<compile_context>
chip_gen: v5e
topology: v5e:2x2
jax: 0.10.0
libtpu: 0.0.40
codegen_flags: <defaults>
</compile_context>

<pallas_src>
import numpy as np
import jax
import jax.numpy as jnp
from jax.experimental import pallas as pl
from jax.experimental.pallas import tpu as pltpu

# ----- model config (small, consistent with the module) -----
NZ = 8          # opt.nz
NGF = 8         # opt.ngf
NC = 4          # opt.nc
ISIZE = 32      # opt.isize
BATCH = 2

B_PAD = 8       # batch padded to a full sublane group
CL_PAD = 384    # every intermediate C*L width (<= 320) padded to 3*128 lanes
C_PAD = 128     # per-channel stats padded to one lane group
EPS = 1e-5

CONV_CFG = [
    # (C_in,     C_out,   K,  stride, pad, L_in, L_out)
    (NZ,        NGF * 4, 10, 1,      0,   1,    10),
    (NGF * 4,   NGF * 2, 4,  2,      1,   10,   20),
    (NGF * 2,   NGF,     4,  2,      1,   20,   40),
    (NGF,       NC,      4,  2,      1,   40,   80),
]

_VMEM = pl.BlockSpec(memory_space=pltpu.MemorySpace.VMEM)


# ----------------------------- fused Pallas kernel -----------------------------

def _decoder_fused_kernel(x_ref, convw_ref, a_ref, atg_ref, vecs_ref, lin_ref,
                          o_ref):
    """Whole Decoder forward. Activations are (B_PAD, CL_PAD) f32 slabs."""
    vecs = vecs_ref[...]                                     # (8, 128) f32
    # Row mask selecting the real batch rows; computed once, reused 3x.
    rowmask = (jax.lax.broadcasted_iota(jnp.int32, (B_PAD, CL_PAD), 0)
               < BATCH).astype(jnp.float32)

    def bn_relu(h, i, n_elems):
        # h: (B_PAD, CL_PAD) f32, channel-major flattening c*L + l on lanes.
        inv_n = 1.0 / n_elems
        hm = h * rowmask                                     # zero padded rows
        stats = jnp.concatenate(
            [jnp.sum(hm, axis=0, keepdims=True),
             jnp.sum(hm * h, axis=0, keepdims=True)], axis=0)            # (2, 384)
        sc = jnp.dot(stats.astype(jnp.bfloat16), a_ref[i],
                     preferred_element_type=jnp.float32)                 # (2, 128)
        mean_c = sc[0:1, :] * inv_n
        var_c = jnp.maximum(sc[1:2, :] * inv_n - mean_c * mean_c, 0.0)
        inv_std = jax.lax.rsqrt(var_c + EPS)                             # (1, 128)
        # atg carries gamma on its rows, so scale_b = gamma*inv_std and
        # off_b = (beta/gamma - mean*inv_std)*gamma = beta - mean*scale.
        off_c = vecs[i:i + 1, :] - mean_c * inv_std
        sb = jnp.dot(jnp.concatenate([inv_std, off_c], axis=0)
                     .astype(jnp.bfloat16),
                     atg_ref[i], preferred_element_type=jnp.float32)     # (2, 384)
        # Padded lanes: h=0, scale_b=0, off_b=0 -> stay exactly 0.
        return jnp.maximum(h * sb[0:1, :] + sb[1:2, :], 0.0)

    # ConvT0: (B_PAD, 384) @ (384, 384)
    h = jnp.dot(x_ref[...].astype(jnp.bfloat16), convw_ref[0],
                preferred_element_type=jnp.float32)
    h = bn_relu(h, 0, BATCH * 10)

    h = jnp.dot(h.astype(jnp.bfloat16), convw_ref[1],
                preferred_element_type=jnp.float32)
    h = bn_relu(h, 1, BATCH * 20)

    h = jnp.dot(h.astype(jnp.bfloat16), convw_ref[2],
                preferred_element_type=jnp.float32)
    h = bn_relu(h, 2, BATCH * 40)

    h = jnp.dot(h.astype(jnp.bfloat16), convw_ref[3],
                preferred_element_type=jnp.float32)

    # Tanh (f32 EUP, v5e-safe) + block-diagonal Linear(80, isize) + bias.
    z = jnp.tanh(h).astype(jnp.bfloat16)
    o_ref[...] = (jnp.dot(z, lin_ref[...],
                          preferred_element_type=jnp.float32)
                  + vecs[3:4, :])


def decoder_forward(x, params):
    # x: (B, nz, 1) with B == BATCH (BN batch statistics are baked for BATCH).
    b = x.shape[0]
    assert b == BATCH, "fused BN stats are built for batch == BATCH"
    x_flat = x.reshape(b, NZ).astype(jnp.float32)
    x_pad = jnp.zeros((B_PAD, CL_PAD), jnp.float32).at[:b, :NZ].set(x_flat)

    out_pad = pl.pallas_call(
        _decoder_fused_kernel,
        out_shape=jax.ShapeDtypeStruct((B_PAD, NC * ISIZE), jnp.float32),
        in_specs=[_VMEM] * 6,
        out_specs=_VMEM,
    )(x_pad, params["convw"], params["bn_A"], params["bn_ATg"],
      params["vecs"], params["lin_bd"])

    # Padded batch rows (2..7) carry BN-offset garbage by design; they never
    # influence the real rows (row-wise matmuls + masked stats) and are
    # dropped here.
    return out_pad[:b, :].reshape(b, NC, ISIZE)


# ----------------------------- parameter setup -----------------------------

def convT_dense_matrix(w, l_in, stride, padding):
    """Exact dense lowering of ConvTranspose1d.

    w: (C_in, C_out, K) PyTorch ConvTranspose1d weight (numpy).
    Returns M of shape (C_in*L_in, C_out*L_out) such that, with channel-major
    flattening, out_flat = x_flat @ M reproduces
      out[b, o, j] = sum_{i,l,t : j = l*stride - padding + t} x[b,i,l]*w[i,o,t].
    """
    c_in, c_out, k = w.shape
    l_out = (l_in - 1) * stride - 2 * padding + k
    wn = np.asarray(w, dtype=np.float32)
    m = np.zeros((c_in * l_in, c_out * l_out), dtype=np.float32)
    m4 = m.reshape(c_in, l_in, c_out, l_out)  # view into m
    for l in range(l_in):
        for t in range(k):
            j = l * stride - padding + t
            if 0 <= j < l_out:
                m4[:, l, :, j] = wn[:, :, t]
    return m


def _pad2(m, rows, cols):
    out = np.zeros((rows, cols), dtype=np.float32)
    out[:m.shape[0], :m.shape[1]] = m
    return out


def init_params(key):
    keys = jax.random.split(key, 12)
    ki = 0
    conv_slabs, a_slabs, atg_slabs = [], [], []
    vecs = np.zeros((B_PAD, C_PAD), dtype=np.float32)

    for idx, (c_in, c_out, k, stride, pad, l_in, l_out) in enumerate(CONV_CFG):
        w = 0.02 * jax.random.normal(keys[ki], (c_in, c_out, k), jnp.float32)
        ki += 1
        dense = convT_dense_matrix(np.asarray(w), l_in, stride, pad)
        conv_slabs.append(_pad2(dense, CL_PAD, CL_PAD))
        if idx < 3:  # BN after the first three transposed convs
            gamma = np.asarray(
                1.0 + 0.02 * jax.random.normal(keys[ki], (c_out,), jnp.float32))
            ki += 1
            beta = np.asarray(
                0.02 * jax.random.normal(keys[ki], (c_out,), jnp.float32))
            ki += 1
            a = np.zeros((CL_PAD, C_PAD), dtype=np.float32)     # 0/1 aggregation
            atg = np.zeros((C_PAD, CL_PAD), dtype=np.float32)   # gamma-folded bcast
            for c in range(c_out):
                a[c * l_out:(c + 1) * l_out, c] = 1.0
                atg[c, c * l_out:(c + 1) * l_out] = gamma[c]
            a_slabs.append(a)
            atg_slabs.append(atg)
            vecs[idx, :c_out] = beta / gamma                    # beta/gamma const

    # Linear(80, isize) on the last axis -> block-diagonal (CL_PAD, NC*ISIZE).
    lin_w = 0.05 * jax.random.normal(keys[ki], (80, ISIZE), jnp.float32)
    ki += 1
    lin_b = 0.05 * jax.random.normal(keys[ki], (ISIZE,), jnp.float32)
    ki += 1
    lbd = np.zeros((CL_PAD, NC * ISIZE), dtype=np.float32)
    w_np = np.asarray(lin_w)
    for c in range(NC):
        lbd[c * 80:(c + 1) * 80, c * ISIZE:(c + 1) * ISIZE] = w_np
    vecs[3, :] = np.tile(np.asarray(lin_b), NC)                 # (NC*ISIZE,) = 128

    return {
        "convw": jnp.asarray(np.stack(conv_slabs), dtype=jnp.bfloat16),
        "bn_A": jnp.asarray(np.stack(a_slabs), dtype=jnp.bfloat16),
        "bn_ATg": jnp.asarray(np.stack(atg_slabs), dtype=jnp.bfloat16),
        "vecs": jnp.asarray(vecs, dtype=jnp.float32),
        "lin_bd": jnp.asarray(lbd, dtype=jnp.bfloat16),
    }


# ----------------------------- main -----------------------------

if __name__ == "__main__":
    key = jax.random.PRNGKey(0)
    k_param, k_input = jax.random.split(key)
    params = init_params(k_param)
    x = jax.random.normal(k_input, (BATCH, NZ, 1), jnp.float32)

    fwd = jax.jit(decoder_forward)
    out = fwd(x, params)
    out = jax.block_until_ready(out)

    assert out.shape == (BATCH, NC, ISIZE), out.shape
    assert out.dtype == jnp.float32
    assert bool(jnp.all(jnp.isfinite(out)))
    print("KERNEL_OK")
</pallas_src>

<mosaic_0001>
module attributes {stable_mosaic.version = 11 : i64} {
  func.func @_decoder_fused_kernel(%arg0: memref<8x384xf32, #tpu.memory_space<vmem>>, %arg1: memref<4x384x384xbf16, #tpu.memory_space<vmem>>, %arg2: memref<3x384x128xbf16, #tpu.memory_space<vmem>>, %arg3: memref<3x128x384xbf16, #tpu.memory_space<vmem>>, %arg4: memref<8x128xf32, #tpu.memory_space<vmem>>, %arg5: memref<384x128xbf16, #tpu.memory_space<vmem>>, %arg6: memref<8x128xf32, #tpu.memory_space<vmem>>) attributes {dimension_semantics = [], scalar_prefetch = 0 : i64, scratch_operands = 0 : i64, tpu.core_type = #tpu.core_type<tc>} {
    %c0 = arith.constant 0 : index
    %c0_0 = arith.constant 0 : index
    %0 = vector.load %arg4[%c0, %c0_0] : memref<8x128xf32, #tpu.memory_space<vmem>>, vector<8x128xf32>
    %1 = tpu.iota {dimensions = array<i32: 0>} : vector<8x384xi32>
    %c2_i32 = arith.constant 2 : i32
    %2 = vector.broadcast %c2_i32 : i32 to vector<8x384xi32>
    %3 = arith.cmpi slt, %1, %2 : vector<8x384xi32>
    %4 = arith.extui %3 : vector<8x384xi1> to vector<8x384xi32>
    %5 = arith.sitofp %4 : vector<8x384xi32> to vector<8x384xf32>
    %c0_1 = arith.constant 0 : index
    %c0_2 = arith.constant 0 : index
    %6 = vector.load %arg0[%c0_1, %c0_2] : memref<8x384xf32, #tpu.memory_space<vmem>>, vector<8x384xf32>
    %7 = arith.truncf %6 : vector<8x384xf32> to vector<8x384xbf16>
    %c0_3 = arith.constant 0 : index
    %c0_4 = arith.constant 0 : index
    %c0_5 = arith.constant 0 : index
    %8 = vector.load %arg1[%c0_3, %c0_4, %c0_5] : memref<4x384x384xbf16, #tpu.memory_space<vmem>>, vector<1x384x384xbf16>
    %9 = vector.shape_cast %8 : vector<1x384x384xbf16> to vector<384x384xbf16>
    %cst = arith.constant dense<0.000000e+00> : vector<8x384xf32>
    %10 = tpu.matmul %7, %9, %cst {dimension_numbers = #tpu.dot_dimension_numbers<[1], [0], [0], [1], [0, 0, 1, 1], [], []>} : vector<8x384xbf16>, vector<384x384xbf16>, vector<8x384xf32> -> vector<8x384xf32>
    %11 = arith.mulf %10, %5 : vector<8x384xf32>
    %cst_6 = arith.constant dense<0.000000e+00> : vector<384xf32>
    %12 = vector.multi_reduction <add>, %11, %cst_6 [0] : vector<8x384xf32> to vector<384xf32>
    %13 = vector.shape_cast %12 : vector<384xf32> to vector<1x384xf32>
    %14 = arith.mulf %11, %10 : vector<8x384xf32>
    %cst_7 = arith.constant dense<0.000000e+00> : vector<384xf32>
    %15 = vector.multi_reduction <add>, %14, %cst_7 [0] : vector<8x384xf32> to vector<384xf32>
    %16 = vector.shape_cast %15 : vector<384xf32> to vector<1x384xf32>
    %17 = tpu.concatenate %13, %16 in 0 : vector<1x384xf32>, vector<1x384xf32> -> vector<2x384xf32>
    %18 = arith.truncf %17 : vector<2x384xf32> to vector<2x384xbf16>
    %c0_8 = arith.constant 0 : index
    %c0_9 = arith.constant 0 : index
    %c0_10 = arith.constant 0 : index
    %19 = vector.load %arg2[%c0_8, %c0_9, %c0_10] : memref<3x384x128xbf16, #tpu.memory_space<vmem>>, vector<1x384x128xbf16>
    %20 = vector.shape_cast %19 : vector<1x384x128xbf16> to vector<384x128xbf16>
    %cst_11 = arith.constant dense<0.000000e+00> : vector<2x128xf32>
    %21 = tpu.matmul %18, %20, %cst_11 {dimension_numbers = #tpu.dot_dimension_numbers<[1], [0], [0], [1], [0, 0, 1, 1], [], []>} : vector<2x384xbf16>, vector<384x128xbf16>, vector<2x128xf32> -> vector<2x128xf32>
    %22 = vector.extract_strided_slice %21 {offsets = [0, 0], sizes = [1, 128], strides = [1, 1]} : vector<2x128xf32> to vector<1x128xf32>
    %cst_12 = arith.constant 5.000000e-02 : f32
    %23 = vector.broadcast %cst_12 : f32 to vector<1x128xf32>
    %24 = arith.mulf %22, %23 : vector<1x128xf32>
    %25 = vector.extract_strided_slice %21 {offsets = [1, 0], sizes = [1, 128], strides = [1, 1]} : vector<2x128xf32> to vector<1x128xf32>
    %cst_13 = arith.constant 5.000000e-02 : f32
    %26 = vector.broadcast %cst_13 : f32 to vector<1x128xf32>
    %27 = arith.mulf %25, %26 : vector<1x128xf32>
    %28 = arith.mulf %24, %24 : vector<1x128xf32>
    %29 = arith.subf %27, %28 : vector<1x128xf32>
    %cst_14 = arith.constant 0.000000e+00 : f32
    %30 = vector.broadcast %cst_14 : f32 to vector<1x128xf32>
    %31 = arith.maximumf %29, %30 : vector<1x128xf32>
    %cst_15 = arith.constant 9.99999974E-6 : f32
    %32 = vector.broadcast %cst_15 : f32 to vector<1x128xf32>
    %33 = arith.addf %31, %32 : vector<1x128xf32>
    %34 = math.rsqrt %33 : vector<1x128xf32>
    %35 = vector.extract_strided_slice %0 {offsets = [0, 0], sizes = [1, 128], strides = [1, 1]} : vector<8x128xf32> to vector<1x128xf32>
    %36 = arith.mulf %24, %34 : vector<1x128xf32>
    %37 = arith.subf %35, %36 : vector<1x128xf32>
    %38 = tpu.concatenate %34, %37 in 0 : vector<1x128xf32>, vector<1x128xf32> -> vector<2x128xf32>
    %39 = arith.truncf %38 : vector<2x128xf32> to vector<2x128xbf16>
    %c0_16 = arith.constant 0 : index
    %c0_17 = arith.constant 0 : index
    %c0_18 = arith.constant 0 : index
    %40 = vector.load %arg3[%c0_16, %c0_17, %c0_18] : memref<3x128x384xbf16, #tpu.memory_space<vmem>>, vector<1x128x384xbf16>
    %41 = vector.shape_cast %40 : vector<1x128x384xbf16> to vector<128x384xbf16>
    %cst_19 = arith.constant dense<0.000000e+00> : vector<2x384xf32>
    %42 = tpu.matmul %39, %41, %cst_19 {dimension_numbers = #tpu.dot_dimension_numbers<[1], [0], [0], [1], [0, 0, 1, 1], [], []>} : vector<2x128xbf16>, vector<128x384xbf16>, vector<2x384xf32> -> vector<2x384xf32>
    %43 = vector.extract_strided_slice %42 {offsets = [0, 0], sizes = [1, 384], strides = [1, 1]} : vector<2x384xf32> to vector<1x384xf32>
    %44 = vector.broadcast %43 : vector<1x384xf32> to vector<8x384xf32>
    %45 = arith.mulf %10, %44 : vector<8x384xf32>
    %46 = vector.extract_strided_slice %42 {offsets = [1, 0], sizes = [1, 384], strides = [1, 1]} : vector<2x384xf32> to vector<1x384xf32>
    %47 = vector.broadcast %46 : vector<1x384xf32> to vector<8x384xf32>
    %48 = arith.addf %45, %47 : vector<8x384xf32>
    %cst_20 = arith.constant 0.000000e+00 : f32
    %49 = vector.broadcast %cst_20 : f32 to vector<8x384xf32>
    %50 = arith.maximumf %48, %49 : vector<8x384xf32>
    %51 = arith.truncf %50 : vector<8x384xf32> to vector<8x384xbf16>
    %c1 = arith.constant 1 : index
    %c0_21 = arith.constant 0 : index
    %c0_22 = arith.constant 0 : index
    %52 = vector.load %arg1[%c1, %c0_21, %c0_22] : memref<4x384x384xbf16, #tpu.memory_space<vmem>>, vector<1x384x384xbf16>
    %53 = vector.shape_cast %52 : vector<1x384x384xbf16> to vector<384x384xbf16>
    %cst_23 = arith.constant dense<0.000000e+00> : vector<8x384xf32>
    %54 = tpu.matmul %51, %53, %cst_23 {dimension_numbers = #tpu.dot_dimension_numbers<[1], [0], [0], [1], [0, 0, 1, 1], [], []>} : vector<8x384xbf16>, vector<384x384xbf16>, vector<8x384xf32> -> vector<8x384xf32>
    %55 = arith.mulf %54, %5 : vector<8x384xf32>
    %cst_24 = arith.constant dense<0.000000e+00> : vector<384xf32>
    %56 = vector.multi_reduction <add>, %55, %cst_24 [0] : vector<8x384xf32> to vector<384xf32>
    %57 = vector.shape_cast %56 : vector<384xf32> to vector<1x384xf32>
    %58 = arith.mulf %55, %54 : vector<8x384xf32>
    %cst_25 = arith.constant dense<0.000000e+00> : vector<384xf32>
    %59 = vector.multi_reduction <add>, %58, %cst_25 [0] : vector<8x384xf32> to vector<384xf32>
    %60 = vector.shape_cast %59 : vector<384xf32> to vector<1x384xf32>
    %61 = tpu.concatenate %57, %60 in 0 : vector<1x384xf32>, vector<1x384xf32> -> vector<2x384xf32>
    %62 = arith.truncf %61 : vector<2x384xf32> to vector<2x384xbf16>
    %c1_26 = arith.constant 1 : index
    %c0_27 = arith.constant 0 : index
    %c0_28 = arith.constant 0 : index
    %63 = vector.load %arg2[%c1_26, %c0_27, %c0_28] : memref<3x384x128xbf16, #tpu.memory_space<vmem>>, vector<1x384x128xbf16>
    %64 = vector.shape_cast %63 : vector<1x384x128xbf16> to vector<384x128xbf16>
    %cst_29 = arith.constant dense<0.000000e+00> : vector<2x128xf32>
    %65 = tpu.matmul %62, %64, %cst_29 {dimension_numbers = #tpu.dot_dimension_numbers<[1], [0], [0], [1], [0, 0, 1, 1], [], []>} : vector<2x384xbf16>, vector<384x128xbf16>, vector<2x128xf32> -> vector<2x128xf32>
    %66 = vector.extract_strided_slice %65 {offsets = [0, 0], sizes = [1, 128], strides = [1, 1]} : vector<2x128xf32> to vector<1x128xf32>
    %cst_30 = arith.constant 2.500000e-02 : f32
    %67 = vector.broadcast %cst_30 : f32 to vector<1x128xf32>
    %68 = arith.mulf %66, %67 : vector<1x128xf32>
    %69 = vector.extract_strided_slice %65 {offsets = [1, 0], sizes = [1, 128], strides = [1, 1]} : vector<2x128xf32> to vector<1x128xf32>
    %cst_31 = arith.constant 2.500000e-02 : f32
    %70 = vector.broadcast %cst_31 : f32 to vector<1x128xf32>
    %71 = arith.mulf %69, %70 : vector<1x128xf32>
    %72 = arith.mulf %68, %68 : vector<1x128xf32>
    %73 = arith.subf %71, %72 : vector<1x128xf32>
    %cst_32 = arith.constant 0.000000e+00 : f32
    %74 = vector.broadcast %cst_32 : f32 to vector<1x128xf32>
    %75 = arith.maximumf %73, %74 : vector<1x128xf32>
    %cst_33 = arith.constant 9.99999974E-6 : f32
    %76 = vector.broadcast %cst_33 : f32 to vector<1x128xf32>
    %77 = arith.addf %75, %76 : vector<1x128xf32>
    %78 = math.rsqrt %77 : vector<1x128xf32>
    %79 = vector.extract_strided_slice %0 {offsets = [1, 0], sizes = [1, 128], strides = [1, 1]} : vector<8x128xf32> to vector<1x128xf32>
    %80 = arith.mulf %68, %78 : vector<1x128xf32>
    %81 = arith.subf %79, %80 : vector<1x128xf32>
    %82 = tpu.concatenate %78, %81 in 0 : vector<1x128xf32>, vector<1x128xf32> -> vector<2x128xf32>
    %83 = arith.truncf %82 : vector<2x128xf32> to vector<2x128xbf16>
    %c1_34 = arith.constant 1 : index
    %c0_35 = arith.constant 0 : index
    %c0_36 = arith.constant 0 : index
    %84 = vector.load %arg3[%c1_34, %c0_35, %c0_36] : memref<3x128x384xbf16, #tpu.memory_space<vmem>>, vector<1x128x384xbf16>
    %85 = vector.shape_cast %84 : vector<1x128x384xbf16> to vector<128x384xbf16>
    %cst_37 = arith.constant dense<0.000000e+00> : vector<2x384xf32>
    %86 = tpu.matmul %83, %85, %cst_37 {dimension_numbers = #tpu.dot_dimension_numbers<[1], [0], [0], [1], [0, 0, 1, 1], [], []>} : vector<2x128xbf16>, vector<128x384xbf16>, vector<2x384xf32> -> vector<2x384xf32>
    %87 = vector.extract_strided_slice %86 {offsets = [0, 0], sizes = [1, 384], strides = [1, 1]} : vector<2x384xf32> to vector<1x384xf32>
    %88 = vector.broadcast %87 : vector<1x384xf32> to vector<8x384xf32>
    %89 = arith.mulf %54, %88 : vector<8x384xf32>
    %90 = vector.extract_strided_slice %86 {offsets = [1, 0], sizes = [1, 384], strides = [1, 1]} : vector<2x384xf32> to vector<1x384xf32>
    %91 = vector.broadcast %90 : vector<1x384xf32> to vector<8x384xf32>
    %92 = arith.addf %89, %91 : vector<8x384xf32>
    %cst_38 = arith.constant 0.000000e+00 : f32
    %93 = vector.broadcast %cst_38 : f32 to vector<8x384xf32>
    %94 = arith.maximumf %92, %93 : vector<8x384xf32>
    %95 = arith.truncf %94 : vector<8x384xf32> to vector<8x384xbf16>
    %c2 = arith.constant 2 : index
    %c0_39 = arith.constant 0 : index
    %c0_40 = arith.constant 0 : index
    %96 = vector.load %arg1[%c2, %c0_39, %c0_40] : memref<4x384x384xbf16, #tpu.memory_space<vmem>>, vector<1x384x384xbf16>
    %97 = vector.shape_cast %96 : vector<1x384x384xbf16> to vector<384x384xbf16>
    %cst_41 = arith.constant dense<0.000000e+00> : vector<8x384xf32>
    %98 = tpu.matmul %95, %97, %cst_41 {dimension_numbers = #tpu.dot_dimension_numbers<[1], [0], [0], [1], [0, 0, 1, 1], [], []>} : vector<8x384xbf16>, vector<384x384xbf16>, vector<8x384xf32> -> vector<8x384xf32>
    %99 = arith.mulf %98, %5 : vector<8x384xf32>
    %cst_42 = arith.constant dense<0.000000e+00> : vector<384xf32>
    %100 = vector.multi_reduction <add>, %99, %cst_42 [0] : vector<8x384xf32> to vector<384xf32>
    %101 = vector.shape_cast %100 : vector<384xf32> to vector<1x384xf32>
    %102 = arith.mulf %99, %98 : vector<8x384xf32>
    %cst_43 = arith.constant dense<0.000000e+00> : vector<384xf32>
    %103 = vector.multi_reduction <add>, %102, %cst_43 [0] : vector<8x384xf32> to vector<384xf32>
    %104 = vector.shape_cast %103 : vector<384xf32> to vector<1x384xf32>
    %105 = tpu.concatenate %101, %104 in 0 : vector<1x384xf32>, vector<1x384xf32> -> vector<2x384xf32>
    %106 = arith.truncf %105 : vector<2x384xf32> to vector<2x384xbf16>
    %c2_44 = arith.constant 2 : index
    %c0_45 = arith.constant 0 : index
    %c0_46 = arith.constant 0 : index
    %107 = vector.load %arg2[%c2_44, %c0_45, %c0_46] : memref<3x384x128xbf16, #tpu.memory_space<vmem>>, vector<1x384x128xbf16>
    %108 = vector.shape_cast %107 : vector<1x384x128xbf16> to vector<384x128xbf16>
    %cst_47 = arith.constant dense<0.000000e+00> : vector<2x128xf32>
    %109 = tpu.matmul %106, %108, %cst_47 {dimension_numbers = #tpu.dot_dimension_numbers<[1], [0], [0], [1], [0, 0, 1, 1], [], []>} : vector<2x384xbf16>, vector<384x128xbf16>, vector<2x128xf32> -> vector<2x128xf32>
    %110 = vector.extract_strided_slice %109 {offsets = [0, 0], sizes = [1, 128], strides = [1, 1]} : vector<2x128xf32> to vector<1x128xf32>
    %cst_48 = arith.constant 1.250000e-02 : f32
    %111 = vector.broadcast %cst_48 : f32 to vector<1x128xf32>
    %112 = arith.mulf %110, %111 : vector<1x128xf32>
    %113 = vector.extract_strided_slice %109 {offsets = [1, 0], sizes = [1, 128], strides = [1, 1]} : vector<2x128xf32> to vector<1x128xf32>
    %cst_49 = arith.constant 1.250000e-02 : f32
    %114 = vector.broadcast %cst_49 : f32 to vector<1x128xf32>
    %115 = arith.mulf %113, %114 : vector<1x128xf32>
    %116 = arith.mulf %112, %112 : vector<1x128xf32>
    %117 = arith.subf %115, %116 : vector<1x128xf32>
    %cst_50 = arith.constant 0.000000e+00 : f32
    %118 = vector.broadcast %cst_50 : f32 to vector<1x128xf32>
    %119 = arith.maximumf %117, %118 : vector<1x128xf32>
    %cst_51 = arith.constant 9.99999974E-6 : f32
    %120 = vector.broadcast %cst_51 : f32 to vector<1x128xf32>
    %121 = arith.addf %119, %120 : vector<1x128xf32>
    %122 = math.rsqrt %121 : vector<1x128xf32>
    %123 = vector.extract_strided_slice %0 {offsets = [2, 0], sizes = [1, 128], strides = [1, 1]} : vector<8x128xf32> to vector<1x128xf32>
    %124 = arith.mulf %112, %122 : vector<1x128xf32>
    %125 = arith.subf %123, %124 : vector<1x128xf32>
    %126 = tpu.concatenate %122, %125 in 0 : vector<1x128xf32>, vector<1x128xf32> -> vector<2x128xf32>
    %127 = arith.truncf %126 : vector<2x128xf32> to vector<2x128xbf16>
    %c2_52 = arith.constant 2 : index
    %c0_53 = arith.constant 0 : index
    %c0_54 = arith.constant 0 : index
    %128 = vector.load %arg3[%c2_52, %c0_53, %c0_54] : memref<3x128x384xbf16, #tpu.memory_space<vmem>>, vector<1x128x384xbf16>
    %129 = vector.shape_cast %128 : vector<1x128x384xbf16> to vector<128x384xbf16>
    %cst_55 = arith.constant dense<0.000000e+00> : vector<2x384xf32>
    %130 = tpu.matmul %127, %129, %cst_55 {dimension_numbers = #tpu.dot_dimension_numbers<[1], [0], [0], [1], [0, 0, 1, 1], [], []>} : vector<2x128xbf16>, vector<128x384xbf16>, vector<2x384xf32> -> vector<2x384xf32>
    %131 = vector.extract_strided_slice %130 {offsets = [0, 0], sizes = [1, 384], strides = [1, 1]} : vector<2x384xf32> to vector<1x384xf32>
    %132 = vector.broadcast %131 : vector<1x384xf32> to vector<8x384xf32>
    %133 = arith.mulf %98, %132 : vector<8x384xf32>
    %134 = vector.extract_strided_slice %130 {offsets = [1, 0], sizes = [1, 384], strides = [1, 1]} : vector<2x384xf32> to vector<1x384xf32>
    %135 = vector.broadcast %134 : vector<1x384xf32> to vector<8x384xf32>
    %136 = arith.addf %133, %135 : vector<8x384xf32>
    %cst_56 = arith.constant 0.000000e+00 : f32
    %137 = vector.broadcast %cst_56 : f32 to vector<8x384xf32>
    %138 = arith.maximumf %136, %137 : vector<8x384xf32>
    %139 = arith.truncf %138 : vector<8x384xf32> to vector<8x384xbf16>
    %c3 = arith.constant 3 : index
    %c0_57 = arith.constant 0 : index
    %c0_58 = arith.constant 0 : index
    %140 = vector.load %arg1[%c3, %c0_57, %c0_58] : memref<4x384x384xbf16, #tpu.memory_space<vmem>>, vector<1x384x384xbf16>
    %141 = vector.shape_cast %140 : vector<1x384x384xbf16> to vector<384x384xbf16>
    %cst_59 = arith.constant dense<0.000000e+00> : vector<8x384xf32>
    %142 = tpu.matmul %139, %141, %cst_59 {dimension_numbers = #tpu.dot_dimension_numbers<[1], [0], [0], [1], [0, 0, 1, 1], [], []>} : vector<8x384xbf16>, vector<384x384xbf16>, vector<8x384xf32> -> vector<8x384xf32>
    %143 = math.tanh %142 : vector<8x384xf32>
    %144 = arith.truncf %143 : vector<8x384xf32> to vector<8x384xbf16>
    %c0_60 = arith.constant 0 : index
    %c0_61 = arith.constant 0 : index
    %145 = vector.load %arg5[%c0_60, %c0_61] : memref<384x128xbf16, #tpu.memory_space<vmem>>, vector<384x128xbf16>
    %cst_62 = arith.constant dense<0.000000e+00> : vector<8x128xf32>
    %146 = tpu.matmul %144, %145, %cst_62 {dimension_numbers = #tpu.dot_dimension_numbers<[1], [0], [0], [1], [0, 0, 1, 1], [], []>} : vector<8x384xbf16>, vector<384x128xbf16>, vector<8x128xf32> -> vector<8x128xf32>
    %147 = vector.extract_strided_slice %0 {offsets = [3, 0], sizes = [1, 128], strides = [1, 1]} : vector<8x128xf32> to vector<1x128xf32>
    %148 = vector.broadcast %147 : vector<1x128xf32> to vector<8x128xf32>
    %149 = arith.addf %146, %148 : vector<8x128xf32>
    %c0_63 = arith.constant 0 : index
    %c0_64 = arith.constant 0 : index
    %150 = vector.load %arg6[%c0_63, %c0_64] : memref<8x128xf32, #tpu.memory_space<vmem>>, vector<8x128xf32>
    tpu.vector_store %arg6[%c0_63, %c0_64], %149 {strides = array<i32>} : memref<8x128xf32, #tpu.memory_space<vmem>>, vector<8x128xf32>,
    return
  }
}

</mosaic_0001>

<bundles_post_ra>
// kernel: decoder_forward.1
= control target key start
LH: loop header
LB: loop body
LE: loop exit
PB: predicated region body
PF: predicated region fallthrough
CT: control target
= control target key end

     0   :  { %11 = vsyncpa [#allocation3], 0  ;;  %s6983_s0 = inlined_call_operand.vmem [shape: f32[8,384], index: 0, kind: input, shape index: {}]   ;;  %s6984_s1 = inlined_call_operand.hbm [shape: bf16[4,384,384], index: 1, kind: input, shape index: {}]   ;;  %s6985_s2 = inlined_call_operand.hbm [shape: bf16[3,384,128], index: 2, kind: input, shape index: {}]   ;;  %s6986_s3 = inlined_call_operand.hbm [shape: bf16[3,128,384], index: 3, kind: input, shape index: {}]   ;;  %s6987_s4 = inlined_call_operand.hbm [shape: f32[8,128], index: 4, kind: input, shape index: {}]   ;;  %s6988_s5 = inlined_call_operand.hbm [shape: bf16[384,128], index: 5, kind: input, shape index: {}]   ;;  %s6989_s6 = inlined_call_operand.vmem [shape: f32[8,128], index: 6, kind: output, shape index: {}]  }
   0x1   :  { %12 = vsyncpa [#allocation5], 0  ;;  %s33_s23 = sshll.u32 %s6985_s2, 4  ;;  %s34_s23 = int_to_ptr.hbm [resolvable:$true] %s33_s23 }
   0x2   :  { %13 = vsyncpa [#allocation8], 0  ;;  %s6759_s24 = smov [#allocation4]   ;;  %s60_s28 = sshll.u32 %s6987_s4, 4  ;;  %s61_s28 = int_to_ptr.hbm [resolvable:$true] %s60_s28 }
   0x3   :  { %s35_s25 = sshll.u32 %s6759_s24, 4  ;;  %s6760_s29 = smov 64   ;;  %s36_s25 = int_to_ptr.vmem [resolvable:$true] %s35_s25 }
   0x4   :  { %s6761_s30 = smov 4   ;;  %s6762_s7 = smov [#allocation7]  }
   0x5   :  { %41 = dma.hbm_to_vmem [thread:$0]  %s34_s23, 9216, %s36_s25, [#allocation5], %s6760_s29, %s6760_s29, %s6761_s30  }
   0x6   :  { %s62_s8 = sshll.u32 %s6762_s7, 4  ;;  %s20_s10 = sshll.u32 %s6984_s1, 4  ;;  %s63_s8 = int_to_ptr.vmem [resolvable:$true] %s62_s8  ;;  %s21_s10 = int_to_ptr.hbm [resolvable:$true] %s20_s10 }
   0x7   :  { %65 = dma.hbm_to_vmem [thread:$0]  %s61_s28, 128, %s63_s8, [#allocation8]  }
   0x8   :  { %s6763_s11 = smov [#allocation2]   ;;  %s46_s14 = sshll.u32 %s6986_s3, 4  ;;  %s47_s14 = int_to_ptr.hbm [resolvable:$true] %s46_s14 }
   0x9   :  { %s22_s12 = sshll.u32 %s6763_s11, 4  ;;  %s6764_s15 = smov 192   ;;  %s23_s12 = int_to_ptr.vmem [resolvable:$true] %s22_s12 }
   0xa   :  { %s6765_s16 = smov 12   ;;  %s6766_s17 = smov [#allocation6]  }
   0xb   :  { %28 = dma.hbm_to_vmem [thread:$0]  %s21_s10, 36864, %s23_s12, [#allocation3], %s6764_s15, %s6764_s15, %s6765_s16  }
   0xc   :  { %s48_s18 = sshll.u32 %s6766_s17, 4  ;;  %s70_s1 = sshll.u32 %s6988_s5, 4  ;;  %s49_s18 = int_to_ptr.vmem [resolvable:$true] %s48_s18  ;;  %s71_s1 = int_to_ptr.hbm [resolvable:$true] %s70_s1 }
   0xd   :  { %54 = dma.hbm_to_vmem [thread:$0]  %s47_s14, 9216, %s49_s18, [#allocation5], %s6764_s15, %s6764_s15, %s6765_s16  }
   0xe   :  { %s6767_s21 = smov [#allocation9]  }
   0xf   :  { %s72_s22 = sshll.u32 %s6767_s21, 4  ;;  %s73_s22 = int_to_ptr.vmem [resolvable:$true] %s72_s22 }
  0x10   :  { %78 = dma.hbm_to_vmem [thread:$0]  %s71_s1, 3072, %s73_s22, [#allocation8], %s6760_s29, %s6760_s29, %s6761_s30  }
  0x11   :  { %6753 = dma.done.wait [#allocation3], 36864  }
  0x12   :  { %6754 = vsyncadd [#allocation3], 4294930432 }
  0x13   :  { %6755 = dma.done.wait [#allocation5], 18432  }
  0x14   :  { %6756 = vsyncadd [#allocation5], 4294948864 }
  0x15   :  { %6757 = dma.done.wait [#allocation8], 3200  }
  0x16   :  { %6758 = vsyncadd [#allocation8], 4294964096  ;;  %v4415_v0 = vld [vmem:[#allocation2 + $0xa8] sm:$0xf]  ;;  %v6175_v1 = vld [vmem:[#allocation2 + $0xb0] sm:$0xf0] }
  0x17   :  { %v4511_v2 = vld [vmem:[#allocation2 + $0x168] sm:$0xf]  ;;  %v4416_v3 = vor.u32 %v6175_v1, %v4415_v0  ;;  %v6199_v4 = vld [vmem:[#allocation2 + $0x170] sm:$0xf0]  ;;  %v4403_v5 = vld [vmem:[#allocation2 + $0x90] sm:$0xf] }
  0x18   :  { %v6172_v6 = vld [vmem:[#allocation2 + $0x98] sm:$0xf0]  ;;  %v4512_v7 = vor.u32 %v6199_v4, %v4511_v2  ;;  %v4499_v8 = vld [vmem:[#allocation2 + $0x150] sm:$0xf]  ;;  %v4607_v10 = vld [vmem:[#allocation2 + $0x228] sm:$0xf] }
  0x19   :  { %v6196_v9 = vld [vmem:[#allocation2 + $0x158] sm:$0xf0]  ;;  %591 = vmatpush.bf16.msra.mxu0 %v4416_v3  ;;  %v4404_v11 = vor.u32 %v6172_v6, %v4403_v5  ;;  %v6223_v12 = vld [vmem:[#allocation2 + $0x230] sm:$0xf0]  ;;  %v4391_v15 = vld [vmem:[#allocation2 + $0x78] sm:$0xf] }
  0x1a   :  { %604 = vmatpush.bf16.msra.mxu1 %v4512_v7  ;;  %v4500_v13 = vor.u32 %v6196_v9, %v4499_v8  ;;  %v4608_v14 = vor.u32 %v6223_v12, %v4607_v10  ;;  %v6169_v16 = vld [vmem:[#allocation2 + $0x80] sm:$0xf0]  ;;  %v4595_v17 = vld [vmem:[#allocation2 + $0x210] sm:$0xf]  ;;  %v4487_v18 = vld [vmem:[#allocation2 + $0x138] sm:$0xf] }
  0x1b   :  { %v6193_v19 = vld [vmem:[#allocation2 + $0x140] sm:$0xf0]  ;;  %v6220_v20 = vld [vmem:[#allocation2 + $0x218] sm:$0xf0]  ;;  %v6174_v22 = vld [vmem:[#allocation2 + $0xac] sm:$0xf]  ;;  %v4392_v24 = vor.u32 %v6169_v16, %v4391_v15 }
  0x1c   :  { %617 = vmatpush.bf16.msra.mxu2 %v4608_v14  ;;  %v4596_v21 = vor.u32 %v6220_v20, %v4595_v17  ;;  %v4417_v23 = vld [vmem:[#allocation2 + $0xb4] sm:$0xf0]  ;;  %v6217_v27 = vld [vmem:[#allocation2 + $0x200] sm:$0xf0]  ;;  %v4488_v28 = vor.u32 %v6193_v19, %v4487_v18  ;;  %v4379_v29 = vld [vmem:[#allocation2 + $0x60] sm:$0xf] }
  0x1d   :  { %592 = vmatpush.bf16.msra.mxu0 %v4404_v11  ;;  %v4420_v25 = vor.u32 %v6174_v22, %v4417_v23  ;;  %v4583_v26 = vld [vmem:[#allocation2 + $0x1f8] sm:$0xf]  ;;  %v6166_v30 = vld [vmem:[#allocation2 + $0x68] sm:$0xf0]  ;;  %v6171_v31 = vld [vmem:[#allocation2 + $0x94] sm:$0xf] }
  0x1e   :  { %605 = vmatpush.bf16.msra.mxu1 %v4500_v13  ;;  %v4475_v32 = vld [vmem:[#allocation2 + $0x120] sm:$0xf]  ;;  %v6190_v33 = vld [vmem:[#allocation2 + $0x128] sm:$0xf0]  ;;  %v4584_v35 = vor.u32 %v6217_v27, %v4583_v26  ;;  %v4380_v38 = vor.u32 %v6166_v30, %v4379_v29  ;;  %v6168_v40 = vld [vmem:[#allocation2 + $0x7c] sm:$0xf] }
  0x1f   :  { %630 = vmatpush.bf16.msra.mxu3 %v4420_v25  ;;  %v4405_v34 = vld [vmem:[#allocation2 + $0x9c] sm:$0xf0]  ;;  %v6214_v39 = vld [vmem:[#allocation2 + $0x1e8] sm:$0xf0]  ;;  %v4393_v41 = vld [vmem:[#allocation2 + $0x84] sm:$0xf0]  ;;  %v4476_v42 = vor.u32 %v6190_v33, %v4475_v32 }
  0x20   :  { %618 = vmatpush.bf16.msra.mxu2 %v4596_v21  ;;  %v4408_v36 = vor.u32 %v6171_v31, %v4405_v34  ;;  %v4571_v37 = vld [vmem:[#allocation2 + $0x1e0] sm:$0xf]  ;;  %v4367_v43 = vld [vmem:[#allocation2 + $0x48] sm:$0xf]  ;;  %v6163_v44 = vld [vmem:[#allocation2 + $0x50] sm:$0xf0]  ;;  %v4396_v47 = vor.u32 %v6168_v40, %v4393_v41 }
  0x21   :  { %593 = vmatpush.bf16.msra.mxu0 %v4392_v24  ;;  %v4463_v45 = vld [vmem:[#allocation2 + $0x108] sm:$0xf]  ;;  %v6187_v46 = vld [vmem:[#allocation2 + $0x110] sm:$0xf0]  ;;  %v4572_v48 = vor.u32 %v6214_v39, %v4571_v37  ;;  %v6165_v49 = vld [vmem:[#allocation2 + $0x64] sm:$0xf]  ;;  %v4368_v51 = vor.u32 %v6163_v44, %v4367_v43 }
  0x22   :  { %606 = vmatpush.bf16.msra.mxu1 %v4488_v28  ;;  %v4381_v50 = vld [vmem:[#allocation2 + $0x6c] sm:$0xf0]  ;;  %v4559_v52 = vld [vmem:[#allocation2 + $0x1c8] sm:$0xf]  ;;  %v6211_v53 = vld [vmem:[#allocation2 + $0x1d0] sm:$0xf0]  ;;  %v4464_v54 = vor.u32 %v6187_v46, %v4463_v45 }
  0x23   :  { %631 = vmatpush.bf16.msra.mxu3 %v4408_v36  ;;  %v4355_v55 = vld [vmem:[#allocation2 + $0x30] sm:$0xf]  ;;  %v6160_v56 = vld [vmem:[#allocation2 + $0x38] sm:$0xf0]  ;;  %v4384_v59 = vor.u32 %v6165_v49, %v4381_v50  ;;  %v4560_v60 = vor.u32 %v6211_v53, %v4559_v52  ;;  %v6162_v61 = vld [vmem:[#allocation2 + $0x4c] sm:$0xf] }
  0x24   :  { %619 = vmatpush.bf16.msra.mxu2 %v4584_v35  ;;  %v4451_v57 = vld [vmem:[#allocation2 + $0xf0] sm:$0xf]  ;;  %v6184_v58 = vld [vmem:[#allocation2 + $0xf8] sm:$0xf0]  ;;  %v4369_v62 = vld [vmem:[#allocation2 + $0x54] sm:$0xf0]  ;;  %v4356_v63 = vor.u32 %v6160_v56, %v4355_v55 }
  0x25   :  { %594 = vmatpush.bf16.msra.mxu0 %v4380_v38  ;;  %v4547_v0 = vld [vmem:[#allocation2 + $0x1b0] sm:$0xf]  ;;  %v6208_v1 = vld [vmem:[#allocation2 + $0x1b8] sm:$0xf0]  ;;  %v4452_v2 = vor.u32 %v6184_v58, %v4451_v57  ;;  %v4343_v3 = vld [vmem:[#allocation2 + $0x18] sm:$0xf]  ;;  %v4372_v7 = vor.u32 %v6162_v61, %v4369_v62 }
  0x26   :  { %607 = vmatpush.bf16.msra.mxu1 %v4476_v42  ;;  %v6157_v4 = vld [vmem:[#allocation2 + $0x20] sm:$0xf0]  ;;  %v4439_v5 = vld [vmem:[#allocation2 + $0xd8] sm:$0xf]  ;;  %v4548_v8 = vor.u32 %v6208_v1, %v4547_v0  ;;  %v6159_v9 = vld [vmem:[#allocation2 + $0x34] sm:$0xf] }
  0x27   :  { %632 = vmatpush.bf16.msra.mxu3 %v4396_v47  ;;  %v6181_v6 = vld [vmem:[#allocation2 + $0xe0] sm:$0xf0]  ;;  %v4357_v10 = vld [vmem:[#allocation2 + $0x3c] sm:$0xf0]  ;;  %v4344_v11 = vor.u32 %v6157_v4, %v4343_v3  ;;  %v4535_v13 = vld [vmem:[#allocation2 + $0x198] sm:$0xf] }
  0x28   :  { %620 = vmatpush.bf16.msra.mxu2 %v4572_v48  ;;  %v4331_v12 = vld [vmem:[#allocation2] sm:$0xf]  ;;  %v6205_v14 = vld [vmem:[#allocation2 + $0x1a0] sm:$0xf0]  ;;  %v4440_v15 = vor.u32 %v6181_v6, %v4439_v5  ;;  %v6154_v16 = vld [vmem:[#allocation2 + $0x8] sm:$0xf0]  ;;  %v4360_v22 = vor.u32 %v6159_v9, %v4357_v10 }
  0x29   :  { %595 = vmatpush.bf16.msra.mxu0 %v4368_v51  ;;  %v6198_v17 = vld [vmem:[#allocation2 + $0x16c] sm:$0xf]  ;;  %v4513_v18 = vld [vmem:[#allocation2 + $0x174] sm:$0xf0]  ;;  %v4427_v19 = vld [vmem:[#allocation2 + $0xc0] sm:$0xf]  ;;  %v4536_v23 = vor.u32 %v6205_v14, %v4535_v13  ;;  %v4332_v27 = vor.u32 %v6154_v16, %v4331_v12 }
  0x2a   :  { %608 = vmatpush.bf16.msra.mxu1 %v4464_v54  ;;  %v6178_v20 = vld [vmem:[#allocation2 + $0xc8] sm:$0xf0]  ;;  %v4609_v24 = vld [vmem:[#allocation2 + $0x234] sm:$0xf0]  ;;  %v6156_v25 = vld [vmem:[#allocation2 + $0x1c] sm:$0xf]  ;;  %v4516_v31 = vor.u32 %v6198_v17, %v4513_v18 }
  0x2b   :  { %633 = vmatpush.bf16.msra.mxu3 %v4384_v59  ;;  %v6222_v21 = vld [vmem:[#allocation2 + $0x22c] sm:$0xf]  ;;  %v4345_v26 = vld [vmem:[#allocation2 + $0x24] sm:$0xf0]  ;;  %v4523_v28 = vld [vmem:[#allocation2 + $0x180] sm:$0xf]  ;;  %v4428_v32 = vor.u32 %v6178_v20, %v4427_v19 }
  0x2c   :  { %621 = vmatpush.bf16.msra.mxu2 %v4560_v60  ;;  %v6202_v29 = vld [vmem:[#allocation2 + $0x188] sm:$0xf0]  ;;  %v105_v30 = vld [vmem:[%s6983_s0] sm:$0xff]  ;;  %v4423_v34 = vld [vmem:[#allocation2 + $0xb0] sm:$0xf]  ;;  %v4612_v36 = vor.u32 %v6222_v21, %v4609_v24  ;;  %v4348_v39 = vor.u32 %v6156_v25, %v4345_v26  ;;  %vm750_vm1 = vcmask 1040384  }
  0x2d   :  { %596 = vmatpush.bf16.msra.mxu0 %v4356_v63  ;;  %v106_v33 = vld [vmem:[%s6983_s0 + $0x8] sm:$0xff]  ;;  %v6176_v35 = vld [vmem:[#allocation2 + $0xb8] sm:$0xf0]  ;;  %v6195_v37 = vld [vmem:[#allocation2 + $0x154] sm:$0xf]  ;;  %v4524_v40 = vor.u32 %v6202_v29, %v4523_v28  ;;  %v6834_v44 = vpack.c.bf16 %v105_v30, %v105_v30 }
  0x2e   :  { %609 = vmatpush.bf16.msra.mxu1 %v4452_v2  ;;  %v4501_v38 = vld [vmem:[#allocation2 + $0x15c] sm:$0xf0]  ;;  %v6219_v41 = vld [vmem:[#allocation2 + $0x214] sm:$0xf]  ;;  %v6836_v45 = vpack.c.bf16 %v106_v33, %v106_v33  ;;  %v6153_v46 = vld [vmem:[#allocation2 + $0x4] sm:$0xf]  ;;  %v4424_v48 = vor.u32 %v6176_v35, %v4423_v34 }
  0x2f   :  { %634 = vmatpush.bf16.msra.mxu3 %v4372_v7  ;;  %v4597_v42 = vld [vmem:[#allocation2 + $0x21c] sm:$0xf0]  ;;  %v107_v43 = vld [vmem:[%s6983_s0 + $0x10] sm:$0xff]  ;;  %v4504_v50 = vor.u32 %v6195_v37, %v4501_v38  ;;  %v6200_v51 = vld [vmem:[#allocation2 + $0x178] sm:$0xf0] }
  0x30   :  { %622 = vmatpush.bf16.msra.mxu2 %v4548_v8  ;;  %v4333_v47 = vld [vmem:[#allocation2 + $0xc] sm:$0xf0]  ;;  %v4411_v52 = vld [vmem:[#allocation2 + $0x98] sm:$0xf]  ;;  %v6173_v53 = vld [vmem:[#allocation2 + $0xa0] sm:$0xf0]  ;;  %v4600_v54 = vor.u32 %v6219_v41, %v4597_v42  ;;  %v6838_v55 = vpack.c.bf16 %v107_v43, %v107_v43 }
  0x31   :  { %597 = vmatpush.bf16.msra.mxu0 %v4344_v11  ;;  %v4519_v49 = vld [vmem:[#allocation2 + $0x170] sm:$0xf]  ;;  %v6192_v56 = vld [vmem:[#allocation2 + $0x13c] sm:$0xf]  ;;  %v4489_v57 = vld [vmem:[#allocation2 + $0x144] sm:$0xf0]  ;;  %v4336_v60 = vor.u32 %v6153_v46, %v4333_v47  ;;  %v4412_v62 = vor.u32 %v6173_v53, %v4411_v52 }
  0x32   :  { %610 = vmatpush.bf16.msra.mxu1 %v4440_v15  ;;  %v6216_v58 = vld [vmem:[#allocation2 + $0x1fc] sm:$0xf]  ;;  %v4585_v59 = vld [vmem:[#allocation2 + $0x204] sm:$0xf0]  ;;  %v4520_v61 = vor.u32 %v6200_v51, %v4519_v49  ;;  %v4507_v63 = vld [vmem:[#allocation2 + $0x158] sm:$0xf]  ;;  %v4492_v0 = vor.u32 %v6192_v56, %v4489_v57 }
  0x33   :  { %635 = vmatpush.bf16.msra.mxu3 %v4360_v22  ;;  %v6197_v1 = vld [vmem:[#allocation2 + $0x160] sm:$0xf0]  ;;  %v4399_v2 = vld [vmem:[#allocation2 + $0x80] sm:$0xf]  ;;  %v6170_v3 = vld [vmem:[#allocation2 + $0x88] sm:$0xf0]  ;;  %v4588_v4 = vor.u32 %v6216_v58, %v4585_v59 }
  0x34   :  { %623 = vmatpush.bf16.msra.mxu2 %v4536_v23  ;;  %v6189_v5 = vld [vmem:[#allocation2 + $0x124] sm:$0xf]  ;;  %v4477_v6 = vld [vmem:[#allocation2 + $0x12c] sm:$0xf0]  ;;  %v4508_v9 = vor.u32 %v6197_v1, %v4507_v63  ;;  %v4400_v10 = vor.u32 %v6170_v3, %v4399_v2  ;;  %v4495_v11 = vld [vmem:[#allocation2 + $0x140] sm:$0xf] }
  0x35   :  { %598 = vmatpush.bf16.msra.mxu0 %v4332_v27  ;;  %v6213_v7 = vld [vmem:[#allocation2 + $0x1e4] sm:$0xf]  ;;  %v4573_v8 = vld [vmem:[#allocation2 + $0x1ec] sm:$0xf0]  ;;  %v4480_v12 = vor.u32 %v6189_v5, %v4477_v6  ;;  %v6194_v13 = vld [vmem:[#allocation2 + $0x148] sm:$0xf0] }
  0x36   :  { %611 = vmatpush.bf16.msra.mxu1 %v4428_v32  ;;  %v4387_v14 = vld [vmem:[#allocation2 + $0x68] sm:$0xf]  ;;  %v6167_v15 = vld [vmem:[#allocation2 + $0x70] sm:$0xf0]  ;;  %v4576_v16 = vor.u32 %v6213_v7, %v4573_v8  ;;  %v6186_v17 = vld [vmem:[#allocation2 + $0x10c] sm:$0xf]  ;;  %v4496_v21 = vor.u32 %v6194_v13, %v4495_v11 }
  0x37   :  { %636 = vmatpush.bf16.msra.mxu3 %v4348_v39  ;;  %v4465_v18 = vld [vmem:[#allocation2 + $0x114] sm:$0xf0]  ;;  %v6210_v19 = vld [vmem:[#allocation2 + $0x1cc] sm:$0xf]  ;;  %v4388_v22 = vor.u32 %v6167_v15, %v4387_v14  ;;  %v4483_v23 = vld [vmem:[#allocation2 + $0x128] sm:$0xf] }
  0x38   :  { %624 = vmatpush.bf16.msra.mxu2 %v4524_v40  ;;  %599 = vmatmul.bf16.vlgmr.msra.gmra.mxu0 %v6834_v44  ;;  %v4561_v20 = vld [vmem:[#allocation2 + $0x1d4] sm:$0xf0]  ;;  %v4468_v24 = vor.u32 %v6186_v17, %v4465_v18  ;;  %v6191_v25 = vld [vmem:[#allocation2 + $0x130] sm:$0xf0]  ;;  %v4375_v26 = vld [vmem:[#allocation2 + $0x50] sm:$0xf] }
  0x39   :  { %643 = vmatpush.bf16.msrb.mxu0 %v4516_v31  ;;  %612 = vmatmul.bf16.vlgmr.msra.gmra.mxu1 %v6836_v45  ;;  %v6164_v27 = vld [vmem:[#allocation2 + $0x58] sm:$0xf0]  ;;  %v4564_v28 = vor.u32 %v6210_v19, %v4561_v20  ;;  %v6183_v29 = vld [vmem:[#allocation2 + $0xf4] sm:$0xf]  ;;  %v4453_v30 = vld [vmem:[#allocation2 + $0xfc] sm:$0xf0]  ;;  %v4484_v33 = vor.u32 %v6191_v25, %v4483_v23 }
  0x3a   :  { %656 = vmatpush.bf16.msrb.mxu1 %v4612_v36  ;;  %v6207_v31 = vld [vmem:[#allocation2 + $0x1b4] sm:$0xf]  ;;  %v4549_v32 = vld [vmem:[#allocation2 + $0x1bc] sm:$0xf0]  ;;  %v4376_v34 = vor.u32 %v6164_v27, %v4375_v26  ;;  %v4471_v35 = vld [vmem:[#allocation2 + $0x110] sm:$0xf]  ;;  %v4456_v36 = vor.u32 %v6183_v29, %v4453_v30 }
  0x3b   :  { %625 = vmatmul.bf16.vlgmr.msra.gmra.mxu2 %v6838_v55  ;;  %637 = vmatpush.bf16.msra.mxu3 %v4336_v60  ;;  %v6188_v37 = vld [vmem:[#allocation2 + $0x118] sm:$0xf0]  ;;  %v4363_v38 = vld [vmem:[#allocation2 + $0x38] sm:$0xf]  ;;  %v6161_v39 = vld [vmem:[#allocation2 + $0x40] sm:$0xf0]  ;;  %v4552_v40 = vor.u32 %v6207_v31, %v4549_v32 }
  0x3c   :  { %669 = vmatpush.bf16.msrb.mxu2 %v4424_v48  ;;  %v6180_v41 = vld [vmem:[#allocation2 + $0xdc] sm:$0xf]  ;;  %v4441_v42 = vld [vmem:[#allocation2 + $0xe4] sm:$0xf0]  ;;  %v4472_v47 = vor.u32 %v6188_v37, %v4471_v35  ;;  %v4364_v48 = vor.u32 %v6161_v39, %v4363_v38  ;;  %v4459_v49 = vld [vmem:[#allocation2 + $0xf8] sm:$0xf] }
  0x3d   :  { %644 = vmatpush.bf16.msrb.mxu0 %v4504_v50  ;;  %v6204_v43 = vld [vmem:[#allocation2 + $0x19c] sm:$0xf]  ;;  %v4537_v46 = vld [vmem:[#allocation2 + $0x1a4] sm:$0xf0]  ;;  %v4444_v50 = vor.u32 %v6180_v41, %v4441_v42  ;;  %v6185_v51 = vld [vmem:[#allocation2 + $0x100] sm:$0xf0]  ;;  %v100_v42 = vlaneseq }
  0x3e   :  { %657 = vmatpush.bf16.msrb.mxu1 %v4600_v54  ;;  %638 = vmatmul.bf16.vlgmr.msra.gmra.mxu3 %v6834_v44  ;;  %v4351_v52 = vld [vmem:[#allocation2 + $0x20] sm:$0xf]  ;;  %v6158_v53 = vld [vmem:[#allocation2 + $0x28] sm:$0xf0]  ;;  %v4540_v54 = vor.u32 %v6204_v43, %v4537_v46  ;;  %v6177_v56 = vld [vmem:[#allocation2 + $0xc4] sm:$0xf] }
  0x3f   :  { %682 = vmatpush.bf16.msrb.mxu3 %v4520_v61  ;;  %v4429_v57 = vld [vmem:[#allocation2 + $0xcc] sm:$0xf0]  ;;  %v6224_v59 = vld [vmem:[#allocation2 + $0x238] sm:$0xf0]  ;;  %v6201_v60 = vld [vmem:[#allocation2 + $0x184] sm:$0xf]  ;;  %v4352_v63 = vor.u32 %v6158_v53, %v4351_v52 }
  0x40   :  { %670 = vmatpush.bf16.msrb.mxu2 %v4412_v62  ;;  %v4615_v58 = vld [vmem:[#allocation2 + $0x230] sm:$0xf]  ;;  %v4460_v62 = vor.u32 %v6185_v51, %v4459_v49  ;;  %v4447_v1 = vld [vmem:[#allocation2 + $0xe0] sm:$0xf]  ;;  %v6182_v2 = vld [vmem:[#allocation2 + $0xe8] sm:$0xf0] }
  0x41   :  { %645 = vmatpush.bf16.msrb.mxu0 %v4492_v0  ;;  %v4525_v61 = vld [vmem:[#allocation2 + $0x18c] sm:$0xf0]  ;;  %v4432_v0 = vor.u32 %v6177_v56, %v4429_v57  ;;  %v4616_v3 = vor.u32 %v6224_v59, %v4615_v58  ;;  %v4339_v5 = vld [vmem:[#allocation2 + $0x8] sm:$0xf]  ;;  %v6155_v6 = vld [vmem:[#allocation2 + $0x10] sm:$0xf0] }
  0x42   :  { %658 = vmatpush.bf16.msrb.mxu1 %v4588_v4  ;;  %v4528_v4 = vor.u32 %v6201_v60, %v4525_v61  ;;  %v4603_v7 = vld [vmem:[#allocation2 + $0x218] sm:$0xf]  ;;  %v6221_v8 = vld [vmem:[#allocation2 + $0x220] sm:$0xf0]  ;;  %v4435_v11 = vld [vmem:[#allocation2 + $0xc8] sm:$0xf] }
  0x43   :  { %683 = vmatpush.bf16.msrb.mxu3 %v4508_v9  ;;  %v4448_v9 = vor.u32 %v6182_v2, %v4447_v1  ;;  %v6232_v13 = vld [vmem:[#allocation4 + $0x38] sm:$0xff]  ;;  %v4604_v14 = vor.u32 %v6221_v8, %v4603_v7  ;;  %v4591_v15 = vld [vmem:[#allocation2 + $0x200] sm:$0xf]  ;;  %v6231_v17 = vld [vmem:[#allocation4 + $0x30] sm:$0xff]  ;;  %v6768_v52 = vmov 0.0  }
  0x44   :  { %671 = vmatpush.bf16.msrb.mxu2 %v4400_v10  ;;  %v4340_v10 = vor.u32 %v6155_v6, %v4339_v5  ;;  %v4579_v20 = vld [vmem:[#allocation2 + $0x1e8] sm:$0xf]  ;;  %v4567_v23 = vld [vmem:[#allocation2 + $0x1d0] sm:$0xf]  ;;  %v4555_v26 = vld [vmem:[#allocation2 + $0x1b8] sm:$0xf] }
  0x45   :  { %646 = vmatpush.bf16.msrb.mxu0 %v4480_v12  ;;  %v6179_v12 = vld [vmem:[#allocation2 + $0xd0] sm:$0xf0]  ;;  %v6209_v27 = vld [vmem:[#allocation2 + $0x1c0] sm:$0xf0]  ;;  %v4543_v29 = vld [vmem:[#allocation2 + $0x1a0] sm:$0xf] }
  0x46   :  { %659 = vmatpush.bf16.msrb.mxu1 %v4576_v16  ;;  %v6218_v16 = vld [vmem:[#allocation2 + $0x208] sm:$0xf0]  ;;  %v4436_v18 = vor.u32 %v6179_v12, %v4435_v11  ;;  %v4531_v32 = vld [vmem:[#allocation2 + $0x188] sm:$0xf]  ;;  %v6228_v35 = vld [vmem:[#allocation4 + $0x18] sm:$0xff] }
  0x47   :  { %684 = vmatpush.bf16.msrb.mxu3 %v4496_v21  ;;  %v4592_v19 = vor.u32 %v6218_v16, %v4591_v15  ;;  %v6215_v21 = vld [vmem:[#allocation2 + $0x1f0] sm:$0xf0]  ;;  %v6206_v30 = vld [vmem:[#allocation2 + $0x1a8] sm:$0xf0]  ;;  %v6225_v41 = vld [vmem:[#allocation4] sm:$0xff] }
  0x48   :  { %672 = vmatpush.bf16.msrb.mxu2 %v4388_v22  ;;  %v4580_v22 = vor.u32 %v6215_v21, %v4579_v20  ;;  %v4544_v31 = vor.u32 %v6206_v30, %v4543_v29  ;;  %v6227_v37 = vld [vmem:[#allocation4 + $0x10] sm:$0xff]  ;;  %v6226_v39 = vld [vmem:[#allocation4 + $0x8] sm:$0xff]  ;;  %v6237_v43 = vld [vmem:[#allocation4 + $0x60] sm:$0xff] }
  0x49   :  { %647 = vmatpush.bf16.msrb.mxu0 %v4468_v24  ;;  %v6212_v24 = vld [vmem:[#allocation2 + $0x1d8] sm:$0xf0]  ;;  %v6239_v38 = vld [vmem:[#allocation4 + $0x70] sm:$0xff]  ;;  %v6234_v59 = vld [vmem:[#allocation4 + $0x48] sm:$0xff] }
  0x4a   :  { %660 = vmatpush.bf16.msrb.mxu1 %v4564_v28  ;;  %v4568_v25 = vor.u32 %v6212_v24, %v4567_v23  ;;  %v4556_v28 = vor.u32 %v6209_v27, %v4555_v26  ;;  %v6235_v51 = vld [vmem:[#allocation4 + $0x50] sm:$0xff]  ;;  %v6233_v2 = vld [vmem:[#allocation4 + $0x40] sm:$0xff] }
  0x4b   :  { %685 = vmatpush.bf16.msrb.mxu3 %v4484_v33  ;;  %v6203_v33 = vld [vmem:[#allocation2 + $0x190] sm:$0xf0]  ;;  %v6245_v16 = vld [vmem:[#allocation4 + $0xa0] sm:$0xff] }
  0x4c   :  { %673 = vmatpush.bf16.msrb.mxu2 %v4376_v34  ;;  %v6229_v34 = vld [vmem:[#allocation4 + $0x20] sm:$0xff]  ;;  %v6247_v6 = vld [vmem:[#allocation4 + $0xb0] sm:$0xff] }
  0x4d   :  { %648 = vmatpush.bf16.msrb.mxu0 %v4456_v36  ;;  %v6240_v36 = vld [vmem:[#allocation4 + $0x78] sm:$0xff] }
  0x4e   :  { %661 = vmatpush.bf16.msrb.mxu1 %v4552_v40  ;;  %v6238_v40 = vld [vmem:[#allocation4 + $0x68] sm:$0xff] }
  0x4f   :  { %686 = vmatpush.bf16.msrb.mxu3 %v4472_v47  ;;  %v101_v47 = vshrl.u32 %v100_v42, 7 }
  0x50   :  { %674 = vmatpush.bf16.msrb.mxu2 %v4364_v48  ;;  %v6236_v48 = vld [vmem:[#allocation4 + $0x58] sm:$0xff] }
  0x51   :  { %649 = vmatpush.bf16.msrb.mxu0 %v4444_v50  ;;  %vm102_vm0 = vcmp.lt.s32.totalorder %v101_v47, 2 }
  0x52   :  { %662 = vmatpush.bf16.msrb.mxu1 %v4540_v54  ;;  %v6849_v53 = vsel %vm102_vm0, 1.0, %v6768_v52 }
  0x53   :  { %687 = vmatpush.bf16.msrb.mxu3 %v4460_v62 }
  0x54   :  { %675 = vmatpush.bf16.msrb.mxu2 %v4352_v63  ;;  %v6248_v63 = vld [vmem:[#allocation4 + $0xb8] sm:$0xff] }
  0x55   :  { %650 = vmatpush.bf16.msrb.mxu0 %v4432_v0 }
  0x56   :  { %663 = vmatpush.bf16.msrb.mxu1 %v4528_v4 }
  0x57   :  { %688 = vmatpush.bf16.msrb.mxu3 %v4448_v9 }
  0x58   :  { %651 = vmatmul.bf16.vlgmr.msrb.gmra.mxu0 %v6836_v45  ;;  %676 = vmatpush.bf16.msrb.mxu2 %v4340_v10  ;;  %v6246_v10 = vld [vmem:[#allocation4 + $0xa8] sm:$0xff] }
  0x59   :  { %695 = vmatpush.bf16.msra.mxu0 %v4616_v3  ;;  %664 = vmatmul.bf16.vlgmr.msrb.gmra.mxu1 %v6838_v55 }
  0x5a   :  { %949 = vmatpush.bf16.msra.mxu1 %v6232_v13 }
  0x5b   :  { %689 = vmatpush.bf16.msrb.mxu3 %v4436_v18  ;;  %677 = vmatmul.bf16.vlgmr.msrb.gmra.mxu2 %v6834_v44  ;;  %v4532_v44 = vor.u32 %v6203_v33, %v4531_v32  ;;  %v6242_v33 = vld [vmem:[#allocation4 + $0x88] sm:$0xff] }
  0x5c   :  { %962 = vmatpush.bf16.msra.mxu2 %v6240_v36 }
  0x5d   :  { %696 = vmatpush.bf16.msra.mxu0 %v4604_v14 }
  0x5e   :  { %950 = vmatpush.bf16.msra.mxu1 %v6231_v17  ;;  %690 = vmatmul.bf16.vlgmr.msrb.gmra.mxu3 %v6836_v45  ;;  %v6230_v45 = vld [vmem:[#allocation4 + $0x28] sm:$0xff] }
  0x5f   :  { %975 = vmatpush.bf16.msra.mxu3 %v6248_v63 }
  0x60   :  { %963 = vmatpush.bf16.msra.mxu2 %v6239_v38 }
  0x61   :  { %697 = vmatpush.bf16.msra.mxu0 %v4592_v19 }
  0x62   :  { %951 = vmatpush.bf16.msra.mxu1 %v6230_v45 }
  0x63   :  { %976 = vmatpush.bf16.msra.mxu3 %v6247_v6 }
  0x64   :  { %964 = vmatpush.bf16.msra.mxu2 %v6238_v40 }
  0x65   :  { %698 = vmatpush.bf16.msra.mxu0 %v4580_v22  ;;  %v6244_v22 = vld [vmem:[#allocation4 + $0x98] sm:$0xff] }
  0x66   :  { %952 = vmatpush.bf16.msra.mxu1 %v6229_v34 }
  0x67   :  { %977 = vmatpush.bf16.msra.mxu3 %v6246_v10  ;;  %v4799_v10 = vld [vmem:[#allocation6 + $0xa8] sm:$0xf] }
  0x68   :  { %965 = vmatpush.bf16.msra.mxu2 %v6237_v43 }
  0x69   :  { %699 = vmatpush.bf16.msra.mxu0 %v4568_v25  ;;  %v6243_v25 = vld [vmem:[#allocation4 + $0x90] sm:$0xff] }
  0x6a   :  { %953 = vmatpush.bf16.msra.mxu1 %v6228_v35 }
  0x6b   :  { %978 = vmatpush.bf16.msra.mxu3 %v6245_v16  ;;  %v6272_v16 = vld [vmem:[#allocation6 + $0xb8] sm:$0xf0] }
  0x6c   :  { %966 = vmatpush.bf16.msra.mxu2 %v6236_v48 }
  0x6d   :  { %700 = vmatpush.bf16.msra.mxu0 %v4556_v28 }
  0x6e   :  { %954 = vmatpush.bf16.msra.mxu1 %v6227_v37  ;;  %v6241_v37 = vld [vmem:[#allocation4 + $0x80] sm:$0xff] }
  0x6f   :  { %979 = vmatpush.bf16.msra.mxu3 %v6244_v22  ;;  %v6267_v22 = vld [vmem:[#allocation6 + $0x94] sm:$0xf] }
  0x70   :  { %967 = vmatpush.bf16.msra.mxu2 %v6235_v51 }
  0x71   :  { %701 = vmatpush.bf16.msra.mxu0 %v4544_v31 }
  0x72   :  { %955 = vmatpush.bf16.msra.mxu1 %v6226_v39 }
  0x73   :  { %980 = vmatpush.bf16.msra.mxu3 %v6243_v25  ;;  %v4789_v25 = vld [vmem:[#allocation6 + $0x9c] sm:$0xf0] }
  0x74   :  { %968 = vmatpush.bf16.msra.mxu2 %v6234_v59 }
  0x75   :  { %702 = vmatpush.bf16.msra.mxu0 %v4532_v44 }
  0x76   :  { %956 = vmatpush.bf16.msra.mxu1 %v6225_v41 }
  0x77   :  { %981 = vmatpush.bf16.msra.mxu3 %v6242_v33 }
  0x78   :  { %703 = vmatmul.bf16.vlgmr.msra.gmra.mxu0 %v6838_v55  ;;  %969 = vmatpush.bf16.msra.mxu2 %v6233_v2 }
  0x7b   :  { %982 = vmatpush.bf16.msra.mxu3 %v6241_v37  ;;  %v4763_v37 = vld [vmem:[#allocation6 + $0x60] sm:$0xf] }
  0xb5   :  { %v600_v55 = vpop.f32.mrf.mxu0 }
  0xb6   :  { %v613_v46 = vpop.f32.mrf.mxu1 }
  0xb7   :  { %v614_v49 = vadd.f32 %v613_v46, %v600_v55 }
  0xbd   :  { %v602_v50 = vpop.f32.mrf.mxu0 }
  0xbe   :  { %v626_v54 = vpop.f32.mrf.mxu2  ;;  %v615_v56 = vpop.f32.mrf.mxu1 }
  0xbf   :  { %v6851_v57 = vadd.f32 %v626_v54, %v614_v49 }
  0xc1   :  { %v708_v58 = vmul.f32 %v6849_v53, %v6851_v57  ;;  %v639_v60 = vpop.f32.mrf.mxu3 }
  0xc3   :  { %v711_v61 = vrot.slane %v708_v58, 4  ;;  %v729_v62 = vmul.f32 %v708_v58, %v6851_v57 }
  0xc5   :  { %v712_v0 = vadd.f32 %v711_v61, %v708_v58  ;;  %v732_v1 = vrot.slane %v729_v62, 4 }
  0xc6   :  { %v628_v3 = vpop.f32.mrf.mxu2 }
  0xc7   :  { %v713_v4 = vrot.slane %v712_v0, 2  ;;  %v733_v5 = vadd.f32 %v732_v1, %v729_v62 }
  0xc9   :  { %v714_v7 = vadd.f32 %v713_v4, %v712_v0  ;;  %v734_v8 = vrot.slane %v733_v5, 2  ;;  %v641_v9 = vpop.f32.mrf.mxu3 }
  0xcb   :  { %v715_v11 = vrot.slane %v714_v7, 1  ;;  %v735_v12 = vadd.f32 %v734_v8, %v733_v5 }
  0xcd   :  { %v736_v13 = vrot.slane %v735_v12, 1  ;;  %v716_v14 = vadd.f32 %v715_v11, %v714_v7  ;;  %v6271_v11 = vld [vmem:[#allocation6 + $0xb0] sm:$0xf0] }
  0xcf   :  { %v737_v15 = vadd.f32 %v736_v13, %v735_v12  ;;  %v6270_v12 = vld [vmem:[#allocation6 + $0xac] sm:$0xf]  ;;  %v4800_v13 = vor.u32 %v6271_v11, %v4799_v10  ;;  %v4727_v10 = vld [vmem:[#allocation6 + $0x18] sm:$0xf]  ;;  %v6253_v11 = vld [vmem:[#allocation6 + $0x20] sm:$0xf0] }
  0xd1   :  { %v751_v17 = vsel %vm750_vm1, %v716_v14, %v737_v15  ;;  %v4801_v14 = vld [vmem:[#allocation6 + $0xb4] sm:$0xf0]  ;;  %v4807_v15 = vld [vmem:[#allocation6 + $0xb0] sm:$0xf]  ;;  %1176 = vmatpush.bf16.msrb.mxu0 %v4800_v13 }
  0xd2   :  { %v754_v19 = vpack.c.bf16 %v751_v17, %v751_v17  ;;  %v4804_v17 = vor.u32 %v6270_v12, %v4801_v14  ;;  %v6252_v12 = vld [vmem:[#allocation6 + $0x1c] sm:$0xf]  ;;  %v4728_v14 = vor.u32 %v6253_v11, %v4727_v10  ;;  %v6283_v10 = vld [vmem:[#allocation2 + $0x290] sm:$0xf0] }
  0xd4   :  { %957 = vmatmul.bf16.vlgmr.msra.gmra.mxu1 %v754_v19 }
  0xd5   :  { %v652_v18 = vpop.f32.mrf.mxu0  ;;  %1189 = vmatpush.bf16.msrb.mxu1 %v4804_v17 }
  0xd6   :  { %v653_v20 = vadd.f32 %v652_v18, %v639_v60  ;;  %v665_v21 = vpop.f32.mrf.mxu1  ;;  %v4808_v18 = vor.u32 %v6272_v16, %v4807_v15  ;;  %v4729_v15 = vld [vmem:[#allocation6 + $0x24] sm:$0xf0]  ;;  %v4735_v16 = vld [vmem:[#allocation6 + $0x20] sm:$0xf] }
  0xd8   :  { %v6857_v23 = vadd.f32 %v665_v21, %v653_v20  ;;  %1202 = vmatpush.bf16.msrb.mxu2 %v4808_v18  ;;  %v4787_v20 = vld [vmem:[#allocation6 + $0x90] sm:$0xf]  ;;  %v6268_v21 = vld [vmem:[#allocation6 + $0x98] sm:$0xf0] }
  0xda   :  { %v709_v24 = vmul.f32 %v6849_v53, %v6857_v23 }
  0xdc   :  { %v717_v26 = vrot.slane %v709_v24, 4  ;;  %v730_v27 = vmul.f32 %v709_v24, %v6857_v23 }
  0xdd   :  { %v654_v28 = vpop.f32.mrf.mxu0 }
  0xde   :  { %v718_v29 = vadd.f32 %v717_v26, %v709_v24  ;;  %v738_v30 = vrot.slane %v730_v27, 4  ;;  %v667_v31 = vpop.f32.mrf.mxu1  ;;  %v678_v32 = vpop.f32.mrf.mxu2  ;;  %v4788_v24 = vor.u32 %v6268_v21, %v4787_v20  ;;  %v4795_v26 = vld [vmem:[#allocation6 + $0x98] sm:$0xf]  ;;  %v4792_v28 = vor.u32 %v6267_v22, %v4789_v25  ;;  %v6250_v20 = vld [vmem:[#allocation6 + $0x8] sm:$0xf0] }
  0xdf   :  { %v6265_v31 = vld [vmem:[#allocation6 + $0x80] sm:$0xf0]  ;;  %v4717_v25 = vld [vmem:[#allocation6 + $0xc] sm:$0xf0] }
  0xe0   :  { %v719_v44 = vrot.slane %v718_v29, 2  ;;  %v739_v45 = vadd.f32 %v738_v30, %v730_v27  ;;  %v6269_v27 = vld [vmem:[#allocation6 + $0xa0] sm:$0xf0]  ;;  %1177 = vmatpush.bf16.msrb.mxu0 %v4788_v24  ;;  %1190 = vmatpush.bf16.msrb.mxu1 %v4792_v28  ;;  %v4775_v30 = vld [vmem:[#allocation6 + $0x78] sm:$0xf] }
  0xe1   :  { %v691_v36 = vpop.f32.mrf.mxu3  ;;  %v4776_v33 = vor.u32 %v6265_v31, %v4775_v30  ;;  %v6249_v21 = vld [vmem:[#allocation6 + $0x4] sm:$0xf] }
  0xe2   :  { %v720_v34 = vadd.f32 %v719_v44, %v718_v29  ;;  %v740_v35 = vrot.slane %v739_v45, 2  ;;  %v692_v48 = vadd.f32 %v691_v36, %v678_v32  ;;  %v4796_v29 = vor.u32 %v6269_v27, %v4795_v26  ;;  %v6264_v32 = vld [vmem:[#allocation6 + $0x7c] sm:$0xf]  ;;  %v4777_v44 = vld [vmem:[#allocation6 + $0x84] sm:$0xf0] }
  0xe3   :  { %v4723_v26 = vld [vmem:[#allocation6 + $0x8] sm:$0xf]  ;;  %v4720_v28 = vor.u32 %v6249_v21, %v4717_v25  ;;  %v6280_v25 = vld [vmem:[#allocation2 + $0x278] sm:$0xf0] }
  0xe4   :  { %v721_v38 = vrot.slane %v720_v34, 1  ;;  %v741_v39 = vadd.f32 %v740_v35, %v739_v45  ;;  %1203 = vmatpush.bf16.msrb.mxu2 %v4796_v29  ;;  %v4783_v45 = vld [vmem:[#allocation6 + $0x80] sm:$0xf]  ;;  %v4780_v35 = vor.u32 %v6264_v32, %v4777_v44  ;;  %1178 = vmatpush.bf16.msrb.mxu0 %v4776_v33  ;;  %v6251_v29 = vld [vmem:[#allocation6 + $0x10] sm:$0xf0] }
  0xe5   :  { %v4724_v31 = vor.u32 %v6251_v29, %v4723_v26  ;;  %v4895_v44 = vld [vmem:[#allocation2 + $0x2e8] sm:$0xf] }
  0xe6   :  { %v742_v40 = vrot.slane %v741_v39, 1  ;;  %v722_v41 = vadd.f32 %v721_v38, %v720_v34  ;;  %v680_v42 = vpop.f32.mrf.mxu2  ;;  %v6266_v34 = vld [vmem:[#allocation6 + $0x88] sm:$0xf0]  ;;  %1191 = vmatpush.bf16.msrb.mxu1 %v4780_v35  ;;  %v4883_v35 = vld [vmem:[#allocation2 + $0x2d0] sm:$0xf] }
  0xe7   :  { %v4784_v36 = vor.u32 %v6266_v34, %v4783_v45  ;;  %v6262_v38 = vld [vmem:[#allocation6 + $0x68] sm:$0xf0]  ;;  %v4771_v42 = vld [vmem:[#allocation6 + $0x68] sm:$0xf]  ;;  %v6295_v45 = vld [vmem:[#allocation2 + $0x2f0] sm:$0xf0] }
  0xe8   :  { %v743_v55 = vadd.f32 %v742_v40, %v741_v39  ;;  %v6261_v39 = vld [vmem:[#allocation6 + $0x64] sm:$0xf]  ;;  %v4764_v40 = vor.u32 %v6262_v38, %v4763_v37  ;;  %v4896_v34 = vor.u32 %v6295_v45, %v4895_v44  ;;  %v4991_v38 = vld [vmem:[#allocation2 + $0x3a8] sm:$0xf]  ;;  %v4849_v44 = vld [vmem:[#allocation2 + $0x294] sm:$0xf0] }
  0xe9   :  { %v693_v46 = vpop.f32.mrf.mxu3  ;;  %1204 = vmatpush.bf16.msrb.mxu2 %v4784_v36  ;;  %v6292_v36 = vld [vmem:[#allocation2 + $0x2d8] sm:$0xf0]  ;;  %v5051_v45 = vld [vmem:[#allocation2 + $0x420] sm:$0xf] }
  0xea   :  { %v752_v43 = vsel %vm750_vm1, %v722_v41, %v743_v55  ;;  %v4765_v41 = vld [vmem:[#allocation6 + $0x6c] sm:$0xf0]  ;;  %v6263_v55 = vld [vmem:[#allocation6 + $0x70] sm:$0xf0]  ;;  %1179 = vmatpush.bf16.msrb.mxu0 %v4764_v40  ;;  %1714 = vmatpush.bf16.msrb.mxu3 %v4896_v34  ;;  %v4884_v37 = vor.u32 %v6292_v36, %v4883_v35  ;;  %v6294_v40 = vld [vmem:[#allocation2 + $0x2ec] sm:$0xf] }
  0xeb   :  { %v755_v47 = vpack.c.bf16 %v752_v43, %v752_v43  ;;  %v4768_v43 = vor.u32 %v6261_v39, %v4765_v41  ;;  %v4772_v46 = vor.u32 %v6263_v55, %v4771_v42  ;;  %v6319_v39 = vld [vmem:[#allocation2 + $0x3b0] sm:$0xf0]  ;;  %v4871_v41 = vld [vmem:[#allocation2 + $0x2b8] sm:$0xf]  ;;  %v6289_v42 = vld [vmem:[#allocation2 + $0x2c0] sm:$0xf0] }
  0xec   :  { %v4992_v55 = vor.u32 %v6319_v39, %v4991_v38  ;;  %v6334_v34 = vld [vmem:[#allocation2 + $0x428] sm:$0xf0]  ;;  %v6277_v38 = vld [vmem:[#allocation2 + $0x260] sm:$0xf0] }
  0xed   :  { %970 = vmatmul.bf16.vlgmr.msra.gmra.mxu2 %v755_v47  ;;  %1192 = vmatpush.bf16.msrb.mxu1 %v4768_v43  ;;  %v4751_v47 = vld [vmem:[#allocation6 + $0x48] sm:$0xf]  ;;  %v4897_v43 = vld [vmem:[#allocation2 + $0x2f4] sm:$0xf0]  ;;  %v5052_v36 = vor.u32 %v6334_v34, %v5051_v45 }
  0xee   :  { %1205 = vmatpush.bf16.msrb.mxu2 %v4772_v46  ;;  %v4900_v46 = vor.u32 %v6294_v40, %v4897_v43  ;;  %1715 = vmatpush.bf16.msrb.mxu3 %v4884_v37  ;;  %v4823_v37 = vld [vmem:[#allocation2 + $0x258] sm:$0xf]  ;;  %v5039_v40 = vld [vmem:[#allocation2 + $0x408] sm:$0xf]  ;;  %v4931_v43 = vld [vmem:[#allocation2 + $0x330] sm:$0xf] }
  0xef   :  { %v4969_v45 = vld [vmem:[#allocation2 + $0x384] sm:$0xf0] }
  0xf5   :  { %v704_v49 = vpop.f32.mrf.mxu0 }
  0xf6   :  { %v6863_v50 = vadd.f32 %v704_v49, %v692_v48  ;;  %v6259_v48 = vld [vmem:[#allocation6 + $0x50] sm:$0xf0]  ;;  %v6258_v49 = vld [vmem:[#allocation6 + $0x4c] sm:$0xf] }
  0xf8   :  { %v710_v51 = vmul.f32 %v6849_v53, %v6863_v50 }
  0xfa   :  { %v723_v52 = vrot.slane %v710_v51, 4  ;;  %v731_v54 = vmul.f32 %v710_v51, %v6863_v50 }
  0xfc   :  { %v724_v56 = vadd.f32 %v723_v52, %v710_v51  ;;  %v744_v58 = vrot.slane %v731_v54, 4  ;;  %v4752_v51 = vor.u32 %v6259_v48, %v4751_v47  ;;  %v4753_v52 = vld [vmem:[#allocation6 + $0x54] sm:$0xf0]  ;;  %v4979_v47 = vld [vmem:[#allocation2 + $0x390] sm:$0xf] }
  0xfd   :  { %v706_v59 = vpop.f32.mrf.mxu0  ;;  %v6316_v48 = vld [vmem:[#allocation2 + $0x398] sm:$0xf0] }
  0xfe   :  { %v725_v60 = vrot.slane %v724_v56, 2  ;;  %v745_v61 = vadd.f32 %v744_v58, %v731_v54  ;;  %v4759_v54 = vld [vmem:[#allocation6 + $0x50] sm:$0xf]  ;;  %v4756_v58 = vor.u32 %v6258_v49, %v4753_v52  ;;  %1180 = vmatpush.bf16.msrb.mxu0 %v4752_v51  ;;  %v6291_v49 = vld [vmem:[#allocation2 + $0x2d4] sm:$0xf]  ;;  %v4980_v51 = vor.u32 %v6316_v48, %v4979_v47 }
  0xff   :  { %v4885_v52 = vld [vmem:[#allocation2 + $0x2dc] sm:$0xf0]  ;;  %v6331_v47 = vld [vmem:[#allocation2 + $0x410] sm:$0xf0] }
 0x100   :  { %v726_v62 = vadd.f32 %v725_v60, %v724_v56  ;;  %v746_v63 = vrot.slane %v745_v61, 2  ;;  %v6260_v56 = vld [vmem:[#allocation6 + $0x58] sm:$0xf0]  ;;  %1193 = vmatpush.bf16.msrb.mxu1 %v4756_v58  ;;  %v4739_v60 = vld [vmem:[#allocation6 + $0x30] sm:$0xf]  ;;  %v4872_v58 = vor.u32 %v6289_v42, %v4871_v41 }
 0x101   :  { %v4760_v59 = vor.u32 %v6260_v56, %v4759_v54  ;;  %v5087_v54 = vld [vmem:[#allocation2 + $0x468] sm:$0xf]  ;;  %v6343_v56 = vld [vmem:[#allocation2 + $0x470] sm:$0xf0] }
 0x102   :  { %v727_v0 = vrot.slane %v726_v62, 1  ;;  %v747_v1 = vadd.f32 %v746_v63, %v745_v61  ;;  %v6256_v61 = vld [vmem:[#allocation6 + $0x38] sm:$0xf0]  ;;  %1716 = vmatpush.bf16.msrb.mxu3 %v4872_v58  ;;  %v5027_v58 = vld [vmem:[#allocation2 + $0x3f0] sm:$0xf] }
 0x103   :  { %1206 = vmatpush.bf16.msrb.mxu2 %v4760_v59  ;;  %v4859_v59 = vld [vmem:[#allocation2 + $0x2a0] sm:$0xf] }
 0x104   :  { %v748_v2 = vrot.slane %v747_v1, 1  ;;  %v728_v4 = vadd.f32 %v727_v0, %v726_v62  ;;  %v6255_v62 = vld [vmem:[#allocation6 + $0x34] sm:$0xf]  ;;  %v4740_v0 = vor.u32 %v6256_v61, %v4739_v60  ;;  %v6286_v60 = vld [vmem:[#allocation2 + $0x2a8] sm:$0xf0]  ;;  %v4888_v61 = vor.u32 %v6291_v49, %v4885_v52 }
 0x105   :  { %v6279_v49 = vld [vmem:[#allocation2 + $0x274] sm:$0xf]  ;;  %v5040_v52 = vor.u32 %v6331_v47, %v5039_v40  ;;  %v4945_v40 = vld [vmem:[#allocation2 + $0x354] sm:$0xf0]  ;;  %v6317_v47 = vld [vmem:[#allocation2 + $0x3a0] sm:$0xf0] }
 0x106   :  { %v749_v3 = vadd.f32 %v748_v2, %v747_v1  ;;  %v4741_v1 = vld [vmem:[#allocation6 + $0x3c] sm:$0xf0]  ;;  %v4747_v2 = vld [vmem:[#allocation6 + $0x38] sm:$0xf]  ;;  %1181 = vmatpush.bf16.msrb.mxu0 %v4740_v0 }
 0x108   :  { %v753_v5 = vsel %vm750_vm1, %v728_v4, %v749_v3  ;;  %v6257_v3 = vld [vmem:[#allocation6 + $0x40] sm:$0xf0] }
 0x109   :  { %v756_v6 = vpack.c.bf16 %v753_v5, %v753_v5  ;;  %v4744_v5 = vor.u32 %v6255_v62, %v4741_v1  ;;  %v5088_v62 = vor.u32 %v6343_v56, %v5087_v54  ;;  %v6313_v1 = vld [vmem:[#allocation2 + $0x380] sm:$0xf0] }
 0x10a   :  { %1182 = vmatpush.bf16.msrb.mxu0 %v4728_v14 }
 0x10b   :  { %983 = vmatmul.bf16.vlgmr.msra.gmra.mxu3 %v756_v6  ;;  %v4748_v6 = vor.u32 %v6257_v3, %v4747_v2  ;;  %1194 = vmatpush.bf16.msrb.mxu1 %v4744_v5  ;;  %v6288_v2 = vld [vmem:[#allocation2 + $0x2bc] sm:$0xf]  ;;  %v4873_v3 = vld [vmem:[#allocation2 + $0x2c4] sm:$0xf0]  ;;  %v5075_v5 = vld [vmem:[#allocation2 + $0x450] sm:$0xf] }
 0x10d   :  { %1207 = vmatpush.bf16.msrb.mxu2 %v4748_v6  ;;  %v6340_v6 = vld [vmem:[#allocation2 + $0x458] sm:$0xf0] }
 0x151   :  { %v6869_v7 = vpop.f32.mrf.mxu1 }
 0x159   :  { %v960_v8 = vpop.f32.mrf.mxu1 }
 0x170   :  { %v6871_v9 = vpop.f32.mrf.mxu2 }
 0x171   :  { %v972_v63 = vadd.f32 %v6871_v9, %v6869_v7  ;;  %v4732_v7 = vor.u32 %v6252_v12, %v4729_v15  ;;  %v6254_v9 = vld [vmem:[#allocation6 + $0x28] sm:$0xf0]  ;;  %v5076_v12 = vor.u32 %v6340_v6, %v5075_v5  ;;  %v4860_v15 = vor.u32 %v6286_v60, %v4859_v59  ;;  %v6328_v59 = vld [vmem:[#allocation2 + $0x3f8] sm:$0xf0] }
 0x172   :  { %v4736_v18 = vor.u32 %v6254_v9, %v4735_v16  ;;  %v4876_v16 = vor.u32 %v6288_v2, %v4873_v3  ;;  %v6310_v9 = vld [vmem:[#allocation2 + $0x368] sm:$0xf0]  ;;  %v4824_v60 = vor.u32 %v6277_v38, %v4823_v37  ;;  %v6276_v5 = vld [vmem:[#allocation2 + $0x25c] sm:$0xf]  ;;  %v5028_v6 = vor.u32 %v6328_v59, %v5027_v58  ;;  %v4957_v37 = vld [vmem:[#allocation2 + $0x36c] sm:$0xf0] }
 0x173   :  { %1195 = vmatpush.bf16.msrb.mxu1 %v4732_v7  ;;  %v4955_v7 = vld [vmem:[#allocation2 + $0x360] sm:$0xf]  ;;  %1717 = vmatpush.bf16.msrb.mxu3 %v4860_v15  ;;  %v6274_v2 = vld [vmem:[#allocation2 + $0x248] sm:$0xf0]  ;;  %v6325_v15 = vld [vmem:[#allocation2 + $0x3e0] sm:$0xf0] }
 0x174   :  { %1208 = vmatpush.bf16.msrb.mxu2 %v4736_v18  ;;  %v4861_v18 = vld [vmem:[#allocation2 + $0x2ac] sm:$0xf0]  ;;  %v4956_v26 = vor.u32 %v6310_v9, %v4955_v7  ;;  %v6318_v3 = vld [vmem:[#allocation2 + $0x3ac] sm:$0xf]  ;;  %v6303_v58 = vld [vmem:[#allocation2 + $0x334] sm:$0xf] }
 0x175   :  { %v6342_v9 = vld [vmem:[#allocation2 + $0x46c] sm:$0xf]  ;;  %v4933_v59 = vld [vmem:[#allocation2 + $0x33c] sm:$0xf0] }
 0x177   :  { %1196 = vmatpush.bf16.msrb.mxu1 %v4720_v28 }
 0x178   :  { %v973_v19 = vpop.f32.mrf.mxu2  ;;  %1209 = vmatpush.bf16.msrb.mxu2 %v4724_v31  ;;  %v6307_v31 = vld [vmem:[#allocation2 + $0x350] sm:$0xf0] }
 0x179   :  { %v4715_v19 = vld [vmem:[#allocation6] sm:$0xf] }
 0x17a   :  { %v4716_v24 = vor.u32 %v6250_v20, %v4715_v19  ;;  %v5063_v19 = vld [vmem:[#allocation2 + $0x438] sm:$0xf]  ;;  %v6337_v20 = vld [vmem:[#allocation2 + $0x440] sm:$0xf0] }
 0x17b   :  { %1740 = vmatpush.bf16.msra.mxu1 %v5088_v62  ;;  %v4919_v62 = vld [vmem:[#allocation2 + $0x318] sm:$0xf] }
 0x17c   :  { %1183 = vmatpush.bf16.msrb.mxu0 %v4716_v24  ;;  %1753 = vmatpush.bf16.msra.mxu2 %v4900_v46  ;;  %v4835_v24 = vld [vmem:[#allocation2 + $0x270] sm:$0xf]  ;;  %v6304_v46 = vld [vmem:[#allocation2 + $0x338] sm:$0xf0] }
 0x17d   :  { %v4836_v42 = vor.u32 %v6280_v25, %v4835_v24  ;;  %v4932_v56 = vor.u32 %v6304_v46, %v4931_v43  ;;  %v6273_v25 = vld [vmem:[#allocation2 + $0x244] sm:$0xf]  ;;  %v4987_v43 = vld [vmem:[#allocation2 + $0x398] sm:$0xf] }
 0x17f   :  { %1741 = vmatpush.bf16.msra.mxu1 %v5076_v12  ;;  %v6298_v12 = vld [vmem:[#allocation2 + $0x308] sm:$0xf0] }
 0x180   :  { %1727 = vmatpush.bf16.msra.mxu0 %v4992_v55  ;;  %1754 = vmatpush.bf16.msra.mxu2 %v4888_v61 }
 0x184   :  { %1728 = vmatpush.bf16.msra.mxu0 %v4980_v51  ;;  %1755 = vmatpush.bf16.msra.mxu2 %v4876_v16  ;;  %v4837_v51 = vld [vmem:[#allocation2 + $0x27c] sm:$0xf0] }
 0x185   :  { %v4840_v61 = vor.u32 %v6279_v49, %v4837_v51  ;;  %v6322_v49 = vld [vmem:[#allocation2 + $0x3c8] sm:$0xf0]  ;;  %v4988_v51 = vor.u32 %v6317_v47, %v4987_v43  ;;  %v6281_v47 = vld [vmem:[#allocation2 + $0x280] sm:$0xf0] }
 0x18e   :  { %v984_v4 = vpop.f32.mrf.mxu3 }
 0x18f   :  { %v985_v8 = vadd.f32 %v984_v4, %v972_v63  ;;  %v4967_v63 = vld [vmem:[#allocation2 + $0x378] sm:$0xf] }
 0x190   :  { %v4968_v11 = vor.u32 %v6313_v1, %v4967_v63  ;;  %v6301_v63 = vld [vmem:[#allocation2 + $0x320] sm:$0xf0]  ;;  %v4811_v1 = vld [vmem:[#allocation2 + $0x240] sm:$0xf] }
 0x191   :  { %v6875_v13 = vmul.f32 0.05, %v985_v8  ;;  %v4847_v8 = vld [vmem:[#allocation2 + $0x288] sm:$0xf]  ;;  %v4812_v7 = vor.u32 %v6274_v2, %v4811_v1  ;;  %v6314_v1 = vld [vmem:[#allocation2 + $0x388] sm:$0xf0] }
 0x192   :  { %1729 = vmatpush.bf16.msra.mxu0 %v4968_v11  ;;  %v4848_v29 = vor.u32 %v6283_v10, %v4847_v8  ;;  %v4825_v10 = vld [vmem:[#allocation2 + $0x264] sm:$0xf0]  ;;  %v4907_v11 = vld [vmem:[#allocation2 + $0x300] sm:$0xf] }
 0x193   :  { %v989_v17 = vmul.f32 %v6875_v13, %v6875_v13  ;;  %v4908_v24 = vor.u32 %v6298_v12, %v4907_v11  ;;  %v5053_v11 = vld [vmem:[#allocation2 + $0x42c] sm:$0xf0]  ;;  %v4963_v12 = vld [vmem:[#allocation2 + $0x368] sm:$0xf] }
 0x194   :  { %1718 = vmatpush.bf16.msrb.mxu3 %v4848_v29  ;;  %v4999_v29 = vld [vmem:[#allocation2 + $0x3b0] sm:$0xf] }
 0x195   :  { %v991_v22 = vrot.slane %v989_v17, 7  ;;  %v6285_v17 = vld [vmem:[#allocation2 + $0x2a4] sm:$0xf] }
 0x196   :  { %v986_v27 = vpop.f32.mrf.mxu3  ;;  %1730 = vmatpush.bf16.msra.mxu0 %v4956_v26  ;;  %v4813_v26 = vld [vmem:[#allocation2 + $0x24c] sm:$0xf0] }
 0x197   :  { %v993_v30 = vsub.f32 %v6875_v13, %v991_v22  ;;  %v5064_v22 = vor.u32 %v6337_v20, %v5063_v19  ;;  %v4943_v27 = vld [vmem:[#allocation2 + $0x348] sm:$0xf]  ;;  %v6315_v20 = vld [vmem:[#allocation2 + $0x394] sm:$0xf] }
 0x198   :  { %v4944_v39 = vor.u32 %v6307_v31, %v4943_v27  ;;  %1719 = vmatpush.bf16.msrb.mxu3 %v4836_v42  ;;  %v6339_v42 = vld [vmem:[#allocation2 + $0x454] sm:$0xf] }
 0x199   :  { %v994_v32 = vmax.f32 %v993_v30, 0.0  ;;  %v4864_v30 = vor.u32 %v6285_v17, %v4861_v18  ;;  %1742 = vmatpush.bf16.msra.mxu1 %v5064_v22  ;;  %v5089_v17 = vld [vmem:[#allocation2 + $0x474] sm:$0xf0]  ;;  %v4981_v22 = vld [vmem:[#allocation2 + $0x39c] sm:$0xf0] }
 0x19a   :  { %1731 = vmatpush.bf16.msra.mxu0 %v4944_v39  ;;  %v4984_v31 = vor.u32 %v6315_v20, %v4981_v22  ;;  %v6306_v39 = vld [vmem:[#allocation2 + $0x34c] sm:$0xf]  ;;  %v5041_v22 = vld [vmem:[#allocation2 + $0x414] sm:$0xf0] }
 0x19b   :  { %v6880_v33 = vadd.f32 1e-05, %v994_v32  ;;  %v6282_v32 = vld [vmem:[#allocation2 + $0x28c] sm:$0xf]  ;;  %1756 = vmatpush.bf16.msra.mxu2 %v4864_v30  ;;  %v6320_v30 = vld [vmem:[#allocation2 + $0x3b8] sm:$0xf0] }
 0x19c   :  { %v4852_v55 = vor.u32 %v6282_v32, %v4849_v44  ;;  %1720 = vmatpush.bf16.msrb.mxu3 %v4824_v60  ;;  %v4816_v32 = vor.u32 %v6273_v25, %v4813_v26  ;;  %v6312_v44 = vld [vmem:[#allocation2 + $0x37c] sm:$0xf]  ;;  %v5000_v34 = vor.u32 %v6320_v30, %v4999_v29  ;;  %v4936_v60 = vor.u32 %v6303_v58, %v4933_v59  ;;  %v6287_v29 = vld [vmem:[#allocation2 + $0x2b0] sm:$0xf0]  ;;  %v4831_v58 = vld [vmem:[#allocation2 + $0x260] sm:$0xf] }
 0x19d   :  { %6619 = vrsqrt.f32 %v6880_v33  ;;  %vm1002_vm3 = vweird.f32 %v6880_v33  ;;  %1743 = vmatpush.bf16.msra.mxu1 %v5052_v36  ;;  %v6309_v36 = vld [vmem:[#allocation2 + $0x364] sm:$0xf]  ;;  %v6308_v26 = vld [vmem:[#allocation2 + $0x358] sm:$0xf0]  ;;  %v6278_v59 = vld [vmem:[#allocation2 + $0x268] sm:$0xf0] }
 0x19e   :  { %1732 = vmatpush.bf16.msra.mxu0 %v4932_v56  ;;  %v4960_v38 = vor.u32 %v6309_v36, %v4957_v37  ;;  %v4855_v36 = vld [vmem:[#allocation2 + $0x290] sm:$0xf]  ;;  %v6284_v37 = vld [vmem:[#allocation2 + $0x298] sm:$0xf0] }
 0x19f   :  { %1757 = vmatpush.bf16.msra.mxu2 %v4852_v55  ;;  %v5077_v55 = vld [vmem:[#allocation2 + $0x45c] sm:$0xf0] }
 0x1a0   :  { %1721 = vmatpush.bf16.msrb.mxu3 %v4812_v7  ;;  %v5080_v46 = vor.u32 %v6339_v42, %v5077_v55  ;;  %v4879_v7 = vld [vmem:[#allocation2 + $0x2c0] sm:$0xf]  ;;  %v6302_v55 = vld [vmem:[#allocation2 + $0x328] sm:$0xf0] }
 0x1a1   :  { %1744 = vmatpush.bf16.msra.mxu1 %v5040_v52  ;;  %v4903_v52 = vld [vmem:[#allocation2 + $0x2f0] sm:$0xf] }
 0x1a3   :  { %v6620_v0 = vpop.eup %6619  ;;  %1758 = vmatpush.bf16.msra.mxu2 %v4840_v61  ;;  %v6336_v61 = vld [vmem:[#allocation2 + $0x43c] sm:$0xf] }
 0x1a4   :  { %v997_v4 = vmul.f32 %v6620_v0, %v6880_v33  ;;  %vm1003_vm2 = vweird.f32 %v6620_v0  ;;  %v99_v33 = vld [vmem:[#allocation7] sm:$0xff] }
 0x1a5   :  { %vm1004_vm4 = vmor %vm1002_vm3, %vm1003_vm2  ;;  %1745 = vmatpush.bf16.msra.mxu1 %v5028_v6  ;;  %v6300_v6 = vld [vmem:[#allocation2 + $0x31c] sm:$0xf] }
 0x1a6   :  { %v998_v14 = vmul.f32 %v6620_v0, %v997_v4  ;;  %v4993_v4 = vld [vmem:[#allocation2 + $0x3b4] sm:$0xf0] }
 0x1a7   :  { %v4996_v19 = vor.u32 %v6318_v3, %v4993_v4  ;;  %v4891_v3 = vld [vmem:[#allocation2 + $0x2d8] sm:$0xf]  ;;  %v6293_v4 = vld [vmem:[#allocation2 + $0x2e0] sm:$0xf0] }
 0x1a8   :  { %v999_v21 = vmul.f32 0.5, %v998_v14  ;;  %v5015_v14 = vld [vmem:[#allocation2 + $0x3d8] sm:$0xf] }
 0x1a9   :  { %v5016_v27 = vor.u32 %v6325_v15, %v5015_v14  ;;  %1766 = vmatpush.bf16.msra.mxu3 %v4996_v19  ;;  %v6311_v15 = vld [vmem:[#allocation2 + $0x370] sm:$0xf0]  ;;  %v4909_v19 = vld [vmem:[#allocation2 + $0x30c] sm:$0xf0] }
 0x1aa   :  { %v1000_v28 = vsub.f32 1.5, %v999_v21  ;;  %v4828_v21 = vor.u32 %v6276_v5, %v4825_v10  ;;  %v4892_v5 = vor.u32 %v6293_v4, %v4891_v3  ;;  %v6333_v10 = vld [vmem:[#allocation2 + $0x424] sm:$0xf] }
 0x1ab   :  { %1746 = vmatpush.bf16.msra.mxu1 %v5016_v27  ;;  %v5056_v14 = vor.u32 %v6333_v10, %v5053_v11  ;;  %v5095_v11 = vld [vmem:[#allocation2 + $0x470] sm:$0xf] }
 0x1ac   :  { %v1001_v35 = vmul.f32 %v6620_v0, %v1000_v28  ;;  %v5092_v28 = vor.u32 %v6342_v9, %v5089_v17  ;;  %1759 = vmatpush.bf16.msra.mxu2 %v4828_v21  ;;  %v6290_v9 = vld [vmem:[#allocation2 + $0x2c8] sm:$0xf0] }
 0x1ad   :  { %1767 = vmatpush.bf16.msra.mxu3 %v4984_v31  ;;  %v4880_v17 = vor.u32 %v6290_v9, %v4879_v7  ;;  %v6330_v21 = vld [vmem:[#allocation2 + $0x40c] sm:$0xf]  ;;  %v6327_v31 = vld [vmem:[#allocation2 + $0x3f4] sm:$0xf] }
 0x1ae   :  { %v1005_v41 = vsel %vm1004_vm4, %v6620_v0, %v1001_v35  ;;  %v4972_v35 = vor.u32 %v6312_v44, %v4969_v45  ;;  %v5044_v25 = vor.u32 %v6330_v21, %v5041_v22  ;;  %v4939_v44 = vld [vmem:[#allocation2 + $0x338] sm:$0xf]  ;;  %v6341_v22 = vld [vmem:[#allocation2 + $0x460] sm:$0xf0] }
 0x1af   :  { %v1007_v48 = vrot.slane %v1005_v41, 1  ;;  %v4948_v41 = vor.u32 %v6306_v39, %v4945_v40  ;;  %v6324_v39 = vld [vmem:[#allocation2 + $0x3dc] sm:$0xf]  ;;  %v5017_v40 = vld [vmem:[#allocation2 + $0x3e4] sm:$0xf0] }
 0x1b0   :  { %1760 = vmatpush.bf16.msra.mxu2 %v4816_v32  ;;  %v5029_v32 = vld [vmem:[#allocation2 + $0x3fc] sm:$0xf0]  ;;  %v5020_v42 = vor.u32 %v6324_v39, %v5017_v40  ;;  %v5083_v21 = vld [vmem:[#allocation2 + $0x458] sm:$0xf] }
 0x1b1   :  { %v1009_v54 = vmul.f32 %v1007_v48, %v6875_v13  ;;  %v4920_v13 = vor.u32 %v6301_v63, %v4919_v62  ;;  %1768 = vmatpush.bf16.msra.mxu3 %v4972_v35  ;;  %v5065_v62 = vld [vmem:[#allocation2 + $0x444] sm:$0xf0]  ;;  %v4975_v63 = vld [vmem:[#allocation2 + $0x380] sm:$0xf]  ;;  %v5032_v45 = vor.u32 %v6327_v31, %v5029_v32 }
 0x1b2   :  { %v4976_v2 = vor.u32 %v6314_v1, %v4975_v63  ;;  %v5023_v40 = vld [vmem:[#allocation2 + $0x3e0] sm:$0xf] }
 0x1b3   :  { %v1010_v0 = vsub.f32 %v99_v33, %v1009_v54  ;;  %1733 = vmatpush.bf16.msra.mxu0 %v4920_v13  ;;  %v6296_v54 = vld [vmem:[#allocation2 + $0x2f8] sm:$0xf0] }
 0x1b4   :  { %v4904_v56 = vor.u32 %v6296_v54, %v4903_v52  ;;  %v6299_v52 = vld [vmem:[#allocation2 + $0x310] sm:$0xf0] }
 0x1b5   :  { %v1012_v8 = vrot.slane %v1010_v0, 7  ;;  %1769 = vmatpush.bf16.msra.mxu3 %v4960_v38  ;;  %v5068_v0 = vor.u32 %v6336_v61, %v5065_v62  ;;  %v4856_v38 = vor.u32 %v6284_v37, %v4855_v36  ;;  %v4819_v61 = vld [vmem:[#allocation2 + $0x248] sm:$0xf]  ;;  %v6275_v62 = vld [vmem:[#allocation2 + $0x250] sm:$0xf0] }
 0x1b6   :  { %v4820_v63 = vor.u32 %v6275_v62, %v4819_v61  ;;  %v5035_v37 = vld [vmem:[#allocation2 + $0x3f8] sm:$0xf] }
 0x1b7   :  { %v1014_v16 = vsel %vm750_vm1, %v1007_v48, %v1012_v8  ;;  %1734 = vmatpush.bf16.msra.mxu0 %v4908_v24  ;;  %v5003_v48 = vld [vmem:[#allocation2 + $0x3c0] sm:$0xf]  ;;  %v4921_v8 = vld [vmem:[#allocation2 + $0x324] sm:$0xf0]  ;;  %v4951_v24 = vld [vmem:[#allocation2 + $0x350] sm:$0xf] }
 0x1b8   :  { %v1015_v18 = vpack.c.bf16 %v1014_v16, %v1014_v16  ;;  %v5004_v33 = vor.u32 %v6322_v49, %v5003_v48  ;;  %v4924_v13 = vor.u32 %v6300_v6, %v4921_v8  ;;  %v4964_v16 = vor.u32 %v6311_v15, %v4963_v12  ;;  %v6321_v48 = vld [vmem:[#allocation2 + $0x3c4] sm:$0xf]  ;;  %v6344_v12 = vld [vmem:[#allocation2 + $0x478] sm:$0xf0] }
 0x1b9   :  { %1770 = vmatpush.bf16.msra.mxu3 %v4948_v41  ;;  %v4952_v27 = vor.u32 %v6308_v26, %v4951_v24  ;;  %v4927_v41 = vld [vmem:[#allocation2 + $0x320] sm:$0xf]  ;;  %v5084_v26 = vor.u32 %v6341_v22, %v5083_v21  ;;  %v6368_v61 = vld [vmem:[#allocation4 + $0x178] sm:$0xff]  ;;  %v6363_v22 = vld [vmem:[#allocation4 + $0x150] sm:$0xff] }
 0x1ba   :  { %1184 = vmatmul.bf16.vlgmr.msrb.gmra.mxu0 %v1015_v18  ;;  %1197 = vmatmul.bf16.vlgmr.msrb.gmra.mxu1 %v1015_v18  ;;  %v4928_v43 = vor.u32 %v6302_v55, %v4927_v41  ;;  %v6326_v41 = vld [vmem:[#allocation2 + $0x3e8] sm:$0xf0]  ;;  %v5011_v55 = vld [vmem:[#allocation2 + $0x3c8] sm:$0xf]  ;;  %v6356_v62 = vld [vmem:[#allocation4 + $0x118] sm:$0xff] }
 0x1bb   :  { %1210 = vmatmul.bf16.vlgmr.msrb.gmra.mxu2 %v1015_v18  ;;  %1779 = vmatpush.bf16.msrb.mxu0 %v5092_v28  ;;  %v6297_v18 = vld [vmem:[#allocation2 + $0x304] sm:$0xf]  ;;  %v4867_v28 = vld [vmem:[#allocation2 + $0x2a8] sm:$0xf] }
 0x1bc   :  { %1805 = vmatpush.bf16.msrb.mxu2 %v5000_v34  ;;  %1747 = vmatpush.bf16.msra.mxu1 %v5004_v33  ;;  %v4912_v20 = vor.u32 %v6297_v18, %v4909_v19  ;;  %v4868_v30 = vor.u32 %v6287_v29, %v4867_v28  ;;  %v6305_v34 = vld [vmem:[#allocation2 + $0x340] sm:$0xf0]  ;;  %v4915_v33 = vld [vmem:[#allocation2 + $0x308] sm:$0xf]  ;;  %v5096_v18 = vor.u32 %v6344_v12, %v5095_v11  ;;  %v6338_v28 = vld [vmem:[#allocation2 + $0x448] sm:$0xf0] }
 0x1bd   :  { %1771 = vmatpush.bf16.msra.mxu3 %v4936_v60  ;;  %v4940_v35 = vor.u32 %v6305_v34, %v4939_v44  ;;  %v4832_v60 = vor.u32 %v6278_v59, %v4831_v58  ;;  %v5059_v44 = vld [vmem:[#allocation2 + $0x428] sm:$0xf]  ;;  %v5047_v34 = vld [vmem:[#allocation2 + $0x410] sm:$0xf]  ;;  %v6345_v59 = vld [vmem:[#allocation4 + $0xc0] sm:$0xff] }
 0x1be   :  { %v6358_v58 = vld [vmem:[#allocation4 + $0x128] sm:$0xff]  ;;  %v6353_v12 = vld [vmem:[#allocation4 + $0x100] sm:$0xff] }
 0x1bf   :  { %1780 = vmatpush.bf16.msrb.mxu0 %v5080_v46  ;;  %v4843_v46 = vld [vmem:[#allocation2 + $0x278] sm:$0xf] }
 0x1c0   :  { %1806 = vmatpush.bf16.msrb.mxu2 %v4988_v51  ;;  %1792 = vmatpush.bf16.msrb.mxu1 %v4904_v56  ;;  %v4844_v49 = vor.u32 %v6281_v47, %v4843_v46  ;;  %v5005_v51 = vld [vmem:[#allocation2 + $0x3cc] sm:$0xf0]  ;;  %v4916_v56 = vor.u32 %v6299_v52, %v4915_v33  ;;  %v6360_v33 = vld [vmem:[#allocation4 + $0x138] sm:$0xff] }
 0x1c1   :  { %1772 = vmatpush.bf16.msra.mxu3 %v4924_v13  ;;  %v5008_v54 = vor.u32 %v6321_v48, %v5005_v51  ;;  %v6351_v47 = vld [vmem:[#allocation4 + $0xf0] sm:$0xff]  ;;  %v6350_v48 = vld [vmem:[#allocation4 + $0xe8] sm:$0xff]  ;;  %v6348_v51 = vld [vmem:[#allocation4 + $0xd8] sm:$0xff] }
 0x1c2   :  { %v6347_v52 = vld [vmem:[#allocation4 + $0xd0] sm:$0xff] }
 0x1c3   :  { %1781 = vmatpush.bf16.msrb.mxu0 %v5068_v0 }
 0x1c4   :  { %1807 = vmatpush.bf16.msrb.mxu2 %v4976_v2  ;;  %1793 = vmatpush.bf16.msrb.mxu1 %v4892_v5 }
 0x1c5   :  { %1773 = vmatpush.bf16.msra.mxu3 %v4912_v20 }
 0x1c7   :  { %1782 = vmatpush.bf16.msrb.mxu0 %v5056_v14 }
 0x1c8   :  { %1808 = vmatpush.bf16.msrb.mxu2 %v4964_v16  ;;  %1794 = vmatpush.bf16.msrb.mxu1 %v4880_v17 }
 0x1cb   :  { %1783 = vmatpush.bf16.msrb.mxu0 %v5044_v25 }
 0x1cc   :  { %1809 = vmatpush.bf16.msrb.mxu2 %v4952_v27  ;;  %1795 = vmatpush.bf16.msrb.mxu1 %v4868_v30  ;;  %v5071_v27 = vld [vmem:[#allocation2 + $0x440] sm:$0xf] }
 0x1cd   :  { %v5072_v32 = vor.u32 %v6338_v28, %v5071_v27 }
 0x1cf   :  { %1784 = vmatpush.bf16.msrb.mxu0 %v5032_v45  ;;  %v6335_v45 = vld [vmem:[#allocation2 + $0x430] sm:$0xf0] }
 0x1d0   :  { %1810 = vmatpush.bf16.msrb.mxu2 %v4940_v35  ;;  %1796 = vmatpush.bf16.msrb.mxu1 %v4856_v38  ;;  %v6332_v35 = vld [vmem:[#allocation2 + $0x418] sm:$0xf0]  ;;  %v6329_v38 = vld [vmem:[#allocation2 + $0x400] sm:$0xf0] }
 0x1d1   :  { %v5048_v36 = vor.u32 %v6332_v35, %v5047_v34  ;;  %v5036_v39 = vor.u32 %v6329_v38, %v5035_v37 }
 0x1d3   :  { %1785 = vmatpush.bf16.msrb.mxu0 %v5020_v42  ;;  %v5024_v42 = vor.u32 %v6326_v41, %v5023_v40 }
 0x1d4   :  { %1811 = vmatpush.bf16.msrb.mxu2 %v4928_v43  ;;  %1797 = vmatpush.bf16.msrb.mxu1 %v4844_v49  ;;  %v6323_v43 = vld [vmem:[#allocation2 + $0x3d0] sm:$0xf0]  ;;  %v6349_v49 = vld [vmem:[#allocation4 + $0xe0] sm:$0xff] }
 0x1d5   :  { %v5012_v46 = vor.u32 %v6323_v43, %v5011_v55 }
 0x1d7   :  { %1786 = vmatpush.bf16.msrb.mxu0 %v5008_v54  ;;  %v6359_v54 = vld [vmem:[#allocation4 + $0x130] sm:$0xff] }
 0x1d8   :  { %1812 = vmatpush.bf16.msrb.mxu2 %v4916_v56  ;;  %1798 = vmatpush.bf16.msrb.mxu1 %v4832_v60  ;;  %v6346_v56 = vld [vmem:[#allocation4 + $0xc8] sm:$0xff]  ;;  %v6357_v60 = vld [vmem:[#allocation4 + $0x120] sm:$0xff] }
 0x1dc   :  { %1799 = vmatpush.bf16.msrb.mxu1 %v4820_v63 }
 0x237   :  { %v1185_v0 = vpop.f32.mrf.mxu0  ;;  %v1198_v1 = vpop.f32.mrf.mxu1 }
 0x238   :  { %v1215_v2 = vperm.slane %v1185_v0, 0  ;;  %v1216_v3 = vperm.slane %v1198_v1, 0  ;;  %v1221_v5 = vperm.slane %v1185_v0, 1  ;;  %v1222_v8 = vperm.slane %v1198_v1, 1  ;;  %v6367_v0 = vld [vmem:[#allocation4 + $0x170] sm:$0xff] }
 0x239   :  { %v6355_v1 = vld [vmem:[#allocation4 + $0x110] sm:$0xff] }
 0x23a   :  { %v1218_v4 = vmul.f32 %v1215_v2, %v6851_v57  ;;  %v1219_v6 = vmul.f32 %v1216_v3, %v6857_v23  ;;  %v6352_v23 = vld [vmem:[#allocation4 + $0xf8] sm:$0xff]  ;;  %v6366_v2 = vld [vmem:[#allocation4 + $0x168] sm:$0xff] }
 0x23c   :  { %v1224_v13 = vadd.f32 %v1221_v5, %v1218_v4  ;;  %v1225_v10 = vadd.f32 %v1222_v8, %v1219_v6  ;;  %v6354_v4 = vld [vmem:[#allocation4 + $0x108] sm:$0xff] }
 0x23e   :  { %v1227_v14 = vmax.f32 %v1224_v13, 0.0  ;;  %v1228_v15 = vmax.f32 %v1225_v10, 0.0  ;;  %v1211_v16 = vpop.f32.mrf.mxu2  ;;  %v6365_v10 = vld [vmem:[#allocation4 + $0x160] sm:$0xff] }
 0x23f   :  { %v1217_v7 = vperm.slane %v1211_v16, 0  ;;  %v1187_v9 = vpop.f32.mrf.mxu0  ;;  %v1200_v17 = vpop.f32.mrf.mxu1  ;;  %v1223_v24 = vperm.slane %v1211_v16, 1 }
 0x240   :  { %v1230_v19 = vpack.c.bf16 %v1227_v14, %v1227_v14  ;;  %v1231_v20 = vpack.c.bf16 %v1228_v15, %v1228_v15  ;;  %v6364_v15 = vld [vmem:[#allocation4 + $0x158] sm:$0xff] }
 0x241   :  { %v1220_v57 = vmul.f32 %v1217_v7, %v6863_v50  ;;  %v5060_v50 = vor.u32 %v6335_v45, %v5059_v44  ;;  %v6361_v45 = vld [vmem:[#allocation4 + $0x140] sm:$0xff] }
 0x242   :  { %1722 = vmatmul.bf16.vlgmr.msrb.gmra.mxu3 %v1230_v19  ;;  %1735 = vmatmul.bf16.vlgmr.msra.gmra.mxu0 %v1231_v20 }
 0x243   :  { %v1226_v25 = vadd.f32 %v1223_v24, %v1220_v57  ;;  %1761 = vmatmul.bf16.vlgmr.msra.gmra.mxu2 %v1230_v19  ;;  %1818 = vmatpush.bf16.msrb.mxu3 %v5096_v18 }
 0x244   :  { %2072 = vmatpush.bf16.msra.mxu0 %v6352_v23  ;;  %2098 = vmatpush.bf16.msra.mxu2 %v6368_v61 }
 0x245   :  { %v1229_v29 = vmax.f32 %v1226_v25, 0.0 }
 0x246   :  { %v1213_v30 = vpop.f32.mrf.mxu2 }
 0x247   :  { %v1232_v31 = vpack.c.bf16 %v1229_v29, %v1229_v29  ;;  %1819 = vmatpush.bf16.msrb.mxu3 %v5084_v26  ;;  %v6362_v26 = vld [vmem:[#allocation4 + $0x148] sm:$0xff] }
 0x248   :  { %2073 = vmatpush.bf16.msra.mxu0 %v6351_v47  ;;  %2099 = vmatpush.bf16.msra.mxu2 %v6367_v0 }
 0x249   :  { %1748 = vmatmul.bf16.vlgmr.msra.gmra.mxu1 %v1232_v31 }
 0x24a   :  { %2085 = vmatpush.bf16.msra.mxu1 %v6360_v33 }
 0x24b   :  { %1820 = vmatpush.bf16.msrb.mxu3 %v5072_v32 }
 0x24c   :  { %2074 = vmatpush.bf16.msra.mxu0 %v6350_v48  ;;  %2100 = vmatpush.bf16.msra.mxu2 %v6366_v2 }
 0x24e   :  { %2086 = vmatpush.bf16.msra.mxu1 %v6359_v54 }
 0x24f   :  { %1821 = vmatpush.bf16.msrb.mxu3 %v5060_v50 }
 0x250   :  { %2075 = vmatpush.bf16.msra.mxu0 %v6349_v49  ;;  %2101 = vmatpush.bf16.msra.mxu2 %v6365_v10 }
 0x252   :  { %1774 = vmatmul.bf16.vlgmr.msra.gmra.mxu3 %v1231_v20  ;;  %1787 = vmatmul.bf16.vlgmr.msrb.gmra.mxu0 %v1232_v31 }
 0x253   :  { %1813 = vmatmul.bf16.vlgmr.msrb.gmra.mxu2 %v1231_v20  ;;  %1822 = vmatpush.bf16.msrb.mxu3 %v5048_v36 }
 0x254   :  { %2076 = vmatpush.bf16.msra.mxu0 %v6348_v51  ;;  %2087 = vmatpush.bf16.msra.mxu1 %v6358_v58 }
 0x255   :  { %2102 = vmatpush.bf16.msra.mxu2 %v6364_v15 }
 0x257   :  { %1823 = vmatpush.bf16.msrb.mxu3 %v5036_v39 }
 0x258   :  { %2077 = vmatpush.bf16.msra.mxu0 %v6347_v52  ;;  %2088 = vmatpush.bf16.msra.mxu1 %v6357_v60 }
 0x259   :  { %1800 = vmatmul.bf16.vlgmr.msrb.gmra.mxu1 %v1230_v19  ;;  %2103 = vmatpush.bf16.msra.mxu2 %v6363_v22  ;;  %v6391_v22 = vld [vmem:[#allocation6 + $0x170] sm:$0xf0] }
 0x25b   :  { %1824 = vmatpush.bf16.msrb.mxu3 %v5024_v42 }
 0x25c   :  { %2078 = vmatpush.bf16.msra.mxu0 %v6346_v56  ;;  %2089 = vmatpush.bf16.msra.mxu1 %v6356_v62 }
 0x25d   :  { %2104 = vmatpush.bf16.msra.mxu2 %v6362_v26  ;;  %v5287_v26 = vld [vmem:[#allocation6 + $0x170] sm:$0xf] }
 0x25f   :  { %1825 = vmatpush.bf16.msrb.mxu3 %v5012_v46 }
 0x260   :  { %2079 = vmatpush.bf16.msra.mxu0 %v6345_v59  ;;  %2090 = vmatpush.bf16.msra.mxu1 %v6355_v1 }
 0x261   :  { %2105 = vmatpush.bf16.msra.mxu2 %v6361_v45  ;;  %v5269_v45 = vld [vmem:[#allocation6 + $0x15c] sm:$0xf0] }
 0x262   :  { %1826 = vmatmul.bf16.vlgmr.msrb.gmra.mxu3 %v1232_v31 }
 0x264   :  { %2091 = vmatpush.bf16.msra.mxu1 %v6354_v4 }
 0x268   :  { %2092 = vmatpush.bf16.msra.mxu1 %v6353_v12 }
 0x2bf   :  { %v1736_v63 = vpop.f32.mrf.mxu0 }
 0x2c5   :  { %v1723_v3 = vpop.f32.mrf.mxu3 }
 0x2c6   :  { %v1737_v5 = vadd.f32 %v1736_v63, %v1723_v3  ;;  %v1749_v6 = vpop.f32.mrf.mxu1  ;;  %v1762_v8 = vpop.f32.mrf.mxu2 }
 0x2c7   :  { %v1738_v13 = vpop.f32.mrf.mxu0 }
 0x2c8   :  { %v6890_v11 = vadd.f32 %v1749_v6, %v1737_v5 }
 0x2ca   :  { %v1831_v14 = vmul.f32 %v6849_v53, %v6890_v11 }
 0x2cc   :  { %v1834_v16 = vrot.slane %v1831_v14, 4  ;;  %v1852_v7 = vmul.f32 %v1831_v14, %v6890_v11 }
 0x2cd   :  { %v1725_v9 = vpop.f32.mrf.mxu3 }
 0x2ce   :  { %v1835_v17 = vadd.f32 %v1834_v16, %v1831_v14  ;;  %v1855_v18 = vrot.slane %v1852_v7, 4  ;;  %v1751_v19 = vpop.f32.mrf.mxu1  ;;  %v1764_v20 = vpop.f32.mrf.mxu2 }
 0x2cf   :  { %v1788_v21 = vpop.f32.mrf.mxu0 }
 0x2d0   :  { %v1836_v57 = vrot.slane %v1835_v17, 2  ;;  %v1856_v24 = vadd.f32 %v1855_v18, %v1852_v7 }
 0x2d2   :  { %v1837_v23 = vadd.f32 %v1836_v57, %v1835_v17  ;;  %v1857_v25 = vrot.slane %v1856_v24, 2  ;;  %v6390_v57 = vld [vmem:[#allocation6 + $0x16c] sm:$0xf] }
 0x2d4   :  { %v1838_v27 = vrot.slane %v1837_v23, 1  ;;  %v1858_v28 = vadd.f32 %v1857_v25, %v1856_v24  ;;  %v5281_v25 = vld [vmem:[#allocation6 + $0x174] sm:$0xf0] }
 0x2d5   :  { %v1775_v29 = vpop.f32.mrf.mxu3 }
 0x2d6   :  { %v1859_v30 = vrot.slane %v1858_v28, 1  ;;  %v1776_v31 = vadd.f32 %v1775_v29, %v1762_v8  ;;  %v1801_v32 = vpop.f32.mrf.mxu1  ;;  %v1814_v44 = vpop.f32.mrf.mxu2  ;;  %v1839_v36 = vadd.f32 %v1838_v27, %v1837_v23  ;;  %v6392_v27 = vld [vmem:[#allocation6 + $0x178] sm:$0xf0] }
 0x2d7   :  { %v1790_v50 = vpop.f32.mrf.mxu0  ;;  %v1815_v54 = vadd.f32 %v1814_v44, %v1801_v32  ;;  %v5288_v29 = vor.u32 %v6392_v27, %v5287_v26  ;;  %v6387_v32 = vld [vmem:[#allocation6 + $0x154] sm:$0xf] }
 0x2d8   :  { %v1860_v34 = vadd.f32 %v1859_v30, %v1858_v28  ;;  %v6895_v35 = vadd.f32 %v1788_v21, %v1776_v31  ;;  %v5279_v21 = vld [vmem:[#allocation6 + $0x168] sm:$0xf]  ;;  %v5284_v28 = vor.u32 %v6390_v57, %v5281_v25  ;;  %v5267_v30 = vld [vmem:[#allocation6 + $0x150] sm:$0xf]  ;;  %v6388_v31 = vld [vmem:[#allocation6 + $0x158] sm:$0xf0] }
 0x2d9   :  { %v5280_v23 = vor.u32 %v6391_v22, %v5279_v21  ;;  %2326 = vmatpush.bf16.msrb.mxu1 %v5288_v29  ;;  %v5268_v44 = vor.u32 %v6388_v31, %v5267_v30  ;;  %v5275_v50 = vld [vmem:[#allocation6 + $0x158] sm:$0xf]  ;;  %v5215_v25 = vld [vmem:[#allocation6 + $0xe0] sm:$0xf] }
 0x2da   :  { %v1832_v37 = vmul.f32 %v6849_v53, %v6895_v35  ;;  %v1873_v38 = vsel %vm750_vm1, %v1839_v36, %v1860_v34  ;;  %2313 = vmatpush.bf16.msrb.mxu0 %v5284_v28  ;;  %v6389_v34 = vld [vmem:[#allocation6 + $0x160] sm:$0xf0]  ;;  %v5272_v36 = vor.u32 %v6387_v32, %v5269_v45  ;;  %v5207_v22 = vld [vmem:[#allocation6 + $0xd8] sm:$0xf]  ;;  %v6374_v28 = vld [vmem:[#allocation6 + $0xe8] sm:$0xf0] }
 0x2db   :  { %v1876_v39 = vpack.c.bf16 %v1873_v38, %v1873_v38  ;;  %2300 = vmatpush.bf16.msra.mxu3 %v5280_v23  ;;  %v5255_v38 = vld [vmem:[#allocation6 + $0x138] sm:$0xf]  ;;  %v5209_v23 = vld [vmem:[#allocation6 + $0xe4] sm:$0xf0]  ;;  %v5216_v29 = vor.u32 %v6374_v28, %v5215_v25  ;;  %v5195_v31 = vld [vmem:[#allocation6 + $0xc0] sm:$0xf] }
 0x2dc   :  { %v1840_v40 = vrot.slane %v1832_v37, 4  ;;  %v1853_v41 = vmul.f32 %v1832_v37, %v6895_v35  ;;  %v6370_v32 = vld [vmem:[#allocation6 + $0xc8] sm:$0xf0]  ;;  %v6408_v28 = vld [vmem:[#allocation2 + $0x4fc] sm:$0xf] }
 0x2dd   :  { %v1777_v42 = vpop.f32.mrf.mxu3  ;;  %2080 = vmatmul.bf16.vlgmr.msra.gmra.mxu0 %v1876_v39  ;;  %v6385_v39 = vld [vmem:[#allocation6 + $0x140] sm:$0xf0]  ;;  %v5196_v45 = vor.u32 %v6370_v32, %v5195_v31  ;;  %v6454_v25 = vld [vmem:[#allocation2 + $0x668] sm:$0xf0]  ;;  %v6403_v31 = vld [vmem:[#allocation2 + $0x4d0] sm:$0xf0] }
 0x2de   :  { %v1841_v55 = vadd.f32 %v1840_v40, %v1832_v37  ;;  %v1861_v43 = vrot.slane %v1853_v41, 4  ;;  %v1803_v46 = vpop.f32.mrf.mxu1  ;;  %v1816_v47 = vpop.f32.mrf.mxu2  ;;  %v5276_v37 = vor.u32 %v6389_v34, %v5275_v50  ;;  %2314 = vmatpush.bf16.msrb.mxu0 %v5272_v36  ;;  %v6384_v40 = vld [vmem:[#allocation6 + $0x13c] sm:$0xf]  ;;  %v5256_v42 = vor.u32 %v6385_v39, %v5255_v38  ;;  %v6369_v50 = vld [vmem:[#allocation6 + $0xc4] sm:$0xf] }
 0x2df   :  { %2301 = vmatpush.bf16.msra.mxu3 %v5268_v44  ;;  %v6386_v46 = vld [vmem:[#allocation6 + $0x148] sm:$0xf0]  ;;  %v5197_v34 = vld [vmem:[#allocation6 + $0xcc] sm:$0xf0]  ;;  %v5203_v36 = vld [vmem:[#allocation6 + $0xc8] sm:$0xf] }
 0x2e0   :  { %v1842_v48 = vrot.slane %v1841_v55, 2  ;;  %v1862_v49 = vadd.f32 %v1861_v43, %v1853_v41  ;;  %2327 = vmatpush.bf16.msrb.mxu1 %v5276_v37  ;;  %v5263_v43 = vld [vmem:[#allocation6 + $0x140] sm:$0xf]  ;;  %v5200_v38 = vor.u32 %v6369_v50, %v5197_v34  ;;  %v6371_v39 = vld [vmem:[#allocation6 + $0xd0] sm:$0xf0] }
 0x2e1   :  { %v5423_v50 = vld [vmem:[#allocation2 + $0x588] sm:$0xf] }
 0x2e2   :  { %v1843_v51 = vadd.f32 %v1842_v48, %v1841_v55  ;;  %v1863_v33 = vrot.slane %v1862_v49, 2  ;;  %v5257_v55 = vld [vmem:[#allocation6 + $0x144] sm:$0xf0]  ;;  %v5264_v48 = vor.u32 %v6386_v46, %v5263_v43  ;;  %v6415_v43 = vld [vmem:[#allocation2 + $0x530] sm:$0xf0] }
 0x2e3   :  { %v5260_v47 = vor.u32 %v6384_v40, %v5257_v55  ;;  %2302 = vmatpush.bf16.msra.mxu3 %v5256_v42  ;;  %v5204_v40 = vor.u32 %v6371_v39, %v5203_v36  ;;  %v5375_v55 = vld [vmem:[#allocation2 + $0x528] sm:$0xf]  ;;  %v6427_v36 = vld [vmem:[#allocation2 + $0x590] sm:$0xf0] }
 0x2e4   :  { %v1864_v52 = vadd.f32 %v1863_v33, %v1862_v49  ;;  %v1844_v56 = vrot.slane %v1843_v51, 1  ;;  %2328 = vmatpush.bf16.msrb.mxu1 %v5264_v48  ;;  %v5243_v49 = vld [vmem:[#allocation6 + $0x120] sm:$0xf]  ;;  %v6381_v33 = vld [vmem:[#allocation6 + $0x124] sm:$0xf]  ;;  %v5376_v46 = vor.u32 %v6415_v43, %v5375_v55 }
 0x2e5   :  { %v1827_v58 = vpop.f32.mrf.mxu3  ;;  %2315 = vmatpush.bf16.msrb.mxu0 %v5260_v47  ;;  %v5363_v47 = vld [vmem:[#allocation2 + $0x510] sm:$0xf]  ;;  %v6412_v48 = vld [vmem:[#allocation2 + $0x518] sm:$0xf0] }
 0x2e6   :  { %v1865_v59 = vrot.slane %v1864_v52, 1  ;;  %v6901_v60 = vadd.f32 %v1827_v58, %v1815_v54  ;;  %v1845_v62 = vadd.f32 %v1844_v56, %v1843_v51  ;;  %v6382_v51 = vld [vmem:[#allocation6 + $0x128] sm:$0xf0]  ;;  %v5245_v54 = vld [vmem:[#allocation6 + $0x12c] sm:$0xf0]  ;;  %2838 = vmatpush.bf16.msrb.mxu2 %v5376_v46 }
 0x2e7   :  { %v5251_v56 = vld [vmem:[#allocation6 + $0x128] sm:$0xf]  ;;  %v6383_v58 = vld [vmem:[#allocation6 + $0x130] sm:$0xf0]  ;;  %v5341_v55 = vld [vmem:[#allocation2 + $0x4ec] sm:$0xf0] }
 0x2e8   :  { %v1833_v61 = vmul.f32 %v6849_v53, %v6901_v60  ;;  %v1866_v63 = vadd.f32 %v1865_v59, %v1864_v52  ;;  %v5244_v52 = vor.u32 %v6382_v51, %v5243_v49  ;;  %v5248_v59 = vor.u32 %v6381_v33, %v5245_v54  ;;  %v5471_v49 = vld [vmem:[#allocation2 + $0x5e8] sm:$0xf]  ;;  %v6439_v51 = vld [vmem:[#allocation2 + $0x5f0] sm:$0xf0]  ;;  %v5315_v43 = vld [vmem:[#allocation2 + $0x4b0] sm:$0xf] }
 0x2e9   :  { %v5567_v33 = vld [vmem:[#allocation2 + $0x6a8] sm:$0xf]  ;;  %v5364_v54 = vor.u32 %v6412_v48, %v5363_v47  ;;  %v6400_v46 = vld [vmem:[#allocation2 + $0x4b8] sm:$0xf0] }
 0x2ea   :  { %v1846_v0 = vrot.slane %v1833_v61, 4  ;;  %v1854_v1 = vmul.f32 %v1833_v61, %v6901_v60  ;;  %v1874_v2 = vsel %vm750_vm1, %v1845_v62, %v1866_v63  ;;  %2303 = vmatpush.bf16.msra.mxu3 %v5244_v52  ;;  %2316 = vmatpush.bf16.msrb.mxu0 %v5248_v59  ;;  %v5231_v62 = vld [vmem:[#allocation6 + $0x108] sm:$0xf]  ;;  %v6379_v63 = vld [vmem:[#allocation6 + $0x110] sm:$0xf0] }
 0x2eb   :  { %v1877_v3 = vpack.c.bf16 %v1874_v2, %v1874_v2  ;;  %v5233_v2 = vld [vmem:[#allocation6 + $0x114] sm:$0xf0]  ;;  %v6463_v52 = vld [vmem:[#allocation2 + $0x6b0] sm:$0xf0]  ;;  %2839 = vmatpush.bf16.msrb.mxu2 %v5364_v54  ;;  %v6424_v54 = vld [vmem:[#allocation2 + $0x578] sm:$0xf0] }
 0x2ec   :  { %v1847_v4 = vadd.f32 %v1846_v0, %v1833_v61  ;;  %v1867_v5 = vrot.slane %v1854_v1, 4  ;;  %v5252_v61 = vor.u32 %v6383_v58, %v5251_v56  ;;  %v6378_v0 = vld [vmem:[#allocation6 + $0x10c] sm:$0xf]  ;;  %v5472_v56 = vor.u32 %v6439_v51, %v5471_v49  ;;  %v5351_v59 = vld [vmem:[#allocation2 + $0x4f8] sm:$0xf] }
 0x2ed   :  { %v1829_v6 = vpop.f32.mrf.mxu3  ;;  %2093 = vmatmul.bf16.vlgmr.msra.gmra.mxu1 %v1877_v3  ;;  %v5239_v3 = vld [vmem:[#allocation6 + $0x110] sm:$0xf]  ;;  %v5568_v58 = vor.u32 %v6463_v52, %v5567_v33  ;;  %v5424_v49 = vor.u32 %v6427_v36, %v5423_v50 }
 0x2ee   :  { %v1848_v8 = vrot.slane %v1847_v4, 2  ;;  %v1868_v13 = vadd.f32 %v1867_v5, %v1854_v1  ;;  %2329 = vmatpush.bf16.msrb.mxu1 %v5252_v61  ;;  %v5232_v1 = vor.u32 %v6379_v63, %v5231_v62  ;;  %v5236_v5 = vor.u32 %v6378_v0, %v5233_v2  ;;  %v6409_v61 = vld [vmem:[#allocation2 + $0x500] sm:$0xf0]  ;;  %v5459_v62 = vld [vmem:[#allocation2 + $0x5d0] sm:$0xf] }
 0x2ef   :  { %v6436_v63 = vld [vmem:[#allocation2 + $0x5d8] sm:$0xf0]  ;;  %v5555_v0 = vld [vmem:[#allocation2 + $0x690] sm:$0xf] }
 0x2f0   :  { %v1849_v10 = vadd.f32 %v1848_v8, %v1847_v4  ;;  %v1869_v12 = vrot.slane %v1868_v13, 2  ;;  %v6380_v4 = vld [vmem:[#allocation6 + $0x118] sm:$0xf0]  ;;  %2304 = vmatpush.bf16.msra.mxu3 %v5232_v1  ;;  %2317 = vmatpush.bf16.msrb.mxu0 %v5236_v5  ;;  %v5460_v2 = vor.u32 %v6436_v63, %v5459_v62  ;;  %v5377_v5 = vld [vmem:[#allocation2 + $0x534] sm:$0xf0] }
 0x2f1   :  { %v5240_v6 = vor.u32 %v6380_v4, %v5239_v3  ;;  %v6460_v1 = vld [vmem:[#allocation2 + $0x698] sm:$0xf0]  ;;  %v6414_v4 = vld [vmem:[#allocation2 + $0x52c] sm:$0xf]  ;;  %v5411_v33 = vld [vmem:[#allocation2 + $0x570] sm:$0xf] }
 0x2f2   :  { %v1850_v14 = vrot.slane %v1849_v10, 1  ;;  %v1870_v15 = vadd.f32 %v1869_v12, %v1868_v13  ;;  %v5219_v13 = vld [vmem:[#allocation6 + $0xf0] sm:$0xf]  ;;  %v6375_v12 = vld [vmem:[#allocation6 + $0xf4] sm:$0xf]  ;;  %v5556_v3 = vor.u32 %v6460_v1, %v5555_v0 }
 0x2f3   :  { %2330 = vmatpush.bf16.msrb.mxu1 %v5240_v6  ;;  %v5447_v6 = vld [vmem:[#allocation2 + $0x5b8] sm:$0xf]  ;;  %v6397_v1 = vld [vmem:[#allocation2 + $0x4a0] sm:$0xf0] }
 0x2f4   :  { %v1871_v16 = vrot.slane %v1870_v15, 1  ;;  %v1851_v9 = vadd.f32 %v1850_v14, %v1849_v10  ;;  %v6376_v10 = vld [vmem:[#allocation6 + $0xf8] sm:$0xf0]  ;;  %v5329_v62 = vld [vmem:[#allocation2 + $0x4d4] sm:$0xf0] }
 0x2f5   :  { %v5303_v0 = vld [vmem:[#allocation2 + $0x498] sm:$0xf] }
 0x2f6   :  { %v1872_v7 = vadd.f32 %v1871_v16, %v1870_v15  ;;  %v5220_v15 = vor.u32 %v6376_v10, %v5219_v13  ;;  %v5221_v16 = vld [vmem:[#allocation6 + $0xfc] sm:$0xf0]  ;;  %v5352_v13 = vor.u32 %v6409_v61, %v5351_v59  ;;  %v5316_v59 = vor.u32 %v6400_v46, %v5315_v43  ;;  %v6402_v61 = vld [vmem:[#allocation2 + $0x4cc] sm:$0xf]  ;;  %v6432_v46 = vld [vmem:[#allocation2 + $0x5bc] sm:$0xf] }
 0x2f7   :  { %v5339_v10 = vld [vmem:[#allocation2 + $0x4e0] sm:$0xf] }
 0x2f8   :  { %v1875_v17 = vsel %vm750_vm1, %v1851_v9, %v1872_v7  ;;  %v5227_v7 = vld [vmem:[#allocation6 + $0xf8] sm:$0xf]  ;;  %v6377_v9 = vld [vmem:[#allocation6 + $0x100] sm:$0xf0]  ;;  %2305 = vmatpush.bf16.msra.mxu3 %v5220_v15  ;;  %2840 = vmatpush.bf16.msrb.mxu2 %v5352_v13 }
 0x2f9   :  { %v1878_v18 = vpack.c.bf16 %v1875_v17, %v1875_v17  ;;  %v6457_v15 = vld [vmem:[#allocation2 + $0x680] sm:$0xf0]  ;;  %v5495_v13 = vld [vmem:[#allocation2 + $0x618] sm:$0xf] }
 0x2fb   :  { %2106 = vmatmul.bf16.vlgmr.msra.gmra.mxu2 %v1878_v18  ;;  %v5224_v18 = vor.u32 %v6375_v12, %v5221_v16  ;;  %v5380_v12 = vor.u32 %v6414_v4, %v5377_v5  ;;  %v5399_v4 = vld [vmem:[#allocation2 + $0x558] sm:$0xf] }
 0x2fd   :  { %2318 = vmatpush.bf16.msrb.mxu0 %v5224_v18 }
 0x35a   :  { %v2081_v19 = vpop.f32.mrf.mxu0 }
 0x362   :  { %v2083_v20 = vpop.f32.mrf.mxu0 }
 0x363   :  { %v5228_v20 = vor.u32 %v6377_v9, %v5227_v7  ;;  %v6406_v7 = vld [vmem:[#allocation2 + $0x4e8] sm:$0xf0]  ;;  %v6411_v9 = vld [vmem:[#allocation2 + $0x514] sm:$0xf] }
 0x365   :  { %2331 = vmatpush.bf16.msrb.mxu1 %v5228_v20 }
 0x369   :  { %2332 = vmatpush.bf16.msrb.mxu1 %v5216_v29  ;;  %v5353_v29 = vld [vmem:[#allocation2 + $0x504] sm:$0xf0] }
 0x36a   :  { %v2094_v24 = vpop.f32.mrf.mxu1  ;;  %v5356_v34 = vor.u32 %v6408_v28, %v5353_v29  ;;  %v5569_v28 = vld [vmem:[#allocation2 + $0x6b4] sm:$0xf0]  ;;  %v5383_v29 = vld [vmem:[#allocation2 + $0x530] sm:$0xf] }
 0x36b   :  { %v2095_v8 = vadd.f32 %v2094_v24, %v2081_v19  ;;  %v6373_v19 = vld [vmem:[#allocation6 + $0xe0] sm:$0xf0]  ;;  %v6372_v24 = vld [vmem:[#allocation6 + $0xdc] sm:$0xf] }
 0x36c   :  { %v5208_v57 = vor.u32 %v6373_v19, %v5207_v22  ;;  %v5212_v27 = vor.u32 %v6372_v24, %v5209_v23  ;;  %v5435_v19 = vld [vmem:[#allocation2 + $0x5a0] sm:$0xf]  ;;  %v6430_v24 = vld [vmem:[#allocation2 + $0x5a8] sm:$0xf0] }
 0x36d   :  { %2333 = vmatpush.bf16.msrb.mxu1 %v5204_v40  ;;  %v5531_v23 = vld [vmem:[#allocation2 + $0x660] sm:$0xf] }
 0x36e   :  { %2306 = vmatpush.bf16.msra.mxu3 %v5208_v57  ;;  %2319 = vmatpush.bf16.msrb.mxu0 %v5212_v27  ;;  %v5340_v27 = vor.u32 %v6406_v7, %v5339_v10  ;;  %v6445_v10 = vld [vmem:[#allocation2 + $0x620] sm:$0xf0]  ;;  %v5291_v7 = vld [vmem:[#allocation2 + $0x480] sm:$0xf] }
 0x370   :  { %2841 = vmatpush.bf16.msrb.mxu2 %v5340_v27  ;;  %v6462_v27 = vld [vmem:[#allocation2 + $0x6ac] sm:$0xf] }
 0x371   :  { %2877 = vmatpush.bf16.msra.mxu1 %v5380_v12  ;;  %v5304_v12 = vor.u32 %v6397_v1, %v5303_v0  ;;  %v6440_v1 = vld [vmem:[#allocation2 + $0x5f8] sm:$0xf0] }
 0x372   :  { %v2096_v41 = vpop.f32.mrf.mxu1  ;;  %2307 = vmatpush.bf16.msra.mxu3 %v5196_v45  ;;  %2320 = vmatpush.bf16.msrb.mxu0 %v5200_v38  ;;  %v5532_v45 = vor.u32 %v6454_v25, %v5531_v23  ;;  %v6451_v38 = vld [vmem:[#allocation2 + $0x650] sm:$0xf0]  ;;  %v6418_v23 = vld [vmem:[#allocation2 + $0x548] sm:$0xf0]  ;;  %v5483_v25 = vld [vmem:[#allocation2 + $0x600] sm:$0xf] }
 0x376   :  { %2851 = vmatpush.bf16.msrb.mxu3 %v5472_v56  ;;  %2864 = vmatpush.bf16.msra.mxu0 %v5568_v58  ;;  %v5507_v56 = vld [vmem:[#allocation2 + $0x630] sm:$0xf]  ;;  %v6448_v58 = vld [vmem:[#allocation2 + $0x638] sm:$0xf0] }
 0x37a   :  { %2852 = vmatpush.bf16.msrb.mxu3 %v5460_v2  ;;  %2865 = vmatpush.bf16.msra.mxu0 %v5556_v3  ;;  %v5412_v2 = vor.u32 %v6424_v54, %v5411_v33  ;;  %v5508_v3 = vor.u32 %v6448_v58, %v5507_v56  ;;  %v5371_v33 = vld [vmem:[#allocation2 + $0x518] sm:$0xf]  ;;  %v6413_v54 = vld [vmem:[#allocation2 + $0x520] sm:$0xf0]  ;;  %v5293_v58 = vld [vmem:[#allocation2 + $0x48c] sm:$0xf0] }
 0x37b   :  { %v6393_v56 = vld [vmem:[#allocation2 + $0x484] sm:$0xf] }
 0x37e   :  { %v2107_v14 = vpop.f32.mrf.mxu2 }
 0x37f   :  { %v2108_v17 = vadd.f32 %v2107_v14, %v2095_v8  ;;  %v6433_v8 = vld [vmem:[#allocation2 + $0x5c0] sm:$0xf0]  ;;  %v5543_v14 = vld [vmem:[#allocation2 + $0x678] sm:$0xf] }
 0x380   :  { %v5448_v20 = vor.u32 %v6433_v8, %v5447_v6  ;;  %v5544_v22 = vor.u32 %v6457_v15, %v5543_v14  ;;  %v5332_v6 = vor.u32 %v6402_v61, %v5329_v62  ;;  %v6421_v8 = vld [vmem:[#allocation2 + $0x560] sm:$0xf0]  ;;  %v6399_v14 = vld [vmem:[#allocation2 + $0x4b4] sm:$0xf]  ;;  %v5317_v15 = vld [vmem:[#allocation2 + $0x4bc] sm:$0xf0] }
 0x381   :  { %v6908_v21 = vmul.f32 0.025, %v2108_v17  ;;  %v5365_v17 = vld [vmem:[#allocation2 + $0x51c] sm:$0xf0]  ;;  %v6429_v61 = vld [vmem:[#allocation2 + $0x5a4] sm:$0xf] }
 0x382   :  { %v5368_v57 = vor.u32 %v6411_v9, %v5365_v17  ;;  %2853 = vmatpush.bf16.msrb.mxu3 %v5448_v20  ;;  %2866 = vmatpush.bf16.msra.mxu0 %v5544_v22  ;;  %v6394_v9 = vld [vmem:[#allocation2 + $0x488] sm:$0xf0]  ;;  %v5400_v20 = vor.u32 %v6421_v8, %v5399_v4  ;;  %v5496_v22 = vor.u32 %v6445_v10, %v5495_v13  ;;  %v5437_v62 = vld [vmem:[#allocation2 + $0x5ac] sm:$0xf0]  ;;  %v5545_v4 = vld [vmem:[#allocation2 + $0x684] sm:$0xf0] }
 0x383   :  { %v2112_v26 = vmul.f32 %v6908_v21, %v6908_v21  ;;  %v6438_v17 = vld [vmem:[#allocation2 + $0x5ec] sm:$0xf]  ;;  %v5440_v0 = vor.u32 %v6429_v61, %v5437_v62  ;;  %v5425_v10 = vld [vmem:[#allocation2 + $0x594] sm:$0xf0]  ;;  %v6425_v61 = vld [vmem:[#allocation2 + $0x580] sm:$0xf0] }
 0x384   :  { %2878 = vmatpush.bf16.msra.mxu1 %v5368_v57  ;;  %v6410_v8 = vld [vmem:[#allocation2 + $0x508] sm:$0xf0] }
 0x385   :  { %v2114_v30 = vrot.slane %v2112_v26, 7  ;;  %v6426_v13 = vld [vmem:[#allocation2 + $0x58c] sm:$0xf] }
 0x386   :  { %v2109_v44 = vpop.f32.mrf.mxu2  ;;  %2867 = vmatpush.bf16.msra.mxu0 %v5532_v45  ;;  %v5305_v45 = vld [vmem:[#allocation2 + $0x4a4] sm:$0xf0] }
 0x387   :  { %v2116_v37 = vsub.f32 %v6908_v21, %v2114_v30  ;;  %v5327_v30 = vld [vmem:[#allocation2 + $0x4c8] sm:$0xf]  ;;  %v5436_v44 = vor.u32 %v6430_v24, %v5435_v19  ;;  %v5387_v19 = vld [vmem:[#allocation2 + $0x540] sm:$0xf]  ;;  %v5320_v24 = vor.u32 %v6399_v14, %v5317_v15  ;;  %v5428_v14 = vor.u32 %v6426_v13, %v5425_v10  ;;  %v5467_v15 = vld [vmem:[#allocation2 + $0x5d8] sm:$0xf] }
 0x388   :  { %v5328_v40 = vor.u32 %v6403_v31, %v5327_v30  ;;  %2879 = vmatpush.bf16.msra.mxu1 %v5356_v34  ;;  %v5292_v31 = vor.u32 %v6394_v9, %v5291_v7  ;;  %v5388_v36 = vor.u32 %v6418_v23, %v5387_v19  ;;  %v6453_v9 = vld [vmem:[#allocation2 + $0x664] sm:$0xf]  ;;  %v6423_v19 = vld [vmem:[#allocation2 + $0x574] sm:$0xf]  ;;  %v5455_v23 = vld [vmem:[#allocation2 + $0x5c0] sm:$0xf] }
 0x389   :  { %v2117_v41 = vmax.f32 %v2116_v37, 0.0  ;;  %v5519_v37 = vld [vmem:[#allocation2 + $0x648] sm:$0xf]  ;;  %2854 = vmatpush.bf16.msrb.mxu3 %v5436_v44  ;;  %v6396_v44 = vld [vmem:[#allocation2 + $0x49c] sm:$0xf] }
 0x38a   :  { %v5520_v51 = vor.u32 %v6451_v38, %v5519_v37  ;;  %2842 = vmatpush.bf16.msrb.mxu2 %v5328_v40  ;;  %v6435_v37 = vld [vmem:[#allocation2 + $0x5d4] sm:$0xf]  ;;  %v5461_v38 = vld [vmem:[#allocation2 + $0x5dc] sm:$0xf0]  ;;  %v5572_v40 = vor.u32 %v6462_v27, %v5569_v28  ;;  %v6450_v27 = vld [vmem:[#allocation2 + $0x64c] sm:$0xf] }
 0x38b   :  { %v6913_v42 = vadd.f32 1e-05, %v2117_v41  ;;  %v6405_v41 = vld [vmem:[#allocation2 + $0x4e4] sm:$0xf]  ;;  %v5464_v43 = vor.u32 %v6435_v37, %v5461_v38  ;;  %v5521_v28 = vld [vmem:[#allocation2 + $0x654] sm:$0xf0] }
 0x38c   :  { %v5344_v52 = vor.u32 %v6405_v41, %v5341_v55  ;;  %2868 = vmatpush.bf16.msra.mxu0 %v5520_v51  ;;  %v5308_v55 = vor.u32 %v6396_v44, %v5305_v45  ;;  %v5557_v51 = vld [vmem:[#allocation2 + $0x69c] sm:$0xf0]  ;;  %v5401_v44 = vld [vmem:[#allocation2 + $0x564] sm:$0xf0]  ;;  %v6447_v38 = vld [vmem:[#allocation2 + $0x634] sm:$0xf] }
 0x38d   :  { %6621 = vrsqrt.f32 %v6913_v42  ;;  %vm2125_vm6 = vweird.f32 %v6913_v42  ;;  %2855 = vmatpush.bf16.msrb.mxu3 %v5424_v49  ;;  %v6459_v49 = vld [vmem:[#allocation2 + $0x694] sm:$0xf]  ;;  %v5395_v10 = vld [vmem:[#allocation2 + $0x548] sm:$0xf] }
 0x38e   :  { %2880 = vmatpush.bf16.msra.mxu1 %v5344_v52  ;;  %2843 = vmatpush.bf16.msrb.mxu2 %v5316_v59  ;;  %v5560_v52 = vor.u32 %v6459_v49, %v5557_v51  ;;  %v5296_v59 = vor.u32 %v6393_v56, %v5293_v58  ;;  %v5431_v49 = vld [vmem:[#allocation2 + $0x590] sm:$0xf]  ;;  %v6428_v51 = vld [vmem:[#allocation2 + $0x598] sm:$0xf0]  ;;  %v5311_v56 = vld [vmem:[#allocation2 + $0x4a0] sm:$0xf] }
 0x390   :  { %2869 = vmatpush.bf16.msra.mxu0 %v5508_v3  ;;  %v6456_v3 = vld [vmem:[#allocation2 + $0x67c] sm:$0xf] }
 0x391   :  { %2856 = vmatpush.bf16.msrb.mxu3 %v5412_v2 }
 0x392   :  { %2881 = vmatpush.bf16.msra.mxu1 %v5332_v6  ;;  %2844 = vmatpush.bf16.msrb.mxu2 %v5304_v12  ;;  %v5548_v6 = vor.u32 %v6456_v3, %v5545_v4  ;;  %v6395_v4 = vld [vmem:[#allocation2 + $0x490] sm:$0xf0] }
 0x393   :  { %v6622_v16 = vpop.eup %6621 }
 0x394   :  { %v2120_v18 = vmul.f32 %v6622_v16, %v6913_v42  ;;  %vm2126_vm5 = vweird.f32 %v6622_v16  ;;  %2870 = vmatpush.bf16.msra.mxu0 %v5496_v22  ;;  %v6407_v22 = vld [vmem:[#allocation2 + $0x4f0] sm:$0xf0] }
 0x395   :  { %vm6919_vm7 = vmor %vm2125_vm6, %vm2126_vm5  ;;  %2857 = vmatpush.bf16.msrb.mxu3 %v5400_v20 }
 0x396   :  { %v2121_v26 = vmul.f32 %v6622_v16, %v2120_v18  ;;  %v5473_v18 = vld [vmem:[#allocation2 + $0x5f4] sm:$0xf0]  ;;  %2882 = vmatpush.bf16.msra.mxu1 %v5320_v24  ;;  %2845 = vmatpush.bf16.msrb.mxu2 %v5292_v31  ;;  %v6404_v31 = vld [vmem:[#allocation2 + $0x4d8] sm:$0xf0] }
 0x397   :  { %v5476_v34 = vor.u32 %v6438_v17, %v5473_v18  ;;  %v5533_v17 = vld [vmem:[#allocation2 + $0x66c] sm:$0xf0]  ;;  %v5347_v18 = vld [vmem:[#allocation2 + $0x4e8] sm:$0xf] }
 0x398   :  { %v2122_v32 = vmul.f32 0.5, %v2121_v26  ;;  %v6442_v26 = vld [vmem:[#allocation2 + $0x608] sm:$0xf0]  ;;  %v5536_v20 = vor.u32 %v6453_v9, %v5533_v17 }
 0x399   :  { %2858 = vmatpush.bf16.msrb.mxu3 %v5388_v36  ;;  %v6431_v36 = vld [vmem:[#allocation2 + $0x5b0] sm:$0xf0] }
 0x39a   :  { %v2123_v39 = vsub.f32 1.5, %v2122_v32  ;;  %v6416_v32 = vld [vmem:[#allocation2 + $0x538] sm:$0xf0]  ;;  %2890 = vmatpush.bf16.msra.mxu2 %v5476_v34  ;;  %2883 = vmatpush.bf16.msra.mxu1 %v5308_v55  ;;  %v5443_v34 = vld [vmem:[#allocation2 + $0x5a8] sm:$0xf] }
 0x39b   :  { %v5384_v41 = vor.u32 %v6416_v32, %v5383_v29  ;;  %v5335_v29 = vld [vmem:[#allocation2 + $0x4d0] sm:$0xf]  ;;  %v6420_v32 = vld [vmem:[#allocation2 + $0x55c] sm:$0xf]  ;;  %v5444_v37 = vor.u32 %v6431_v36, %v5443_v34  ;;  %v6401_v55 = vld [vmem:[#allocation2 + $0x4c0] sm:$0xf0] }
 0x39c   :  { %v2124_v47 = vmul.f32 %v6622_v16, %v2123_v39  ;;  %v5484_v39 = vor.u32 %v6442_v26, %v5483_v25  ;;  %v6434_v25 = vld [vmem:[#allocation2 + $0x5c8] sm:$0xf0]  ;;  %v5336_v45 = vor.u32 %v6404_v31, %v5335_v29  ;;  %v5563_v36 = vld [vmem:[#allocation2 + $0x698] sm:$0xf] }
 0x39d   :  { %v5456_v26 = vor.u32 %v6434_v25, %v5455_v23 }
 0x39e   :  { %v2128_v42 = vsel %vm6919_vm7, %v6622_v16, %v2124_v47  ;;  %2871 = vmatpush.bf16.msra.mxu0 %v5484_v39  ;;  %v5449_v47 = vld [vmem:[#allocation2 + $0x5c4] sm:$0xf0]  ;;  %2891 = vmatpush.bf16.msra.mxu2 %v5464_v43  ;;  %v5509_v39 = vld [vmem:[#allocation2 + $0x63c] sm:$0xf0]  ;;  %v6417_v43 = vld [vmem:[#allocation2 + $0x544] sm:$0xf] }
 0x39f   :  { %v2130_v63 = vrot.slane %v2128_v42, 1  ;;  %v5452_v48 = vor.u32 %v6432_v46, %v5449_v47  ;;  %v5372_v42 = vor.u32 %v6413_v54, %v5371_v33  ;;  %2884 = vmatpush.bf16.msra.mxu1 %v5296_v59  ;;  %v5389_v46 = vld [vmem:[#allocation2 + $0x54c] sm:$0xf0]  ;;  %v5432_v33 = vor.u32 %v6428_v51, %v5431_v49  ;;  %v5497_v54 = vld [vmem:[#allocation2 + $0x624] sm:$0xf0] }
 0x3a0   :  { %v5419_v59 = vld [vmem:[#allocation2 + $0x578] sm:$0xf]  ;;  %v6449_v51 = vld [vmem:[#allocation2 + $0x640] sm:$0xf0] }
 0x3a1   :  { %v2132_v5 = vmul.f32 %v2130_v63, %v6908_v21  ;;  %v6631_v21 = vld [vmem:[#allocation7] sm:$0xff]  ;;  %v5515_v49 = vld [vmem:[#allocation2 + $0x638] sm:$0xf] }
 0x3a2   :  { %2892 = vmatpush.bf16.msra.mxu2 %v5452_v48  ;;  %v5392_v48 = vor.u32 %v6417_v43, %v5389_v46  ;;  %v5527_v46 = vld [vmem:[#allocation2 + $0x650] sm:$0xf] }
 0x3a3   :  { %v2134_v16 = vrot.slane %v2132_v5, 7  ;;  %v5359_v5 = vld [vmem:[#allocation2 + $0x500] sm:$0xf] }
 0x3a4   :  { %v5360_v12 = vor.u32 %v6410_v8, %v5359_v5  ;;  %v5407_v5 = vld [vmem:[#allocation2 + $0x560] sm:$0xf] }
 0x3a5   :  { %v2136_v57 = vsub.f32 %v6631_v21, %v2134_v16  ;;  %v6437_v16 = vld [vmem:[#allocation2 + $0x5e0] sm:$0xf0]  ;;  %v5413_v21 = vld [vmem:[#allocation2 + $0x57c] sm:$0xf0] }
 0x3a6   :  { %2893 = vmatpush.bf16.msra.mxu2 %v5440_v0  ;;  %v5468_v7 = vor.u32 %v6437_v16, %v5467_v15  ;;  %v5416_v24 = vor.u32 %v6423_v19, %v5413_v21  ;;  %v6441_v0 = vld [vmem:[#allocation2 + $0x604] sm:$0xf] }
 0x3a7   :  { %v2137_v30 = vsel %vm750_vm1, %v2130_v63, %v2136_v57  ;;  %v5479_v63 = vld [vmem:[#allocation2 + $0x5f0] sm:$0xf]  ;;  %v5348_v57 = vor.u32 %v6407_v22, %v5347_v18 }
 0x3a8   :  { %v2138_v50 = vpack.c.bf16 %v2137_v30, %v2137_v30  ;;  %v5480_v2 = vor.u32 %v6440_v1, %v5479_v63  ;;  %v5524_v30 = vor.u32 %v6450_v27, %v5521_v28  ;;  %v5420_v63 = vor.u32 %v6425_v61, %v5419_v59  ;;  %v5485_v1 = vld [vmem:[#allocation2 + $0x60c] sm:$0xf0]  ;;  %v6472_v61 = vld [vmem:[#allocation4 + $0x1b8] sm:$0xff] }
 0x3a9   :  { %v5488_v3 = vor.u32 %v6441_v0, %v5485_v1  ;;  %v6469_v0 = vld [vmem:[#allocation4 + $0x1a0] sm:$0xff]  ;;  %v6468_v1 = vld [vmem:[#allocation4 + $0x198] sm:$0xff] }
 0x3aa   :  { %2308 = vmatmul.bf16.vlgmr.msra.gmra.mxu3 %v2138_v50  ;;  %2321 = vmatmul.bf16.vlgmr.msrb.gmra.mxu0 %v2138_v50 }
 0x3ab   :  { %2334 = vmatmul.bf16.vlgmr.msrb.gmra.mxu1 %v2138_v50  ;;  %2903 = vmatpush.bf16.msra.mxu3 %v5572_v40  ;;  %v5404_v50 = vor.u32 %v6420_v32, %v5401_v44  ;;  %v5323_v40 = vld [vmem:[#allocation2 + $0x4b8] sm:$0xf]  ;;  %v6464_v44 = vld [vmem:[#allocation2 + $0x6b8] sm:$0xf0] }
 0x3ac   :  { %2916 = vmatpush.bf16.msrb.mxu0 %v5384_v41  ;;  %2929 = vmatpush.bf16.msrb.mxu1 %v5480_v2  ;;  %v5512_v41 = vor.u32 %v6447_v38, %v5509_v39  ;;  %v5324_v47 = vor.u32 %v6401_v55, %v5323_v40  ;;  %v5299_v2 = vld [vmem:[#allocation2 + $0x488] sm:$0xf]  ;;  %v5551_v39 = vld [vmem:[#allocation2 + $0x680] sm:$0xf]  ;;  %v6455_v55 = vld [vmem:[#allocation2 + $0x670] sm:$0xf0] }
 0x3ad   :  { %2894 = vmatpush.bf16.msra.mxu2 %v5428_v14  ;;  %v5300_v8 = vor.u32 %v6395_v4, %v5299_v2  ;;  %v6480_v2 = vld [vmem:[#allocation4 + $0x1f8] sm:$0xff]  ;;  %v6479_v4 = vld [vmem:[#allocation4 + $0x1f0] sm:$0xff] }
 0x3af   :  { %2904 = vmatpush.bf16.msra.mxu3 %v5560_v52  ;;  %v6444_v52 = vld [vmem:[#allocation2 + $0x61c] sm:$0xf] }
 0x3b0   :  { %2917 = vmatpush.bf16.msrb.mxu0 %v5372_v42  ;;  %2930 = vmatpush.bf16.msrb.mxu1 %v5468_v7  ;;  %v5500_v58 = vor.u32 %v6444_v52, %v5497_v54  ;;  %v6398_v42 = vld [vmem:[#allocation2 + $0x4a8] sm:$0xf0]  ;;  %v5503_v52 = vld [vmem:[#allocation2 + $0x620] sm:$0xf] }
 0x3b1   :  { %2895 = vmatpush.bf16.msra.mxu2 %v5416_v24  ;;  %v5312_v62 = vor.u32 %v6398_v42, %v5311_v56  ;;  %v6446_v54 = vld [vmem:[#allocation2 + $0x628] sm:$0xf0]  ;;  %v6443_v42 = vld [vmem:[#allocation2 + $0x610] sm:$0xf0] }
 0x3b2   :  { %v5504_v56 = vor.u32 %v6446_v54, %v5503_v52 }
 0x3b3   :  { %2905 = vmatpush.bf16.msra.mxu3 %v5548_v6  ;;  %v6422_v6 = vld [vmem:[#allocation2 + $0x568] sm:$0xf0] }
 0x3b4   :  { %2918 = vmatpush.bf16.msrb.mxu0 %v5360_v12  ;;  %2931 = vmatpush.bf16.msrb.mxu1 %v5456_v26  ;;  %v5408_v13 = vor.u32 %v6422_v6, %v5407_v5  ;;  %v6419_v12 = vld [vmem:[#allocation2 + $0x550] sm:$0xf0]  ;;  %v6466_v5 = vld [vmem:[#allocation4 + $0x188] sm:$0xff] }
 0x3b5   :  { %2896 = vmatpush.bf16.msra.mxu2 %v5404_v50  ;;  %v5396_v14 = vor.u32 %v6419_v12, %v5395_v10  ;;  %v6478_v6 = vld [vmem:[#allocation4 + $0x1e8] sm:$0xff]  ;;  %v6488_v12 = vld [vmem:[#allocation4 + $0x238] sm:$0xff] }
 0x3b7   :  { %2906 = vmatpush.bf16.msra.mxu3 %v5536_v20 }
 0x3b8   :  { %2919 = vmatpush.bf16.msrb.mxu0 %v5348_v57  ;;  %2932 = vmatpush.bf16.msrb.mxu1 %v5444_v37  ;;  %v6461_v37 = vld [vmem:[#allocation2 + $0x6a0] sm:$0xf0] }
 0x3b9   :  { %2897 = vmatpush.bf16.msra.mxu2 %v5392_v48  ;;  %v5564_v38 = vor.u32 %v6461_v37, %v5563_v36 }
 0x3bb   :  { %2907 = vmatpush.bf16.msra.mxu3 %v5524_v30 }
 0x3bc   :  { %2920 = vmatpush.bf16.msrb.mxu0 %v5336_v45  ;;  %2933 = vmatpush.bf16.msrb.mxu1 %v5432_v33  ;;  %v5516_v33 = vor.u32 %v6449_v51, %v5515_v49 }
 0x3bf   :  { %2908 = vmatpush.bf16.msra.mxu3 %v5512_v41  ;;  %v5539_v41 = vld [vmem:[#allocation2 + $0x668] sm:$0xf] }
 0x3c0   :  { %2921 = vmatpush.bf16.msrb.mxu0 %v5324_v47  ;;  %2934 = vmatpush.bf16.msrb.mxu1 %v5420_v63  ;;  %v5540_v43 = vor.u32 %v6455_v55, %v5539_v41  ;;  %v6452_v47 = vld [vmem:[#allocation2 + $0x658] sm:$0xf0]  ;;  %v6470_v63 = vld [vmem:[#allocation4 + $0x1a8] sm:$0xff] }
 0x3c1   :  { %v5528_v48 = vor.u32 %v6452_v47, %v5527_v46  ;;  %v6481_v46 = vld [vmem:[#allocation4 + $0x200] sm:$0xff] }
 0x3c3   :  { %2909 = vmatpush.bf16.msra.mxu3 %v5500_v58  ;;  %v5491_v58 = vld [vmem:[#allocation2 + $0x608] sm:$0xf] }
 0x3c4   :  { %2922 = vmatpush.bf16.msrb.mxu0 %v5312_v62  ;;  %2935 = vmatpush.bf16.msrb.mxu1 %v5408_v13  ;;  %v5492_v59 = vor.u32 %v6443_v42, %v5491_v58  ;;  %v6471_v62 = vld [vmem:[#allocation4 + $0x1b0] sm:$0xff]  ;;  %v6477_v13 = vld [vmem:[#allocation4 + $0x1e0] sm:$0xff] }
 0x3c7   :  { %2910 = vmatpush.bf16.msra.mxu3 %v5488_v3  ;;  %v6467_v3 = vld [vmem:[#allocation4 + $0x190] sm:$0xff] }
 0x3c8   :  { %2923 = vmatpush.bf16.msrb.mxu0 %v5300_v8  ;;  %2936 = vmatpush.bf16.msrb.mxu1 %v5396_v14  ;;  %v6465_v8 = vld [vmem:[#allocation4 + $0x180] sm:$0xff]  ;;  %v6476_v14 = vld [vmem:[#allocation4 + $0x1d8] sm:$0xff] }
 0x427   :  { %v2322_v15 = vpop.f32.mrf.mxu0 }
 0x428   :  { %v2340_v16 = vperm.slane %v2322_v15, 0  ;;  %v2335_v7 = vpop.f32.mrf.mxu1  ;;  %v2346_v18 = vperm.slane %v2322_v15, 1 }
 0x429   :  { %v2341_v9 = vperm.slane %v2335_v7, 0  ;;  %v2347_v22 = vperm.slane %v2335_v7, 1  ;;  %v6487_v7 = vld [vmem:[#allocation4 + $0x230] sm:$0xff] }
 0x42a   :  { %v2343_v17 = vmul.f32 %v2340_v16, %v6895_v35  ;;  %v5575_v35 = vld [vmem:[#allocation2 + $0x6b0] sm:$0xf] }
 0x42b   :  { %v2344_v20 = vmul.f32 %v2341_v9, %v6901_v60  ;;  %v5576_v50 = vor.u32 %v6464_v44, %v5575_v35  ;;  %v6475_v9 = vld [vmem:[#allocation4 + $0x1d0] sm:$0xff] }
 0x42c   :  { %v2349_v19 = vadd.f32 %v2346_v18, %v2343_v17  ;;  %v6486_v18 = vld [vmem:[#allocation4 + $0x228] sm:$0xff] }
 0x42d   :  { %v2350_v21 = vadd.f32 %v2347_v22, %v2344_v20  ;;  %v2309_v57 = vpop.f32.mrf.mxu3  ;;  %v6474_v22 = vld [vmem:[#allocation4 + $0x1c8] sm:$0xff] }
 0x42e   :  { %v2352_v24 = vmax.f32 %v2349_v19, 0.0  ;;  %v2339_v23 = vperm.slane %v2309_v57, 0  ;;  %v2345_v29 = vperm.slane %v2309_v57, 1 }
 0x42f   :  { %v2353_v25 = vmax.f32 %v2350_v21, 0.0  ;;  %v2324_v26 = vpop.f32.mrf.mxu0 }
 0x430   :  { %v2355_v27 = vpack.c.bf16 %v2352_v24, %v2352_v24  ;;  %v2342_v28 = vmul.f32 %v2339_v23, %v6890_v11  ;;  %v2337_v30 = vpop.f32.mrf.mxu1  ;;  %v6458_v11 = vld [vmem:[#allocation2 + $0x688] sm:$0xf0]  ;;  %v6485_v24 = vld [vmem:[#allocation4 + $0x220] sm:$0xff] }
 0x431   :  { %v2356_v31 = vpack.c.bf16 %v2353_v25, %v2353_v25  ;;  %v5552_v40 = vor.u32 %v6458_v11, %v5551_v39  ;;  %v6473_v25 = vld [vmem:[#allocation4 + $0x1c0] sm:$0xff]  ;;  %v6482_v39 = vld [vmem:[#allocation4 + $0x208] sm:$0xff] }
 0x432   :  { %v2348_v32 = vadd.f32 %v2345_v29, %v2342_v28  ;;  %2859 = vmatmul.bf16.vlgmr.msrb.gmra.mxu3 %v2355_v27  ;;  %v6484_v28 = vld [vmem:[#allocation4 + $0x218] sm:$0xff] }
 0x433   :  { %2872 = vmatmul.bf16.vlgmr.msra.gmra.mxu0 %v2356_v31  ;;  %3196 = vmatpush.bf16.msrb.mxu3 %v6472_v61 }
 0x434   :  { %v2351_v60 = vmax.f32 %v2348_v32, 0.0  ;;  %3209 = vmatpush.bf16.msra.mxu0 %v6480_v2 }
 0x435   :  { %v2311_v45 = vpop.f32.mrf.mxu3 }
 0x436   :  { %v2354_v34 = vpack.c.bf16 %v2351_v60, %v2351_v60  ;;  %v6483_v45 = vld [vmem:[#allocation4 + $0x210] sm:$0xff] }
 0x437   :  { %3197 = vmatpush.bf16.msrb.mxu3 %v6471_v62 }
 0x438   :  { %2846 = vmatmul.bf16.vlgmr.msrb.gmra.mxu2 %v2354_v34  ;;  %2885 = vmatmul.bf16.vlgmr.msra.gmra.mxu1 %v2354_v34 }
 0x439   :  { %2942 = vmatpush.bf16.msrb.mxu2 %v5576_v50  ;;  %3210 = vmatpush.bf16.msra.mxu0 %v6479_v4 }
 0x43a   :  { %3222 = vmatpush.bf16.msra.mxu1 %v6488_v12 }
 0x43b   :  { %3198 = vmatpush.bf16.msrb.mxu3 %v6470_v63 }
 0x43d   :  { %2943 = vmatpush.bf16.msrb.mxu2 %v5564_v38  ;;  %3211 = vmatpush.bf16.msra.mxu0 %v6478_v6 }
 0x43e   :  { %3223 = vmatpush.bf16.msra.mxu1 %v6487_v7 }
 0x43f   :  { %3199 = vmatpush.bf16.msrb.mxu3 %v6469_v0 }
 0x441   :  { %2944 = vmatpush.bf16.msrb.mxu2 %v5552_v40  ;;  %3212 = vmatpush.bf16.msra.mxu0 %v6477_v13 }
 0x442   :  { %2911 = vmatmul.bf16.vlgmr.msra.gmra.mxu3 %v2356_v31  ;;  %3224 = vmatpush.bf16.msra.mxu1 %v6486_v18 }
 0x443   :  { %2924 = vmatmul.bf16.vlgmr.msrb.gmra.mxu0 %v2354_v34  ;;  %3200 = vmatpush.bf16.msrb.mxu3 %v6468_v1 }
 0x445   :  { %2945 = vmatpush.bf16.msrb.mxu2 %v5540_v43  ;;  %3213 = vmatpush.bf16.msra.mxu0 %v6476_v14 }
 0x446   :  { %3225 = vmatpush.bf16.msra.mxu1 %v6485_v24 }
 0x447   :  { %3201 = vmatpush.bf16.msrb.mxu3 %v6467_v3 }
 0x448   :  { %2898 = vmatmul.bf16.vlgmr.msra.gmra.mxu2 %v2355_v27  ;;  %2937 = vmatmul.bf16.vlgmr.msrb.gmra.mxu1 %v2355_v27 }
 0x449   :  { %2946 = vmatpush.bf16.msrb.mxu2 %v5528_v48  ;;  %3214 = vmatpush.bf16.msra.mxu0 %v6475_v9 }
 0x44a   :  { %3226 = vmatpush.bf16.msra.mxu1 %v6484_v28 }
 0x44b   :  { %3202 = vmatpush.bf16.msrb.mxu3 %v6466_v5 }
 0x44d   :  { %2947 = vmatpush.bf16.msrb.mxu2 %v5516_v33  ;;  %3215 = vmatpush.bf16.msra.mxu0 %v6474_v22 }
 0x44e   :  { %3227 = vmatpush.bf16.msra.mxu1 %v6483_v45  ;;  %v5767_v45 = vld [vmem:[#allocation6 + $0x230] sm:$0xf] }
 0x44f   :  { %3203 = vmatpush.bf16.msrb.mxu3 %v6465_v8 }
 0x451   :  { %2948 = vmatpush.bf16.msrb.mxu2 %v5504_v56  ;;  %3216 = vmatpush.bf16.msra.mxu0 %v6473_v25 }
 0x452   :  { %3228 = vmatpush.bf16.msra.mxu1 %v6482_v39  ;;  %v6508_v39 = vld [vmem:[#allocation6 + $0x218] sm:$0xf0] }
 0x455   :  { %2949 = vmatpush.bf16.msrb.mxu2 %v5492_v59 }
 0x456   :  { %3229 = vmatpush.bf16.msra.mxu1 %v6481_v46  ;;  %v6509_v46 = vld [vmem:[#allocation6 + $0x220] sm:$0xf0] }
 0x458   :  { %2950 = vmatmul.bf16.vlgmr.msrb.gmra.mxu2 %v2356_v31 }
 0x4b0   :  { %v2873_v10 = vpop.f32.mrf.mxu0 }
 0x4b5   :  { %v2860_v15 = vpop.f32.mrf.mxu3  ;;  %v2886_v16 = vpop.f32.mrf.mxu1 }
 0x4b8   :  { %v2875_v17 = vpop.f32.mrf.mxu0 }
 0x4bb   :  { %v2847_v20 = vpop.f32.mrf.mxu2 }
 0x4bc   :  { %v2861_v19 = vadd.f32 %v2860_v15, %v2847_v20 }
 0x4bd   :  { %v2862_v21 = vpop.f32.mrf.mxu3  ;;  %v2888_v57 = vpop.f32.mrf.mxu1 }
 0x4be   :  { %v6930_v23 = vadd.f32 %v2873_v10, %v2861_v19 }
 0x4c0   :  { %v2955_v26 = vmul.f32 %v6849_v53, %v6930_v23  ;;  %v2925_v27 = vpop.f32.mrf.mxu0 }
 0x4c2   :  { %v2958_v29 = vrot.slane %v2955_v26, 4  ;;  %v2976_v30 = vmul.f32 %v2955_v26, %v6930_v23 }
 0x4c3   :  { %v2849_v31 = vpop.f32.mrf.mxu2 }
 0x4c4   :  { %v2959_v32 = vadd.f32 %v2958_v29, %v2955_v26  ;;  %v2979_v35 = vrot.slane %v2976_v30, 4  ;;  %v5759_v31 = vld [vmem:[#allocation6 + $0x228] sm:$0xf] }
 0x4c5   :  { %v2912_v44 = vpop.f32.mrf.mxu3  ;;  %v2938_v60 = vpop.f32.mrf.mxu1 }
 0x4c6   :  { %v2960_v50 = vrot.slane %v2959_v32, 2  ;;  %v2980_v34 = vadd.f32 %v2979_v35, %v2976_v30  ;;  %v2939_v3 = vadd.f32 %v2938_v60, %v2925_v27  ;;  %v6510_v35 = vld [vmem:[#allocation6 + $0x22c] sm:$0xf]  ;;  %v5761_v60 = vld [vmem:[#allocation6 + $0x234] sm:$0xf0] }
 0x4c8   :  { %v2961_v36 = vadd.f32 %v2960_v50, %v2959_v32  ;;  %v2981_v37 = vrot.slane %v2980_v34, 2  ;;  %v2927_v38 = vpop.f32.mrf.mxu0  ;;  %v6511_v32 = vld [vmem:[#allocation6 + $0x230] sm:$0xf0]  ;;  %v6512_v50 = vld [vmem:[#allocation6 + $0x238] sm:$0xf0] }
 0x4c9   :  { %v5747_v38 = vld [vmem:[#allocation6 + $0x210] sm:$0xf] }
 0x4ca   :  { %v2982_v11 = vadd.f32 %v2981_v37, %v2980_v34  ;;  %v2962_v40 = vrot.slane %v2961_v36, 1  ;;  %v5764_v34 = vor.u32 %v6510_v35, %v5761_v60  ;;  %v6493_v35 = vld [vmem:[#allocation6 + $0x1a0] sm:$0xf0] }
 0x4cb   :  { %v2899_v41 = vpop.f32.mrf.mxu2 }
 0x4cc   :  { %v2983_v55 = vrot.slane %v2982_v11, 1  ;;  %v2900_v43 = vadd.f32 %v2899_v41, %v2886_v16  ;;  %v2963_v51 = vadd.f32 %v2962_v40, %v2961_v36  ;;  %v5768_v36 = vor.u32 %v6512_v50, %v5767_v45  ;;  %3440 = vmatpush.bf16.msra.mxu3 %v5764_v34  ;;  %v5689_v45 = vld [vmem:[#allocation6 + $0x1a4] sm:$0xf0]  ;;  %v5695_v50 = vld [vmem:[#allocation6 + $0x1a0] sm:$0xf] }
 0x4cd   :  { %v2914_v47 = vpop.f32.mrf.mxu3  ;;  %v2940_v48 = vpop.f32.mrf.mxu1  ;;  %v5748_v41 = vor.u32 %v6508_v39, %v5747_v38  ;;  %v6494_v34 = vld [vmem:[#allocation6 + $0x1a8] sm:$0xf0] }
 0x4ce   :  { %v6935_v49 = vadd.f32 %v2912_v44, %v2900_v43  ;;  %v2984_v33 = vadd.f32 %v2983_v55, %v2982_v11  ;;  %v5760_v44 = vor.u32 %v6511_v32, %v5759_v31  ;;  %3453 = vmatpush.bf16.msrb.mxu0 %v5768_v36  ;;  %v6507_v11 = vld [vmem:[#allocation6 + $0x214] sm:$0xf]  ;;  %v5749_v55 = vld [vmem:[#allocation6 + $0x21c] sm:$0xf0]  ;;  %v5755_v43 = vld [vmem:[#allocation6 + $0x218] sm:$0xf]  ;;  %v5696_v38 = vor.u32 %v6494_v34, %v5695_v50 }
 0x4cf   :  { %v5752_v47 = vor.u32 %v6507_v11, %v5749_v55  ;;  %v5756_v48 = vor.u32 %v6509_v46, %v5755_v43  ;;  %v5687_v32 = vld [vmem:[#allocation6 + $0x198] sm:$0xf]  ;;  %v6489_v55 = vld [vmem:[#allocation6 + $0x184] sm:$0xf]  ;;  %v5677_v46 = vld [vmem:[#allocation6 + $0x18c] sm:$0xf0] }
 0x4d0   :  { %v2956_v52 = vmul.f32 %v6849_v53, %v6935_v49  ;;  %v2997_v54 = vsel %vm750_vm1, %v2963_v51, %v2984_v33  ;;  %3427 = vmatpush.bf16.msra.mxu2 %v5760_v44  ;;  %v5735_v51 = vld [vmem:[#allocation6 + $0x1f8] sm:$0xf]  ;;  %v6505_v33 = vld [vmem:[#allocation6 + $0x200] sm:$0xf0]  ;;  %v6492_v44 = vld [vmem:[#allocation6 + $0x19c] sm:$0xf]  ;;  %v5688_v60 = vor.u32 %v6493_v35, %v5687_v32 }
 0x4d1   :  { %v3000_v56 = vpack.c.bf16 %v2997_v54, %v2997_v54  ;;  %3441 = vmatpush.bf16.msra.mxu3 %v5752_v47  ;;  %v5736_v54 = vor.u32 %v6505_v33, %v5735_v51  ;;  %v5683_v47 = vld [vmem:[#allocation6 + $0x188] sm:$0xf]  ;;  %v5680_v33 = vor.u32 %v6489_v55, %v5677_v46  ;;  %v5927_v32 = vld [vmem:[#allocation2 + $0x7f8] sm:$0xf]  ;;  %v6553_v35 = vld [vmem:[#allocation2 + $0x800] sm:$0xf0] }
 0x4d2   :  { %v2964_v58 = vrot.slane %v2956_v52, 4  ;;  %v2977_v42 = vmul.f32 %v2956_v52, %v6935_v49  ;;  %3454 = vmatpush.bf16.msrb.mxu0 %v5756_v48  ;;  %v6491_v48 = vld [vmem:[#allocation6 + $0x190] sm:$0xf0]  ;;  %v5807_v34 = vld [vmem:[#allocation2 + $0x708] sm:$0xf] }
 0x4d3   :  { %v2901_v59 = vpop.f32.mrf.mxu2  ;;  %3204 = vmatmul.bf16.vlgmr.msrb.gmra.mxu3 %v3000_v56  ;;  %v5737_v56 = vld [vmem:[#allocation6 + $0x204] sm:$0xf0]  ;;  %v6525_v46 = vld [vmem:[#allocation2 + $0x724] sm:$0xf] }
 0x4d4   :  { %v2965_v61 = vadd.f32 %v2964_v58, %v2956_v52  ;;  %v2985_v62 = vrot.slane %v2977_v42, 4  ;;  %3428 = vmatpush.bf16.msra.mxu2 %v5748_v41  ;;  %v6504_v52 = vld [vmem:[#allocation6 + $0x1fc] sm:$0xf]  ;;  %v5743_v58 = vld [vmem:[#allocation6 + $0x200] sm:$0xf] }
 0x4d5   :  { %v5740_v59 = vor.u32 %v6504_v52, %v5737_v56  ;;  %v6490_v41 = vld [vmem:[#allocation6 + $0x188] sm:$0xf0]  ;;  %v5684_v52 = vor.u32 %v6491_v48, %v5683_v47  ;;  %v5855_v56 = vld [vmem:[#allocation2 + $0x768] sm:$0xf]  ;;  %v5821_v47 = vld [vmem:[#allocation2 + $0x72c] sm:$0xf0] }
 0x4d6   :  { %v2966_v63 = vrot.slane %v2965_v61, 2  ;;  %v2986_v0 = vadd.f32 %v2985_v62, %v2977_v42  ;;  %v6506_v42 = vld [vmem:[#allocation6 + $0x208] sm:$0xf0]  ;;  %v5723_v62 = vld [vmem:[#allocation6 + $0x1e0] sm:$0xf] }
 0x4d7   :  { %3442 = vmatpush.bf16.msra.mxu3 %v5740_v59 }
 0x4d8   :  { %v2967_v1 = vadd.f32 %v2966_v63, %v2965_v61  ;;  %v2987_v2 = vrot.slane %v2986_v0, 2  ;;  %v5744_v61 = vor.u32 %v6506_v42, %v5743_v58  ;;  %3429 = vmatpush.bf16.msra.mxu2 %v5736_v54  ;;  %v6502_v63 = vld [vmem:[#allocation6 + $0x1e8] sm:$0xf0]  ;;  %v6535_v58 = vld [vmem:[#allocation2 + $0x770] sm:$0xf0] }
 0x4d9   :  { %v5843_v42 = vld [vmem:[#allocation2 + $0x750] sm:$0xf]  ;;  %v5856_v59 = vor.u32 %v6535_v58, %v5855_v56  ;;  %v6520_v56 = vld [vmem:[#allocation2 + $0x6f8] sm:$0xf0] }
 0x4da   :  { %v2988_v4 = vadd.f32 %v2987_v2, %v2986_v0  ;;  %v2968_v5 = vrot.slane %v2967_v1, 1  ;;  %3455 = vmatpush.bf16.msrb.mxu0 %v5744_v61  ;;  %v6501_v0 = vld [vmem:[#allocation6 + $0x1e4] sm:$0xf]  ;;  %v5724_v2 = vor.u32 %v6502_v63, %v5723_v62  ;;  %v6532_v61 = vld [vmem:[#allocation2 + $0x758] sm:$0xf0] }
 0x4db   :  { %v2951_v6 = vpop.f32.mrf.mxu2  ;;  %v6047_v62 = vld [vmem:[#allocation2 + $0x8e8] sm:$0xf]  ;;  %v6583_v63 = vld [vmem:[#allocation2 + $0x8f0] sm:$0xf0]  ;;  %3965 = vmatpush.bf16.msrb.mxu1 %v5856_v59  ;;  %v5824_v59 = vor.u32 %v6525_v46, %v5821_v47  ;;  %v6552_v47 = vld [vmem:[#allocation2 + $0x7fc] sm:$0xf] }
 0x4dc   :  { %v2989_v8 = vrot.slane %v2988_v4, 1  ;;  %v6941_v13 = vadd.f32 %v2951_v6, %v2939_v3  ;;  %v2969_v12 = vadd.f32 %v2968_v5, %v2967_v1  ;;  %v5725_v3 = vld [vmem:[#allocation6 + $0x1ec] sm:$0xf0]  ;;  %v6503_v5 = vld [vmem:[#allocation6 + $0x1f0] sm:$0xf0]  ;;  %3430 = vmatpush.bf16.msra.mxu2 %v5724_v2  ;;  %v5844_v2 = vor.u32 %v6532_v61, %v5843_v42 }
 0x4dd   :  { %v5728_v6 = vor.u32 %v6501_v0, %v5725_v3  ;;  %v6048_v0 = vor.u32 %v6583_v63, %v6047_v62  ;;  %v5831_v3 = vld [vmem:[#allocation2 + $0x738] sm:$0xf]  ;;  %v5987_v61 = vld [vmem:[#allocation2 + $0x870] sm:$0xf]  ;;  %v5903_v62 = vld [vmem:[#allocation2 + $0x7c8] sm:$0xf] }
 0x4de   :  { %v2957_v10 = vmul.f32 %v6849_v53, %v6941_v13  ;;  %v2990_v14 = vadd.f32 %v2989_v8, %v2988_v4  ;;  %v5731_v4 = vld [vmem:[#allocation6 + $0x1e8] sm:$0xf] }
 0x4df   :  { %v5732_v8 = vor.u32 %v6503_v5, %v5731_v4  ;;  %3443 = vmatpush.bf16.msra.mxu3 %v5728_v6  ;;  %v6529_v4 = vld [vmem:[#allocation2 + $0x740] sm:$0xf0]  ;;  %v6580_v5 = vld [vmem:[#allocation2 + $0x8d8] sm:$0xf0]  ;;  %3966 = vmatpush.bf16.msrb.mxu1 %v5844_v2  ;;  %v5809_v2 = vld [vmem:[#allocation2 + $0x714] sm:$0xf0] }
 0x4e0   :  { %v2970_v15 = vrot.slane %v2957_v10, 4  ;;  %v2978_v16 = vmul.f32 %v2957_v10, %v6941_v13  ;;  %v2998_v7 = vsel %vm750_vm1, %v2969_v12, %v2990_v14  ;;  %v6499_v12 = vld [vmem:[#allocation6 + $0x1d0] sm:$0xf0]  ;;  %v6498_v14 = vld [vmem:[#allocation6 + $0x1cc] sm:$0xf] }
 0x4e1   :  { %v3001_v9 = vpack.c.bf16 %v2998_v7, %v2998_v7  ;;  %3456 = vmatpush.bf16.msrb.mxu0 %v5732_v8  ;;  %v5719_v7 = vld [vmem:[#allocation6 + $0x1d0] sm:$0xf]  ;;  %v5951_v8 = vld [vmem:[#allocation2 + $0x828] sm:$0xf] }
 0x4e2   :  { %v2971_v17 = vadd.f32 %v2970_v15, %v2957_v10  ;;  %v2991_v18 = vrot.slane %v2978_v16, 4  ;;  %v5711_v10 = vld [vmem:[#allocation6 + $0x1c8] sm:$0xf] }
 0x4e3   :  { %v2953_v20 = vpop.f32.mrf.mxu2  ;;  %3217 = vmatmul.bf16.vlgmr.msra.gmra.mxu0 %v3001_v9  ;;  %v5712_v15 = vor.u32 %v6499_v12, %v5711_v10  ;;  %v6500_v9 = vld [vmem:[#allocation6 + $0x1d8] sm:$0xf0]  ;;  %v6559_v10 = vld [vmem:[#allocation2 + $0x830] sm:$0xf0]  ;;  %v6534_v12 = vld [vmem:[#allocation2 + $0x76c] sm:$0xf] }
 0x4e4   :  { %v2972_v22 = vrot.slane %v2971_v17, 2  ;;  %v2992_v19 = vadd.f32 %v2991_v18, %v2978_v16  ;;  %v5713_v16 = vld [vmem:[#allocation6 + $0x1d4] sm:$0xf0]  ;;  %v5720_v20 = vor.u32 %v6500_v9, %v5719_v7  ;;  %v6577_v7 = vld [vmem:[#allocation2 + $0x8c0] sm:$0xf0] }
 0x4e5   :  { %v5716_v18 = vor.u32 %v6498_v14, %v5713_v16  ;;  %3431 = vmatpush.bf16.msra.mxu2 %v5712_v15  ;;  %v5952_v14 = vor.u32 %v6559_v10, %v5951_v8  ;;  %v5857_v15 = vld [vmem:[#allocation2 + $0x774] sm:$0xf0] }
 0x4e6   :  { %v2973_v21 = vadd.f32 %v2972_v22, %v2971_v17  ;;  %v2993_v57 = vrot.slane %v2992_v19, 2  ;;  %3457 = vmatpush.bf16.msrb.mxu0 %v5720_v20  ;;  %v6023_v16 = vld [vmem:[#allocation2 + $0x8b8] sm:$0xf] }
 0x4e7   :  { %3444 = vmatpush.bf16.msra.mxu3 %v5716_v18  ;;  %v5939_v18 = vld [vmem:[#allocation2 + $0x810] sm:$0xf] }
 0x4e8   :  { %v2974_v24 = vrot.slane %v2973_v21, 1  ;;  %v2994_v25 = vadd.f32 %v2993_v57, %v2992_v19  ;;  %v6496_v57 = vld [vmem:[#allocation6 + $0x1b8] sm:$0xf0] }
 0x4ea   :  { %v2995_v26 = vrot.slane %v2994_v25, 1  ;;  %v2975_v27 = vadd.f32 %v2974_v24, %v2973_v21  ;;  %v5699_v21 = vld [vmem:[#allocation6 + $0x1b0] sm:$0xf]  ;;  %v6495_v24 = vld [vmem:[#allocation6 + $0x1b4] sm:$0xf] }
 0x4ec   :  { %v2996_v53 = vadd.f32 %v2995_v26, %v2994_v25  ;;  %v5700_v25 = vor.u32 %v6496_v57, %v5699_v21  ;;  %v5701_v26 = vld [vmem:[#allocation6 + $0x1bc] sm:$0xf0]  ;;  %v6531_v21 = vld [vmem:[#allocation2 + $0x754] sm:$0xf] }
 0x4ed   :  { %v5845_v57 = vld [vmem:[#allocation2 + $0x75c] sm:$0xf0] }
 0x4ee   :  { %v2999_v28 = vsel %vm750_vm1, %v2975_v27, %v2996_v53  ;;  %v5707_v53 = vld [vmem:[#allocation6 + $0x1b8] sm:$0xf]  ;;  %v6497_v27 = vld [vmem:[#allocation6 + $0x1c0] sm:$0xf0]  ;;  %3432 = vmatpush.bf16.msra.mxu2 %v5700_v25  ;;  %v6526_v25 = vld [vmem:[#allocation2 + $0x728] sm:$0xf0] }
 0x4ef   :  { %v3002_v29 = vpack.c.bf16 %v2999_v28, %v2999_v28  ;;  %v5708_v31 = vor.u32 %v6497_v27, %v5707_v53  ;;  %v5848_v27 = vor.u32 %v6531_v21, %v5845_v57  ;;  %v6972_v21 = vld [vmem:[#allocation7] sm:$0xff] }
 0x4f1   :  { %3230 = vmatmul.bf16.vlgmr.msra.gmra.mxu1 %v3002_v29  ;;  %v5704_v29 = vor.u32 %v6495_v24, %v5701_v26  ;;  %3458 = vmatpush.bf16.msrb.mxu0 %v5708_v31  ;;  %v5819_v24 = vld [vmem:[#allocation2 + $0x720] sm:$0xf]  ;;  %v6024_v26 = vor.u32 %v6577_v7, %v6023_v16  ;;  %v5891_v16 = vld [vmem:[#allocation2 + $0x7b0] sm:$0xf]  ;;  %v6544_v7 = vld [vmem:[#allocation2 + $0x7b8] sm:$0xf0] }
 0x4f2   :  { %3433 = vmatpush.bf16.msra.mxu2 %v5688_v60  ;;  %v6011_v31 = vld [vmem:[#allocation2 + $0x8a0] sm:$0xf]  ;;  %v5833_v60 = vld [vmem:[#allocation2 + $0x744] sm:$0xf0]  ;;  %v5820_v50 = vor.u32 %v6526_v25, %v5819_v24  ;;  %v6514_v24 = vld [vmem:[#allocation2 + $0x6c8] sm:$0xf0] }
 0x4f3   :  { %3445 = vmatpush.bf16.msra.mxu3 %v5704_v29 }
 0x4f5   :  { %3459 = vmatpush.bf16.msrb.mxu0 %v5696_v38 }
 0x4f9   :  { %3460 = vmatpush.bf16.msrb.mxu0 %v5684_v52  ;;  %v5795_v52 = vld [vmem:[#allocation2 + $0x6f0] sm:$0xf] }
 0x556   :  { %v3205_v30 = vpop.f32.mrf.mxu3 }
 0x55e   :  { %v3207_v37 = vpop.f32.mrf.mxu3 }
 0x55f   :  { %v5692_v37 = vor.u32 %v6492_v44, %v5689_v45  ;;  %v6528_v44 = vld [vmem:[#allocation2 + $0x73c] sm:$0xf] }
 0x560   :  { %v3218_v40 = vpop.f32.mrf.mxu0 }
 0x561   :  { %v3219_v17 = vadd.f32 %v3218_v40, %v3205_v30  ;;  %3446 = vmatpush.bf16.msra.mxu3 %v5692_v37  ;;  %v5675_v40 = vld [vmem:[#allocation6 + $0x180] sm:$0xf]  ;;  %v5928_v37 = vor.u32 %v6553_v35, %v5927_v32  ;;  %v5863_v32 = vld [vmem:[#allocation2 + $0x770] sm:$0xf]  ;;  %v6536_v35 = vld [vmem:[#allocation2 + $0x778] sm:$0xf0] }
 0x562   :  { %v5676_v43 = vor.u32 %v6490_v41, %v5675_v40  ;;  %v6571_v40 = vld [vmem:[#allocation2 + $0x890] sm:$0xf0]  ;;  %v5915_v41 = vld [vmem:[#allocation2 + $0x7e0] sm:$0xf] }
 0x564   :  { %3434 = vmatpush.bf16.msra.mxu2 %v5676_v43  ;;  %v6550_v43 = vld [vmem:[#allocation2 + $0x7e8] sm:$0xf0] }
 0x565   :  { %3447 = vmatpush.bf16.msra.mxu3 %v5680_v33  ;;  %v5916_v58 = vor.u32 %v6550_v43, %v5915_v41  ;;  %v5864_v41 = vor.u32 %v6536_v35, %v5863_v32  ;;  %v6554_v32 = vld [vmem:[#allocation2 + $0x808] sm:$0xf0] }
 0x568   :  { %v3220_v1 = vpop.f32.mrf.mxu0  ;;  %3978 = vmatpush.bf16.msrb.mxu2 %v5952_v14 }
 0x569   :  { %v6035_v1 = vld [vmem:[#allocation2 + $0x8d0] sm:$0xf]  ;;  %3991 = vmatpush.bf16.msrb.mxu3 %v6048_v0  ;;  %v6568_v0 = vld [vmem:[#allocation2 + $0x878] sm:$0xf0] }
 0x56a   :  { %v6036_v6 = vor.u32 %v6580_v5, %v6035_v1  ;;  %v6522_v1 = vld [vmem:[#allocation2 + $0x70c] sm:$0xf]  ;;  %v5783_v5 = vld [vmem:[#allocation2 + $0x6d8] sm:$0xf] }
 0x56b   :  { %v5812_v14 = vor.u32 %v6522_v1, %v5809_v2  ;;  %v6582_v2 = vld [vmem:[#allocation2 + $0x8ec] sm:$0xf] }
 0x56d   :  { %3992 = vmatpush.bf16.msrb.mxu3 %v6036_v6  ;;  %v6517_v6 = vld [vmem:[#allocation2 + $0x6e0] sm:$0xf0] }
 0x56e   :  { %v3231_v22 = vpop.f32.mrf.mxu1 }
 0x56f   :  { %v3232_v19 = vadd.f32 %v3231_v22, %v3219_v17  ;;  %v5860_v17 = vor.u32 %v6534_v12, %v5857_v15  ;;  %v5832_v22 = vor.u32 %v6529_v4, %v5831_v3  ;;  %v5796_v4 = vor.u32 %v6520_v56, %v5795_v52  ;;  %v5975_v15 = vld [vmem:[#allocation2 + $0x858] sm:$0xf]  ;;  %v6533_v52 = vld [vmem:[#allocation2 + $0x760] sm:$0xf0] }
 0x570   :  { %v5988_v12 = vor.u32 %v6568_v0, %v5987_v61 }
 0x571   :  { %v6948_v28 = vmul.f32 0.0125, %v3232_v19  ;;  %v6556_v19 = vld [vmem:[#allocation2 + $0x818] sm:$0xf0]  ;;  %4004 = vmatpush.bf16.msra.mxu0 %v5860_v17  ;;  %3967 = vmatpush.bf16.msrb.mxu1 %v5832_v22  ;;  %v6519_v17 = vld [vmem:[#allocation2 + $0x6f4] sm:$0xf]  ;;  %v5784_v22 = vor.u32 %v6517_v6, %v5783_v5 }
 0x572   :  { %v5940_v53 = vor.u32 %v6556_v19, %v5939_v18  ;;  %3993 = vmatpush.bf16.msrb.mxu3 %v6024_v26  ;;  %v5797_v18 = vld [vmem:[#allocation2 + $0x6fc] sm:$0xf0]  ;;  %v5892_v19 = vor.u32 %v6544_v7, %v5891_v16  ;;  %v6560_v6 = vld [vmem:[#allocation2 + $0x838] sm:$0xf0]  ;;  %v5905_v16 = vld [vmem:[#allocation2 + $0x7d4] sm:$0xf0] }
 0x573   :  { %v3236_v30 = vmul.f32 %v6948_v28, %v6948_v28  ;;  %v5800_v26 = vor.u32 %v6519_v17, %v5797_v18  ;;  %v6037_v17 = vld [vmem:[#allocation2 + $0x8dc] sm:$0xf0]  ;;  %v5947_v18 = vld [vmem:[#allocation2 + $0x818] sm:$0xf] }
 0x574   :  { %3979 = vmatpush.bf16.msrb.mxu2 %v5940_v53  ;;  %v6558_v53 = vld [vmem:[#allocation2 + $0x82c] sm:$0xf] }
 0x575   :  { %v3238_v36 = vrot.slane %v3236_v30, 7  ;;  %v6574_v30 = vld [vmem:[#allocation2 + $0x8a8] sm:$0xf0]  ;;  %4005 = vmatpush.bf16.msra.mxu0 %v5848_v27  ;;  %3968 = vmatpush.bf16.msrb.mxu1 %v5820_v50  ;;  %v5953_v27 = vld [vmem:[#allocation2 + $0x834] sm:$0xf0] }
 0x576   :  { %v3233_v39 = vpop.f32.mrf.mxu1  ;;  %v6012_v38 = vor.u32 %v6574_v30, %v6011_v31  ;;  %v6562_v30 = vld [vmem:[#allocation2 + $0x848] sm:$0xf0] }
 0x577   :  { %v3240_v11 = vsub.f32 %v6948_v28, %v3238_v36  ;;  %v6523_v36 = vld [vmem:[#allocation2 + $0x710] sm:$0xf0]  ;;  %v5836_v39 = vor.u32 %v6528_v44, %v5833_v60  ;;  %v5879_v44 = vld [vmem:[#allocation2 + $0x798] sm:$0xf]  ;;  %v6541_v60 = vld [vmem:[#allocation2 + $0x7a0] sm:$0xf0] }
 0x578   :  { %v5808_v33 = vor.u32 %v6523_v36, %v5807_v34  ;;  %3980 = vmatpush.bf16.msrb.mxu2 %v5928_v37  ;;  %3994 = vmatpush.bf16.msrb.mxu3 %v6012_v38  ;;  %v6516_v34 = vld [vmem:[#allocation2 + $0x6dc] sm:$0xf]  ;;  %v5785_v36 = vld [vmem:[#allocation2 + $0x6e4] sm:$0xf0]  ;;  %v5956_v38 = vor.u32 %v6558_v53, %v5953_v27 }
 0x579   :  { %v3241_v51 = vmax.f32 %v3240_v11, 0.0  ;;  %v5999_v11 = vld [vmem:[#allocation2 + $0x888] sm:$0xf]  ;;  %4006 = vmatpush.bf16.msra.mxu0 %v5836_v39  ;;  %v5788_v43 = vor.u32 %v6516_v34, %v5785_v36  ;;  %v6576_v27 = vld [vmem:[#allocation2 + $0x8bc] sm:$0xf] }
 0x57a   :  { %v6000_v42 = vor.u32 %v6571_v40, %v5999_v11  ;;  %3969 = vmatpush.bf16.msrb.mxu1 %v5808_v33  ;;  %v6555_v11 = vld [vmem:[#allocation2 + $0x814] sm:$0xf]  ;;  %v5941_v40 = vld [vmem:[#allocation2 + $0x81c] sm:$0xf0]  ;;  %v5851_v33 = vld [vmem:[#allocation2 + $0x758] sm:$0xf] }
 0x57b   :  { %v6953_v54 = vadd.f32 1e-05, %v3241_v51  ;;  %v5944_v46 = vor.u32 %v6555_v11, %v5941_v40  ;;  %v5852_v56 = vor.u32 %v6533_v52, %v5851_v33  ;;  %v5881_v34 = vld [vmem:[#allocation2 + $0x7a4] sm:$0xf0]  ;;  %v6551_v40 = vld [vmem:[#allocation2 + $0x7f0] sm:$0xf0] }
 0x57c   :  { %3981 = vmatpush.bf16.msrb.mxu2 %v5916_v58  ;;  %3995 = vmatpush.bf16.msrb.mxu3 %v6000_v42  ;;  %v5867_v58 = vld [vmem:[#allocation2 + $0x780] sm:$0xf]  ;;  %v6538_v42 = vld [vmem:[#allocation2 + $0x788] sm:$0xf0]  ;;  %v6001_v52 = vld [vmem:[#allocation2 + $0x894] sm:$0xf0] }
 0x57d   :  { %6623 = vrsqrt.f32 %v6953_v54  ;;  %vm3249_vm9 = vweird.f32 %v6953_v54  ;;  %4007 = vmatpush.bf16.msra.mxu0 %v5824_v59  ;;  %v6513_v59 = vld [vmem:[#allocation2 + $0x6c4] sm:$0xf]  ;;  %v5868_v61 = vor.u32 %v6538_v42, %v5867_v58  ;;  %v6570_v33 = vld [vmem:[#allocation2 + $0x88c] sm:$0xf]  ;;  %v6548_v42 = vld [vmem:[#allocation2 + $0x7d8] sm:$0xf0] }
 0x57e   :  { %3970 = vmatpush.bf16.msrb.mxu1 %v5796_v4  ;;  %v5959_v4 = vld [vmem:[#allocation2 + $0x830] sm:$0xf]  ;;  %v6004_v58 = vor.u32 %v6570_v33, %v6001_v52  ;;  %v6591_v33 = vld [vmem:[#allocation9 + $0x30] sm:$0xff] }
 0x580   :  { %3996 = vmatpush.bf16.msrb.mxu3 %v5988_v12  ;;  %v5960_v12 = vor.u32 %v6560_v6, %v5959_v4  ;;  %v6515_v6 = vld [vmem:[#allocation2 + $0x6d0] sm:$0xf0] }
 0x581   :  { %4008 = vmatpush.bf16.msra.mxu0 %v5812_v14 }
 0x582   :  { %3971 = vmatpush.bf16.msrb.mxu1 %v5784_v22  ;;  %v6557_v22 = vld [vmem:[#allocation2 + $0x820] sm:$0xf0] }
 0x583   :  { %v6956_v9 = vpop.eup %6623 }
 0x584   :  { %v3244_v20 = vmul.f32 %v6956_v9, %v6953_v54  ;;  %vm3250_vm8 = vweird.f32 %v6956_v9  ;;  %v6547_v54 = vld [vmem:[#allocation2 + $0x7d0] sm:$0xf0] }
 0x585   :  { %vm6964_vm10 = vmor %vm3249_vm9, %vm3250_vm8  ;;  %v5904_v8 = vor.u32 %v6547_v54, %v5903_v62  ;;  %4009 = vmatpush.bf16.msra.mxu0 %v5800_v26  ;;  %v5773_v62 = vld [vmem:[#allocation2 + $0x6cc] sm:$0xf0]  ;;  %v6549_v54 = vld [vmem:[#allocation2 + $0x7e4] sm:$0xf] }
 0x586   :  { %v3245_v29 = vmul.f32 %v6956_v9, %v3244_v20  ;;  %v5776_v0 = vor.u32 %v6513_v59, %v5773_v62  ;;  %v5893_v26 = vld [vmem:[#allocation2 + $0x7bc] sm:$0xf0]  ;;  %v6518_v62 = vld [vmem:[#allocation2 + $0x6e8] sm:$0xf0] }
 0x587   :  { %3982 = vmatpush.bf16.msrb.mxu2 %v5904_v8  ;;  %v5839_v8 = vld [vmem:[#allocation2 + $0x740] sm:$0xf] }
 0x588   :  { %v3246_v45 = vmul.f32 0.5, %v3245_v29  ;;  %v5963_v29 = vld [vmem:[#allocation2 + $0x840] sm:$0xf] }
 0x589   :  { %v5964_v39 = vor.u32 %v6562_v30, %v5963_v29  ;;  %4010 = vmatpush.bf16.msra.mxu0 %v5788_v43  ;;  %v6025_v29 = vld [vmem:[#allocation2 + $0x8c4] sm:$0xf0]  ;;  %v6521_v43 = vld [vmem:[#allocation2 + $0x700] sm:$0xf0] }
 0x58a   :  { %v3247_v55 = vsub.f32 1.5, %v3246_v45  ;;  %v6028_v30 = vor.u32 %v6576_v27, %v6025_v29 }
 0x58b   :  { %3983 = vmatpush.bf16.msrb.mxu2 %v5892_v19  ;;  %v5948_v19 = vor.u32 %v6557_v22, %v5947_v18  ;;  %v5875_v18 = vld [vmem:[#allocation2 + $0x788] sm:$0xf]  ;;  %v6539_v22 = vld [vmem:[#allocation2 + $0x790] sm:$0xf0] }
 0x58c   :  { %v3248_v48 = vmul.f32 %v6956_v9, %v3247_v55  ;;  %v5880_v55 = vor.u32 %v6541_v60, %v5879_v44  ;;  %v5815_v44 = vld [vmem:[#allocation2 + $0x710] sm:$0xf]  ;;  %v6524_v60 = vld [vmem:[#allocation2 + $0x718] sm:$0xf0] }
 0x58d   :  { %4011 = vmatpush.bf16.msra.mxu0 %v5776_v0  ;;  %v5989_v0 = vld [vmem:[#allocation2 + $0x87c] sm:$0xf0] }
 0x58e   :  { %v3252_v63 = vsel %vm6964_vm10, %v6956_v9, %v3248_v48  ;;  %v6565_v9 = vld [vmem:[#allocation2 + $0x860] sm:$0xf0]  ;;  %v5929_v48 = vld [vmem:[#allocation2 + $0x804] sm:$0xf0] }
 0x58f   :  { %v3254_v3 = vrot.slane %v3252_v63, 1  ;;  %v5976_v25 = vor.u32 %v6565_v9, %v5975_v15  ;;  %3984 = vmatpush.bf16.msrb.mxu2 %v5880_v55  ;;  %v5932_v51 = vor.u32 %v6552_v47, %v5929_v48  ;;  %v5917_v63 = vld [vmem:[#allocation2 + $0x7ec] sm:$0xf0]  ;;  %v6546_v15 = vld [vmem:[#allocation2 + $0x7cc] sm:$0xf] }
 0x590   :  { %v5920_v1 = vor.u32 %v6549_v54, %v5917_v63  ;;  %v5908_v7 = vor.u32 %v6546_v15, %v5905_v16  ;;  %v6579_v9 = vld [vmem:[#allocation2 + $0x8d4] sm:$0xf]  ;;  %v5803_v55 = vld [vmem:[#allocation2 + $0x6f8] sm:$0xf]  ;;  %v6537_v47 = vld [vmem:[#allocation2 + $0x784] sm:$0xf] }
 0x591   :  { %v3256_v10 = vmul.f32 %v3254_v3, %v6948_v28  ;;  %v5771_v28 = vld [vmem:[#allocation2 + $0x6c0] sm:$0xf]  ;;  %3997 = vmatpush.bf16.msrb.mxu3 %v5976_v25  ;;  %v6543_v25 = vld [vmem:[#allocation2 + $0x7b4] sm:$0xf]  ;;  %v5869_v48 = vld [vmem:[#allocation2 + $0x78c] sm:$0xf0] }
 0x592   :  { %v5772_v50 = vor.u32 %v6514_v24, %v5771_v28  ;;  %v6527_v28 = vld [vmem:[#allocation2 + $0x730] sm:$0xf0]  ;;  %v5896_v53 = vor.u32 %v6543_v25, %v5893_v26  ;;  %v6542_v15 = vld [vmem:[#allocation2 + $0x7a8] sm:$0xf0] }
 0x593   :  { %v3258_v20 = vrot.slane %v3256_v10, 6  ;;  %3985 = vmatpush.bf16.msrb.mxu2 %v5868_v61  ;;  %v6530_v10 = vld [vmem:[#allocation2 + $0x748] sm:$0xf0]  ;;  %v5791_v61 = vld [vmem:[#allocation2 + $0x6e0] sm:$0xf] }
 0x594   :  { %3972 = vmatpush.bf16.msrb.mxu1 %v5772_v50  ;;  %v5840_v14 = vor.u32 %v6530_v10, %v5839_v8  ;;  %v6540_v50 = vld [vmem:[#allocation2 + $0x79c] sm:$0xf]  ;;  %v6567_v54 = vld [vmem:[#allocation2 + $0x874] sm:$0xf]  ;;  %v5792_v63 = vor.u32 %v6518_v62, %v5791_v61  ;;  %v6007_v61 = vld [vmem:[#allocation2 + $0x890] sm:$0xf] }
 0x595   :  { %v3260_v57 = vsub.f32 %v6972_v21, %v3258_v20  ;;  %3998 = vmatpush.bf16.msrb.mxu3 %v5964_v39  ;;  %v6040_v20 = vor.u32 %v6579_v9, %v6037_v17  ;;  %v5884_v36 = vor.u32 %v6540_v50, %v5881_v34  ;;  %v5923_v39 = vld [vmem:[#allocation2 + $0x7e8] sm:$0xf]  ;;  %v6564_v8 = vld [vmem:[#allocation2 + $0x85c] sm:$0xf]  ;;  %v6561_v9 = vld [vmem:[#allocation2 + $0x844] sm:$0xf] }
 0x596   :  { %v5965_v17 = vld [vmem:[#allocation2 + $0x84c] sm:$0xf0]  ;;  %v6572_v62 = vld [vmem:[#allocation2 + $0x898] sm:$0xf0] }
 0x597   :  { %v3262_v31 = vrot.slane %v3260_v57, 1  ;;  %v5827_v57 = vld [vmem:[#allocation2 + $0x728] sm:$0xf] }
 0x598   :  { %4017 = vmatpush.bf16.msra.mxu1 %v5956_v38  ;;  %v5828_v24 = vor.u32 %v6527_v28, %v5827_v57  ;;  %v6013_v38 = vld [vmem:[#allocation2 + $0x8ac] sm:$0xf0] }
 0x599   :  { %v3264_v45 = vsel %vm750_vm1, %v3254_v3, %v3262_v31  ;;  %v6049_v3 = vld [vmem:[#allocation2 + $0x8f4] sm:$0xf0]  ;;  %v5935_v31 = vld [vmem:[#allocation2 + $0x800] sm:$0xf] }
 0x59a   :  { %v3265_v37 = vpack.c.bf16 %v3264_v45, %v3264_v45  ;;  %v6052_v5 = vor.u32 %v6582_v2, %v6049_v3  ;;  %v5936_v35 = vor.u32 %v6554_v32, %v5935_v31  ;;  %v5816_v45 = vor.u32 %v6524_v60, %v5815_v44  ;;  %v6545_v2 = vld [vmem:[#allocation2 + $0x7c0] sm:$0xf0] }
 0x59b   :  { %v5992_v3 = vor.u32 %v6567_v54, %v5989_v0  ;;  %v6008_v54 = vor.u32 %v6572_v62, %v6007_v61  ;;  %v6569_v0 = vld [vmem:[#allocation2 + $0x880] sm:$0xf0] }
 0x59c   :  { %3435 = vmatmul.bf16.vlgmr.msra.gmra.mxu2 %v3265_v37  ;;  %3448 = vmatmul.bf16.vlgmr.msra.gmra.mxu3 %v3265_v37 }
 0x59d   :  { %3461 = vmatmul.bf16.vlgmr.msrb.gmra.mxu0 %v3265_v37  ;;  %4043 = vmatpush.bf16.msra.mxu3 %v5864_v41  ;;  %v6573_v37 = vld [vmem:[#allocation2 + $0x8a4] sm:$0xf]  ;;  %v5924_v41 = vor.u32 %v6551_v40, %v5923_v39 }
 0x59e   :  { %4018 = vmatpush.bf16.msra.mxu1 %v5944_v46  ;;  %4030 = vmatpush.bf16.msra.mxu2 %v6052_v5  ;;  %v6016_v11 = vor.u32 %v6573_v37, %v6013_v38  ;;  %v5804_v46 = vor.u32 %v6521_v43, %v5803_v55  ;;  %v5779_v5 = vld [vmem:[#allocation2 + $0x6c8] sm:$0xf]  ;;  %v6055_v37 = vld [vmem:[#allocation2 + $0x8f0] sm:$0xf]  ;;  %v6584_v38 = vld [vmem:[#allocation2 + $0x8f8] sm:$0xf0] }
 0x59f   :  { %4056 = vmatpush.bf16.msrb.mxu0 %v5960_v12  ;;  %v5780_v10 = vor.u32 %v6515_v6, %v5779_v5  ;;  %v5977_v12 = vld [vmem:[#allocation2 + $0x864] sm:$0xf0]  ;;  %v6563_v6 = vld [vmem:[#allocation2 + $0x850] sm:$0xf0] }
 0x5a0   :  { %v5980_v16 = vor.u32 %v6564_v8, %v5977_v12  ;;  %v5971_v5 = vld [vmem:[#allocation2 + $0x848] sm:$0xf]  ;;  %v6600_v12 = vld [vmem:[#allocation9 + $0x78] sm:$0xff] }
 0x5a1   :  { %4044 = vmatpush.bf16.msra.mxu3 %v5852_v56  ;;  %v5911_v56 = vld [vmem:[#allocation2 + $0x7d0] sm:$0xf]  ;;  %v5972_v8 = vor.u32 %v6563_v6, %v5971_v5 }
 0x5a2   :  { %4019 = vmatpush.bf16.msra.mxu1 %v5932_v51  ;;  %4031 = vmatpush.bf16.msra.mxu2 %v6040_v20  ;;  %v5872_v51 = vor.u32 %v6537_v47, %v5869_v48  ;;  %v5912_v59 = vor.u32 %v6548_v42, %v5911_v56  ;;  %v5968_v20 = vor.u32 %v6561_v9, %v5965_v17  ;;  %v6031_v48 = vld [vmem:[#allocation2 + $0x8c0] sm:$0xf]  ;;  %v6019_v56 = vld [vmem:[#allocation2 + $0x8a8] sm:$0xf]  ;;  %v6590_v42 = vld [vmem:[#allocation9 + $0x28] sm:$0xff] }
 0x5a3   :  { %4057 = vmatpush.bf16.msrb.mxu0 %v5948_v19  ;;  %v5876_v19 = vor.u32 %v6539_v22, %v5875_v18  ;;  %v6586_v9 = vld [vmem:[#allocation9 + $0x8] sm:$0xff]  ;;  %v6608_v17 = vld [vmem:[#allocation9 + $0xb8] sm:$0xff]  ;;  %v6597_v18 = vld [vmem:[#allocation9 + $0x60] sm:$0xff] }
 0x5a4   :  { %v6607_v22 = vld [vmem:[#allocation9 + $0xb0] sm:$0xff] }
 0x5a5   :  { %4045 = vmatpush.bf16.msra.mxu3 %v5840_v14  ;;  %v5887_v14 = vld [vmem:[#allocation2 + $0x7a0] sm:$0xf] }
 0x5a6   :  { %4020 = vmatpush.bf16.msra.mxu1 %v5920_v1  ;;  %4032 = vmatpush.bf16.msra.mxu2 %v6028_v30  ;;  %v5899_v1 = vld [vmem:[#allocation2 + $0x7b8] sm:$0xf] }
 0x5a7   :  { %4058 = vmatpush.bf16.msrb.mxu0 %v5936_v35  ;;  %v5900_v4 = vor.u32 %v6545_v2, %v5899_v1  ;;  %v5983_v2 = vld [vmem:[#allocation2 + $0x860] sm:$0xf] }
 0x5a9   :  { %4046 = vmatpush.bf16.msra.mxu3 %v5828_v24 }
 0x5aa   :  { %4021 = vmatpush.bf16.msra.mxu1 %v5908_v7  ;;  %4033 = vmatpush.bf16.msra.mxu2 %v6016_v11  ;;  %v5888_v7 = vor.u32 %v6542_v15, %v5887_v14  ;;  %v6588_v14 = vld [vmem:[#allocation9 + $0x18] sm:$0xff]  ;;  %v6599_v15 = vld [vmem:[#allocation9 + $0x70] sm:$0xff] }
 0x5ab   :  { %4059 = vmatpush.bf16.msrb.mxu0 %v5924_v41  ;;  %v6056_v41 = vor.u32 %v6584_v38, %v6055_v37 }
 0x5ad   :  { %4047 = vmatpush.bf16.msra.mxu3 %v5816_v45 }
 0x5ae   :  { %4022 = vmatpush.bf16.msra.mxu1 %v5896_v53  ;;  %4034 = vmatpush.bf16.msra.mxu2 %v6004_v58  ;;  %v6575_v58 = vld [vmem:[#allocation2 + $0x8b0] sm:$0xf0] }
 0x5af   :  { %4060 = vmatpush.bf16.msrb.mxu0 %v5912_v59  ;;  %v6020_v59 = vor.u32 %v6575_v58, %v6019_v56 }
 0x5b1   :  { %4048 = vmatpush.bf16.msra.mxu3 %v5804_v46  ;;  %v6043_v46 = vld [vmem:[#allocation2 + $0x8d8] sm:$0xf] }
 0x5b2   :  { %4023 = vmatpush.bf16.msra.mxu1 %v5884_v36  ;;  %4035 = vmatpush.bf16.msra.mxu2 %v5992_v3  ;;  %v6566_v3 = vld [vmem:[#allocation2 + $0x868] sm:$0xf0] }
 0x5b3   :  { %4061 = vmatpush.bf16.msrb.mxu0 %v5900_v4  ;;  %v5984_v4 = vor.u32 %v6566_v3, %v5983_v2 }
 0x5b5   :  { %4049 = vmatpush.bf16.msra.mxu3 %v5792_v63  ;;  %v5995_v63 = vld [vmem:[#allocation2 + $0x878] sm:$0xf] }
 0x5b6   :  { %4024 = vmatpush.bf16.msra.mxu1 %v5872_v51  ;;  %4036 = vmatpush.bf16.msra.mxu2 %v5980_v16  ;;  %v6578_v51 = vld [vmem:[#allocation2 + $0x8c8] sm:$0xf0]  ;;  %v5996_v1 = vor.u32 %v6569_v0, %v5995_v63  ;;  %v6587_v16 = vld [vmem:[#allocation9 + $0x10] sm:$0xff] }
 0x5b7   :  { %4062 = vmatpush.bf16.msrb.mxu0 %v5888_v7  ;;  %v6032_v52 = vor.u32 %v6578_v51, %v6031_v48  ;;  %v6598_v7 = vld [vmem:[#allocation9 + $0x68] sm:$0xff] }
 0x5b9   :  { %4050 = vmatpush.bf16.msra.mxu3 %v5780_v10  ;;  %v6589_v10 = vld [vmem:[#allocation9 + $0x20] sm:$0xff] }
 0x5ba   :  { %4037 = vmatpush.bf16.msra.mxu2 %v5968_v20  ;;  %v6585_v20 = vld [vmem:[#allocation9] sm:$0xff] }
 0x5bb   :  { %4063 = vmatpush.bf16.msrb.mxu0 %v5876_v19  ;;  %v6596_v19 = vld [vmem:[#allocation9 + $0x58] sm:$0xff] }
 0x61a   :  { %v3462_v57 = vpop.f32.mrf.mxu0 }
 0x61b   :  { %v3468_v28 = vperm.slane %v3462_v57, 0  ;;  %v3474_v25 = vperm.slane %v3462_v57, 1  ;;  %v6606_v57 = vld [vmem:[#allocation9 + $0xa8] sm:$0xff] }
 0x61d   :  { %v3471_v24 = vmul.f32 %v3468_v28, %v6941_v13  ;;  %v6595_v28 = vld [vmem:[#allocation9 + $0x50] sm:$0xff] }
 0x61f   :  { %v3477_v26 = vadd.f32 %v3474_v25, %v3471_v24  ;;  %v3436_v53 = vpop.f32.mrf.mxu2  ;;  %v3449_v27 = vpop.f32.mrf.mxu3  ;;  %v6605_v24 = vld [vmem:[#allocation9 + $0xa0] sm:$0xff]  ;;  %v6594_v25 = vld [vmem:[#allocation9 + $0x48] sm:$0xff] }
 0x620   :  { %v3466_v29 = vperm.slane %v3436_v53, 0  ;;  %v3467_v31 = vperm.slane %v3449_v27, 0  ;;  %v3472_v35 = vperm.slane %v3436_v53, 1  ;;  %v3473_v60 = vperm.slane %v3449_v27, 1  ;;  %v6593_v53 = vld [vmem:[#allocation9 + $0x40] sm:$0xff] }
 0x621   :  { %v3480_v30 = vmax.f32 %v3477_v26, 0.0  ;;  %v6604_v26 = vld [vmem:[#allocation9 + $0x98] sm:$0xff] }
 0x622   :  { %v3469_v32 = vmul.f32 %v3466_v29, %v6930_v23  ;;  %v3470_v44 = vmul.f32 %v3467_v31, %v6935_v49  ;;  %v3464_v45 = vpop.f32.mrf.mxu0  ;;  %v6581_v23 = vld [vmem:[#allocation2 + $0x8e0] sm:$0xf0]  ;;  %v6603_v29 = vld [vmem:[#allocation9 + $0x90] sm:$0xff] }
 0x623   :  { %v3483_v50 = vpack.c.bf16 %v3480_v30, %v3480_v30  ;;  %v6592_v49 = vld [vmem:[#allocation9 + $0x38] sm:$0xff]  ;;  %v6044_v47 = vor.u32 %v6581_v23, %v6043_v46  ;;  %v6601_v45 = vld [vmem:[#allocation9 + $0x80] sm:$0xff] }
 0x624   :  { %v3475_v34 = vadd.f32 %v3472_v35, %v3469_v32  ;;  %v3476_v36 = vadd.f32 %v3473_v60, %v3470_v44  ;;  %v6602_v32 = vld [vmem:[#allocation9 + $0x88] sm:$0xff] }
 0x625   :  { %3999 = vmatmul.bf16.vlgmr.msrb.gmra.mxu3 %v3483_v50 }
 0x626   :  { %v3478_v13 = vmax.f32 %v3475_v34, 0.0  ;;  %v3479_v39 = vmax.f32 %v3476_v36, 0.0  ;;  %4294 = vmatpush.bf16.msrb.mxu3 %v6600_v12 }
 0x627   :  { %v3438_v11 = vpop.f32.mrf.mxu2  ;;  %v3451_v40 = vpop.f32.mrf.mxu3 }
 0x628   :  { %v3481_v55 = vpack.c.bf16 %v3478_v13, %v3478_v13  ;;  %v3482_v43 = vpack.c.bf16 %v3479_v39, %v3479_v39 }
 0x62a   :  { %3973 = vmatmul.bf16.vlgmr.msrb.gmra.mxu1 %v3481_v55  ;;  %3986 = vmatmul.bf16.vlgmr.msrb.gmra.mxu2 %v3482_v43 }
 0x62b   :  { %4012 = vmatmul.bf16.vlgmr.msra.gmra.mxu0 %v3481_v55  ;;  %4069 = vmatpush.bf16.msrb.mxu1 %v6056_v41 }
 0x62c   :  { %4281 = vmatpush.bf16.msrb.mxu2 %v6592_v49  ;;  %4295 = vmatpush.bf16.msrb.mxu3 %v6599_v15 }
 0x62d   :  { %4307 = vmatpush.bf16.msra.mxu0 %v6608_v17 }
 0x62f   :  { %4070 = vmatpush.bf16.msrb.mxu1 %v6044_v47 }
 0x630   :  { %4282 = vmatpush.bf16.msrb.mxu2 %v6591_v33  ;;  %4296 = vmatpush.bf16.msrb.mxu3 %v6598_v7 }
 0x631   :  { %4308 = vmatpush.bf16.msra.mxu0 %v6607_v22 }
 0x633   :  { %4071 = vmatpush.bf16.msrb.mxu1 %v6032_v52 }
 0x634   :  { %4283 = vmatpush.bf16.msrb.mxu2 %v6590_v42  ;;  %4297 = vmatpush.bf16.msrb.mxu3 %v6597_v18 }
 0x635   :  { %4051 = vmatmul.bf16.vlgmr.msra.gmra.mxu3 %v3481_v55  ;;  %4309 = vmatpush.bf16.msra.mxu0 %v6606_v57 }
 0x637   :  { %4072 = vmatpush.bf16.msrb.mxu1 %v6020_v59 }
 0x638   :  { %4284 = vmatpush.bf16.msrb.mxu2 %v6589_v10  ;;  %4298 = vmatpush.bf16.msrb.mxu3 %v6596_v19 }
 0x639   :  { %4310 = vmatpush.bf16.msra.mxu0 %v6605_v24 }
 0x63a   :  { %4025 = vmatmul.bf16.vlgmr.msra.gmra.mxu1 %v3482_v43  ;;  %4038 = vmatmul.bf16.vlgmr.msra.gmra.mxu2 %v3483_v50 }
 0x63b   :  { %4064 = vmatmul.bf16.vlgmr.msrb.gmra.mxu0 %v3482_v43  ;;  %4073 = vmatpush.bf16.msrb.mxu1 %v6008_v54  ;;  %v4136_v54 = vperm.slane %v6972_v21, 3 }
 0x63c   :  { %4285 = vmatpush.bf16.msrb.mxu2 %v6588_v14  ;;  %4299 = vmatpush.bf16.msrb.mxu3 %v6595_v28 }
 0x63d   :  { %4311 = vmatpush.bf16.msra.mxu0 %v6604_v26 }
 0x63f   :  { %4074 = vmatpush.bf16.msrb.mxu1 %v5996_v1 }
 0x640   :  { %4286 = vmatpush.bf16.msrb.mxu2 %v6587_v16  ;;  %4300 = vmatpush.bf16.msrb.mxu3 %v6594_v25 }
 0x641   :  { %4312 = vmatpush.bf16.msra.mxu0 %v6603_v29 }
 0x643   :  { %4075 = vmatpush.bf16.msrb.mxu1 %v5984_v4 }
 0x644   :  { %4287 = vmatpush.bf16.msrb.mxu2 %v6586_v9  ;;  %4301 = vmatpush.bf16.msrb.mxu3 %v6593_v53 }
 0x645   :  { %4313 = vmatpush.bf16.msra.mxu0 %v6602_v32 }
 0x647   :  { %4076 = vmatpush.bf16.msrb.mxu1 %v5972_v8 }
 0x648   :  { %4288 = vmatpush.bf16.msrb.mxu2 %v6585_v20 }
 0x649   :  { %4314 = vmatpush.bf16.msra.mxu0 %v6601_v45 }
 0x64a   :  { %4077 = vmatmul.bf16.vlgmr.msrb.gmra.mxu1 %v3483_v50 }
 0x6a7   :  { %v3974_v27 = vpop.f32.mrf.mxu1 }
 0x6a8   :  { %v4000_v31 = vpop.f32.mrf.mxu3  ;;  %v4013_v30 = vpop.f32.mrf.mxu0 }
 0x6ad   :  { %v3987_v35 = vpop.f32.mrf.mxu2 }
 0x6ae   :  { %v3988_v44 = vadd.f32 %v3987_v35, %v3974_v27 }
 0x6af   :  { %v3976_v60 = vpop.f32.mrf.mxu1 }
 0x6b0   :  { %v4001_v50 = vadd.f32 %v4000_v31, %v3988_v44  ;;  %v4002_v34 = vpop.f32.mrf.mxu3  ;;  %v4015_v36 = vpop.f32.mrf.mxu0 }
 0x6b2   :  { %6625 = vtanh.f32 %v4001_v50 }
 0x6b5   :  { %v3989_v37 = vpop.f32.mrf.mxu2 }
 0x6b7   :  { %v4026_v38 = vpop.f32.mrf.mxu1 }
 0x6b8   :  { %v6626_v13 = vpop.eup %6625  ;;  %v4052_v39 = vpop.f32.mrf.mxu3  ;;  %v4027_v41 = vadd.f32 %v4026_v38, %v4013_v30 }
 0x6b9   :  { %v4065_v11 = vpop.f32.mrf.mxu0  ;;  %v4085_v40 = vpack.c.bf16 %v6626_v13, %v6626_v13 }
 0x6ba   :  { %v4066_v51 = vadd.f32 %v4065_v11, %v4052_v39 }
 0x6bb   :  { %4289 = vmatmul.bf16.vlgmr.msrb.gmra.mxu2 %v4085_v40 }
 0x6bd   :  { %v4039_v55 = vpop.f32.mrf.mxu2 }
 0x6be   :  { %v4040_v43 = vadd.f32 %v4039_v55, %v4027_v41 }
 0x6bf   :  { %v4028_v46 = vpop.f32.mrf.mxu1 }
 0x6c0   :  { %6627 = vtanh.f32 %v4040_v43  ;;  %v4054_v23 = vpop.f32.mrf.mxu3 }
 0x6c1   :  { %v4067_v49 = vpop.f32.mrf.mxu0 }
 0x6c5   :  { %v4041_v47 = vpop.f32.mrf.mxu2 }
 0x6c6   :  { %v6628_v48 = vpop.eup %6627 }
 0x6c7   :  { %v4086_v33 = vpack.c.bf16 %v6628_v48, %v6628_v48  ;;  %v4078_v52 = vpop.f32.mrf.mxu1 }
 0x6c8   :  { %v4079_v56 = vadd.f32 %v4078_v52, %v4066_v51 }
 0x6c9   :  { %4302 = vmatmul.bf16.vlgmr.msrb.gmra.mxu3 %v4086_v33 }
 0x6ca   :  { %6629 = vtanh.f32 %v4079_v56 }
 0x6cf   :  { %v4080_v58 = vpop.f32.mrf.mxu1 }
 0x6d0   :  { %v6630_v42 = vpop.eup %6629 }
 0x6d1   :  { %v4087_v59 = vpack.c.bf16 %v6630_v42, %v6630_v42 }
 0x6d3   :  { %4315 = vmatmul.bf16.vlgmr.msra.gmra.mxu0 %v4087_v59 }
 0x73e   :  { %v4290_v61 = vpop.f32.mrf.mxu2 }
 0x73f   :  { %v4291_v0 = vadd.f32 %v4290_v61, %v4136_v54 }
 0x746   :  { %v4292_v62 = vpop.f32.mrf.mxu2 }
 0x74c   :  { %v4303_v63 = vpop.f32.mrf.mxu3 }
 0x74d   :  { %v4304_v1 = vadd.f32 %v4303_v63, %v4291_v0 }
 0x750   :  { %v4316_v2 = vpop.f32.mrf.mxu0 }
 0x751   :  { %v4317_v3 = vadd.f32 %v4316_v2, %v4304_v1 }
 0x753   :  { %4320 = vst [vmem:[%s6989_s6] sm:$0xff] %v4317_v3 }
 0x754   :  { %v4305_v4 = vpop.f32.mrf.mxu3 }
 0x758   :  { %v4318_v5 = vpop.f32.mrf.mxu0 }
 0x759   :  { %4325 = vsyncpa [#allocation3], 1 }
 0x75a   :  { %4326 = vsyncpa [#allocation5], 1 }
 0x75b   :  { %4327 = vsyncpa [#allocation8], 1 }

</bundles_post_ra>
